<compile_context>
chip_gen: v6e
topology: v6e:2x2x1
jax: 0.10.0
libtpu: 0.0.40
codegen_flags: <defaults>
</compile_context>

<pallas_src>
import functools

import numpy as np

import jax
import jax.numpy as jnp
from jax import lax
from jax.experimental import pallas as pl
from jax.experimental.pallas import tpu as pltpu


# ------------------------------ parameters -----------------------------------
def init_params(key, variables=1, features=8):
    """Deterministic Conv+BN parameters with BN (eval mode) folded into the conv.

    Returns per layer: (w_hio: (3, C_in, C_out) f32, bias: (C_out,) f32).
    """
    f = features
    dims = [(variables, f), (f, 2 * f), (2 * f, 4 * f), (4 * f, 8 * f),       # encoder (stride 2)
            (8 * f, 4 * f), (4 * f, 2 * f), (2 * f, f), (f, variables)]       # decoder (stride 1)
    eps = 1e-5
    params = []
    for (cin, cout) in dims:
        key, k1, k2, k3, k4, k5, k6 = jax.random.split(key, 7)
        w = 0.1 * jax.random.normal(k1, (cout, cin, 3), jnp.float32)          # Conv2d weight, W axis squeezed
        b = 0.1 * jax.random.normal(k2, (cout,), jnp.float32)
        gamma = 1.0 + 0.1 * jax.random.normal(k3, (cout,), jnp.float32)
        beta = 0.1 * jax.random.normal(k4, (cout,), jnp.float32)
        mean = 0.05 * jax.random.normal(k5, (cout,), jnp.float32)
        var = 1.0 + 0.1 * jnp.abs(jax.random.normal(k6, (cout,), jnp.float32))
        scale = gamma / jnp.sqrt(var + eps)
        w_eff = w * scale[:, None, None]                                      # (cout, cin, 3)
        b_eff = (b - mean) * scale + beta
        w_hio = jnp.transpose(w_eff, (2, 1, 0))                               # (3, cin, cout) == HIO
        params.append((w_hio, b_eff))
    return params


def pack_params(params, variables=1, features=8):
    """Build per-layer block matrices for the coarse-time-block (16-sample) layout.

    For each layer returns (ds, mats, bias_row) where ds is a tuple of coarse-row
    offsets (subset of (-1, 0, 1)), mats[i] is the (fine_in*C_in, fine_out*C_out)
    weight applied to the row at offset ds[i], and bias_row is (1, fine_out*C_out).
    Conv taps, stride-2 downsampling, zero padding and the x16 nearest upsample
    (decoder layer 0) are all folded into these matrices.
    """
    f = features
    enc = [(variables, f), (f, 2 * f), (2 * f, 4 * f), (4 * f, 8 * f)]
    dec = [(8 * f, 4 * f), (4 * f, 2 * f), (2 * f, f), (f, variables)]

    layer_meta = []
    fi = 16
    for (ci, co) in enc:                                  # encoder: stride 2 within the row
        fo = fi // 2
        layer_meta.append(dict(ci=ci, co=co, fi=fi, fo=fo, stride=2, upsample=False))
        fi = fo
    for li, (ci, co) in enumerate(dec):                   # decoder: stride 1, full 16 fine steps
        layer_meta.append(dict(ci=ci, co=co, fi=(1 if li == 0 else 16), fo=16,
                               stride=1, upsample=(li == 0)))

    packed = []
    for meta, (w_hio, b) in zip(layer_meta, params):
        w = np.asarray(jax.device_get(w_hio)).astype(np.float32)      # (3, ci, co)
        bb = np.asarray(jax.device_get(b)).astype(np.float32).reshape(-1)
        ci, co, fi, fo = meta['ci'], meta['co'], meta['fi'], meta['fo']
        mats = {}
        for p in range(fo):                                # output fine position within the row
            for k in range(3):                             # conv tap
                q = meta['stride'] * p + k - 1             # input fine index (input resolution)
                if meta['upsample']:
                    d, j = q // 16, 0                      # x16 nearest upsample folded in
                else:
                    d, j = q // fi, q % fi                 # coarse-row offset / fine index
                m = mats.setdefault(d, np.zeros((fi * ci, fo * co), np.float32))
                m[j * ci:(j + 1) * ci, p * co:(p + 1) * co] += w[k]
        bias = np.tile(bb, fo).reshape(1, fo * co)
        ds = tuple(sorted(mats.keys()))
        packed.append((ds, tuple(jnp.asarray(mats[d]) for d in ds), jnp.asarray(bias)))
    return packed


# ------------------------------ fused kernel ----------------------------------
def _build_pallas_call(N, H, variables, features, packed):
    V, f = variables, features
    assert H % 16 == 0, "time length must be divisible by 16"
    nr = H // 16                       # coarse rows (16 time samples each)
    DOFF = 8                           # payload starts at a sublane-aligned row
    R = nr + 16                        # halo rows at DOFF-1 and DOFF+nr, rounded up
    CHUNK = 256                        # coarse rows (4096 samples) processed per step

    widths = {'x': 16 * V, 'e0': 8 * f, 'e1': 8 * f,
              'da': 64 * f, 'db': 32 * f, 'dc': 16 * f}
    buf_names = ('x', 'e0', 'e1', 'da', 'db', 'dc')
    # (src buffer, dst buffer) per layer; encoder ping-pongs e0/e1, decoder da->db->dc->out.
    plan = [('x', 'e0'), ('e0', 'e1'), ('e1', 'e0'), ('e0', 'e1'),
            ('e1', 'da'), ('da', 'db'), ('db', 'dc'), ('dc', 'out')]
    ds_list = [p[0] for p in packed]
    n_w = sum(len(ds) + 1 for ds in ds_list)              # mats + bias per layer

    def kernel(*refs):
        x_ref = refs[0]
        wrefs = refs[1:1 + n_w]
        o_ref = refs[1 + n_w]
        bufs = dict(zip(buf_names, refs[2 + n_w:2 + n_w + len(buf_names)]))

        # zero the halo rows of every buffer (conv zero padding at both ends)
        for name in buf_names:
            z = jnp.zeros((1, widths[name]), jnp.float32)
            bufs[name][pl.ds(DOFF - 1, 1), :] = z
            bufs[name][pl.ds(DOFF + nr, 1), :] = z

        # stage this batch element's input rows (lane-dense block) into the halo buffer
        bufs['x'][pl.ds(DOFF, nr), :] = x_ref[0, :, :].astype(jnp.float32)

        wi = 0
        for (src, dst), ds in zip(plan, ds_list):
            mats = wrefs[wi:wi + len(ds)]
            bias = wrefs[wi + len(ds)]
            wi += len(ds) + 1
            src_ref = bufs[src]
            for c0 in range(0, nr, CHUNK):                # static row-chunk loop
                cs = min(CHUNK, nr - c0)
                acc = None
                for d, m in zip(ds, mats):                # 2 (encoder) / 3 (decoder) matmuls
                    xk = src_ref[pl.ds(DOFF + c0 + d, cs), :]
                    t = jnp.dot(xk, m[...], preferred_element_type=jnp.float32)
                    acc = t if acc is None else acc + t
                y = jnp.maximum(acc + bias[...], 0.0)     # folded BN bias + ReLU
                if dst == 'out':
                    o_ref[0, pl.ds(c0, cs), :] = y.astype(o_ref.dtype)
                else:
                    bufs[dst][pl.ds(DOFF + c0, cs), :] = y

    in_specs = [pl.BlockSpec((1, nr, 16 * V), lambda n: (n, 0, 0))]
    flat_w = []
    for ds, mats, bias in packed:
        for m in mats:
            in_specs.append(pl.BlockSpec(m.shape, lambda n: (0, 0)))
            flat_w.append(m)
        in_specs.append(pl.BlockSpec(bias.shape, lambda n: (0, 0)))
        flat_w.append(bias)

    scratch = [pltpu.VMEM((R, widths[k]), jnp.float32) for k in buf_names]

    # VMEM footprint estimate ((8,128)-padded) -> pass an explicit, adequate limit.
    def _pad2(r, c):
        return ((r + 7) // 8 * 8) * ((c + 127) // 128 * 128) * 4
    est = 4 * _pad2(nr, 16 * V)                                    # in/out blocks, double-buffered
    est += sum(_pad2(R, widths[k]) for k in buf_names)             # scratch
    est += sum(2 * _pad2(a.shape[0], a.shape[1]) for a in flat_w)  # weight blocks
    vmem_limit = int(min(max(est + (4 << 20), 16 << 20), 100 << 20))

    call = pl.pallas_call(
        kernel,
        grid=(N,),
        out_shape=jax.ShapeDtypeStruct((N, nr, 16 * V), jnp.float32),
        in_specs=in_specs,
        out_specs=pl.BlockSpec((1, nr, 16 * V), lambda n: (n, 0, 0)),
        scratch_shapes=scratch,
        compiler_params=pltpu.CompilerParams(
            dimension_semantics=("parallel",),     # shards batch over v7x's 2 TCs
            vmem_limit_bytes=vmem_limit,
        ),
    )
    return call, flat_w


# --------------------------------- wrapper ------------------------------------
def forward(x_nchw, packed, variables, features):
    """x_nchw: (N, variables, H, 1) -> (N, variables, H, 1)."""
    n, v, h, w = x_nchw.shape
    assert w == 1 and h % 16 == 0 and v == variables
    # (N, V, H, 1) -> (N, H/16, 16*V); for V == 1 this is a pure reshape (no data movement).
    x = jnp.transpose(x_nchw[..., 0], (0, 2, 1)).reshape(n, h // 16, 16 * v)
    call, flat_w = _build_pallas_call(n, h, variables, features, packed)
    y = call(x, *flat_w)                                  # (N, H/16, 16*V)
    y = y.reshape(n, h, v)
    return jnp.transpose(y, (0, 2, 1))[..., None]         # back to NCHW (N, V, H, 1)


# ---------------------- pure-JAX reference (for checking) ---------------------
def reference_forward(x_nchw, params):
    x = jnp.transpose(x_nchw[..., 0], (0, 2, 1))          # (N, H, V)

    def conv(x, w_hio, b, stride):
        y = lax.conv_general_dilated(x, w_hio, window_strides=(stride,),
                                     padding=((1, 1),),
                                     dimension_numbers=('NHC', 'HIO', 'NHC'))
        return jnp.maximum(y + b, 0.0)

    for i in range(4):                                    # encoder
        x = conv(x, params[i][0], params[i][1], 2)
    x = jnp.repeat(x, 16, axis=1)                         # 4x nearest (2,1) upsample
    for i in range(4, 8):                                 # decoder
        x = conv(x, params[i][0], params[i][1], 1)
    return jnp.transpose(x, (0, 2, 1))[..., None]


if __name__ == "__main__":
    key = jax.random.PRNGKey(0)
    kx, kp = jax.random.split(key)

    # Small shapes consistent with the module: batch=2, variables=1, time=128, W=1.
    N, V, H, F = 2, 1, 128, 8
    x = jax.random.normal(kx, (N, V, H, 1), jnp.float32)
    params = init_params(kp, variables=V, features=F)
    packed = pack_params(params, variables=V, features=F)

    fwd = jax.jit(lambda xx: forward(xx, packed, V, F))
    out = jax.block_until_ready(fwd(x))
    assert out.shape == (N, V, H, 1), out.shape

    ref = jax.block_until_ready(reference_forward(x, params))
    max_err = float(jnp.max(jnp.abs(out - ref)))
    assert jnp.allclose(out, ref, rtol=1e-2, atol=2e-3), max_err

    # Secondary check at a longer length so the multi-chunk path is exercised.
    H2, N2 = 8192, 1
    x2 = jax.random.normal(jax.random.PRNGKey(1), (N2, V, H2, 1), jnp.float32)
    out2 = jax.block_until_ready(jax.jit(lambda xx: forward(xx, packed, V, F))(x2))
    ref2 = jax.block_until_ready(reference_forward(x2, params))
    max_err2 = float(jnp.max(jnp.abs(out2 - ref2)))
    assert out2.shape == (N2, V, H2, 1), out2.shape
    assert jnp.allclose(out2, ref2, rtol=1e-2, atol=2e-3), max_err2

    print("KERNEL_OK")
</pallas_src>

<mosaic_0001>
module attributes {stable_mosaic.version = 11 : i64} {
  func.func @kernel(%arg0: i32, %arg1: memref<1x8x16xf32, #tpu.memory_space<vmem>>, %arg2: memref<16x64xf32, #tpu.memory_space<vmem>>, %arg3: memref<16x64xf32, #tpu.memory_space<vmem>>, %arg4: memref<1x64xf32, #tpu.memory_space<vmem>>, %arg5: memref<64x64xf32, #tpu.memory_space<vmem>>, %arg6: memref<64x64xf32, #tpu.memory_space<vmem>>, %arg7: memref<1x64xf32, #tpu.memory_space<vmem>>, %arg8: memref<64x64xf32, #tpu.memory_space<vmem>>, %arg9: memref<64x64xf32, #tpu.memory_space<vmem>>, %arg10: memref<1x64xf32, #tpu.memory_space<vmem>>, %arg11: memref<64x64xf32, #tpu.memory_space<vmem>>, %arg12: memref<64x64xf32, #tpu.memory_space<vmem>>, %arg13: memref<1x64xf32, #tpu.memory_space<vmem>>, %arg14: memref<64x512xf32, #tpu.memory_space<vmem>>, %arg15: memref<64x512xf32, #tpu.memory_space<vmem>>, %arg16: memref<64x512xf32, #tpu.memory_space<vmem>>, %arg17: memref<1x512xf32, #tpu.memory_space<vmem>>, %arg18: memref<512x256xf32, #tpu.memory_space<vmem>>, %arg19: memref<512x256xf32, #tpu.memory_space<vmem>>, %arg20: memref<512x256xf32, #tpu.memory_space<vmem>>, %arg21: memref<1x256xf32, #tpu.memory_space<vmem>>, %arg22: memref<256x128xf32, #tpu.memory_space<vmem>>, %arg23: memref<256x128xf32, #tpu.memory_space<vmem>>, %arg24: memref<256x128xf32, #tpu.memory_space<vmem>>, %arg25: memref<1x128xf32, #tpu.memory_space<vmem>>, %arg26: memref<128x16xf32, #tpu.memory_space<vmem>>, %arg27: memref<128x16xf32, #tpu.memory_space<vmem>>, %arg28: memref<128x16xf32, #tpu.memory_space<vmem>>, %arg29: memref<1x16xf32, #tpu.memory_space<vmem>>, %arg30: memref<1x8x16xf32, #tpu.memory_space<vmem>>, %arg31: memref<24x16xf32, #tpu.memory_space<vmem>>, %arg32: memref<24x64xf32, #tpu.memory_space<vmem>>, %arg33: memref<24x64xf32, #tpu.memory_space<vmem>>, %arg34: memref<24x512xf32, #tpu.memory_space<vmem>>, %arg35: memref<24x256xf32, #tpu.memory_space<vmem>>, %arg36: memref<24x128xf32, #tpu.memory_space<vmem>>) attributes {dimension_semantics = [#tpu.dimension_semantics<parallel>], iteration_bounds = array<i64: 2>, scalar_prefetch = 0 : i64, scratch_operands = 6 : i64, tpu.core_type = #tpu.core_type<tc>, window_params = [{transform_indices = @transform_0, window_bounds = array<i64: 1, 8, 16>}, {pipeline_mode = #tpu.pipeline_mode<synchronous>, transform_indices = @transform_1, window_bounds = array<i64: 16, 64>}, {pipeline_mode = #tpu.pipeline_mode<synchronous>, transform_indices = @transform_2, window_bounds = array<i64: 16, 64>}, {pipeline_mode = #tpu.pipeline_mode<synchronous>, transform_indices = @transform_3, window_bounds = array<i64: 1, 64>}, {pipeline_mode = #tpu.pipeline_mode<synchronous>, transform_indices = @transform_4, window_bounds = array<i64: 64, 64>}, {pipeline_mode = #tpu.pipeline_mode<synchronous>, transform_indices = @transform_5, window_bounds = array<i64: 64, 64>}, {pipeline_mode = #tpu.pipeline_mode<synchronous>, transform_indices = @transform_6, window_bounds = array<i64: 1, 64>}, {pipeline_mode = #tpu.pipeline_mode<synchronous>, transform_indices = @transform_7, window_bounds = array<i64: 64, 64>}, {pipeline_mode = #tpu.pipeline_mode<synchronous>, transform_indices = @transform_8, window_bounds = array<i64: 64, 64>}, {pipeline_mode = #tpu.pipeline_mode<synchronous>, transform_indices = @transform_9, window_bounds = array<i64: 1, 64>}, {pipeline_mode = #tpu.pipeline_mode<synchronous>, transform_indices = @transform_10, window_bounds = array<i64: 64, 64>}, {pipeline_mode = #tpu.pipeline_mode<synchronous>, transform_indices = @transform_11, window_bounds = array<i64: 64, 64>}, {pipeline_mode = #tpu.pipeline_mode<synchronous>, transform_indices = @transform_12, window_bounds = array<i64: 1, 64>}, {pipeline_mode = #tpu.pipeline_mode<synchronous>, transform_indices = @transform_13, window_bounds = array<i64: 64, 512>}, {pipeline_mode = #tpu.pipeline_mode<synchronous>, transform_indices = @transform_14, window_bounds = array<i64: 64, 512>}, {pipeline_mode = #tpu.pipeline_mode<synchronous>, transform_indices = @transform_15, window_bounds = array<i64: 64, 512>}, {pipeline_mode = #tpu.pipeline_mode<synchronous>, transform_indices = @transform_16, window_bounds = array<i64: 1, 512>}, {pipeline_mode = #tpu.pipeline_mode<synchronous>, transform_indices = @transform_17, window_bounds = array<i64: 512, 256>}, {pipeline_mode = #tpu.pipeline_mode<synchronous>, transform_indices = @transform_18, window_bounds = array<i64: 512, 256>}, {pipeline_mode = #tpu.pipeline_mode<synchronous>, transform_indices = @transform_19, window_bounds = array<i64: 512, 256>}, {pipeline_mode = #tpu.pipeline_mode<synchronous>, transform_indices = @transform_20, window_bounds = array<i64: 1, 256>}, {pipeline_mode = #tpu.pipeline_mode<synchronous>, transform_indices = @transform_21, window_bounds = array<i64: 256, 128>}, {pipeline_mode = #tpu.pipeline_mode<synchronous>, transform_indices = @transform_22, window_bounds = array<i64: 256, 128>}, {pipeline_mode = #tpu.pipeline_mode<synchronous>, transform_indices = @transform_23, window_bounds = array<i64: 256, 128>}, {pipeline_mode = #tpu.pipeline_mode<synchronous>, transform_indices = @transform_24, window_bounds = array<i64: 1, 128>}, {pipeline_mode = #tpu.pipeline_mode<synchronous>, transform_indices = @transform_25, window_bounds = array<i64: 128, 16>}, {pipeline_mode = #tpu.pipeline_mode<synchronous>, transform_indices = @transform_26, window_bounds = array<i64: 128, 16>}, {pipeline_mode = #tpu.pipeline_mode<synchronous>, transform_indices = @transform_27, window_bounds = array<i64: 128, 16>}, {pipeline_mode = #tpu.pipeline_mode<synchronous>, transform_indices = @transform_28, window_bounds = array<i64: 1, 16>}, {transform_indices = @transform_29, window_bounds = array<i64: 1, 8, 16>}]} {
    %cst = arith.constant 0.000000e+00 : f32
    %0 = vector.broadcast %cst : f32 to vector<1x16xf32>
    %c7 = arith.constant 7 : index
    %c0 = arith.constant 0 : index
    %1 = vector.load %arg31[%c7, %c0] : memref<24x16xf32, #tpu.memory_space<vmem>>, vector<1x16xf32>
    tpu.vector_store %arg31[%c7, %c0], %0 {strides = array<i32>} : memref<24x16xf32, #tpu.memory_space<vmem>>, vector<1x16xf32>,
    %c16 = arith.constant 16 : index
    %c0_0 = arith.constant 0 : index
    %2 = vector.load %arg31[%c16, %c0_0] : memref<24x16xf32, #tpu.memory_space<vmem>>, vector<1x16xf32>
    tpu.vector_store %arg31[%c16, %c0_0], %0 {strides = array<i32>} : memref<24x16xf32, #tpu.memory_space<vmem>>, vector<1x16xf32>,
    %cst_1 = arith.constant 0.000000e+00 : f32
    %3 = vector.broadcast %cst_1 : f32 to vector<1x64xf32>
    %c7_2 = arith.constant 7 : index
    %c0_3 = arith.constant 0 : index
    %4 = vector.load %arg32[%c7_2, %c0_3] : memref<24x64xf32, #tpu.memory_space<vmem>>, vector<1x64xf32>
    tpu.vector_store %arg32[%c7_2, %c0_3], %3 {strides = array<i32>} : memref<24x64xf32, #tpu.memory_space<vmem>>, vector<1x64xf32>,
    %c16_4 = arith.constant 16 : index
    %c0_5 = arith.constant 0 : index
    %5 = vector.load %arg32[%c16_4, %c0_5] : memref<24x64xf32, #tpu.memory_space<vmem>>, vector<1x64xf32>
    tpu.vector_store %arg32[%c16_4, %c0_5], %3 {strides = array<i32>} : memref<24x64xf32, #tpu.memory_space<vmem>>, vector<1x64xf32>,
    %cst_6 = arith.constant 0.000000e+00 : f32
    %6 = vector.broadcast %cst_6 : f32 to vector<1x64xf32>
    %c7_7 = arith.constant 7 : index
    %c0_8 = arith.constant 0 : index
    %7 = vector.load %arg33[%c7_7, %c0_8] : memref<24x64xf32, #tpu.memory_space<vmem>>, vector<1x64xf32>
    tpu.vector_store %arg33[%c7_7, %c0_8], %6 {strides = array<i32>} : memref<24x64xf32, #tpu.memory_space<vmem>>, vector<1x64xf32>,
    %c16_9 = arith.constant 16 : index
    %c0_10 = arith.constant 0 : index
    %8 = vector.load %arg33[%c16_9, %c0_10] : memref<24x64xf32, #tpu.memory_space<vmem>>, vector<1x64xf32>
    tpu.vector_store %arg33[%c16_9, %c0_10], %6 {strides = array<i32>} : memref<24x64xf32, #tpu.memory_space<vmem>>, vector<1x64xf32>,
    %cst_11 = arith.constant 0.000000e+00 : f32
    %9 = vector.broadcast %cst_11 : f32 to vector<1x512xf32>
    %c7_12 = arith.constant 7 : index
    %c0_13 = arith.constant 0 : index
    %10 = vector.load %arg34[%c7_12, %c0_13] : memref<24x512xf32, #tpu.memory_space<vmem>>, vector<1x512xf32>
    tpu.vector_store %arg34[%c7_12, %c0_13], %9 {strides = array<i32>} : memref<24x512xf32, #tpu.memory_space<vmem>>, vector<1x512xf32>,
    %c16_14 = arith.constant 16 : index
    %c0_15 = arith.constant 0 : index
    %11 = vector.load %arg34[%c16_14, %c0_15] : memref<24x512xf32, #tpu.memory_space<vmem>>, vector<1x512xf32>
    tpu.vector_store %arg34[%c16_14, %c0_15], %9 {strides = array<i32>} : memref<24x512xf32, #tpu.memory_space<vmem>>, vector<1x512xf32>,
    %cst_16 = arith.constant 0.000000e+00 : f32
    %12 = vector.broadcast %cst_16 : f32 to vector<1x256xf32>
    %c7_17 = arith.constant 7 : index
    %c0_18 = arith.constant 0 : index
    %13 = vector.load %arg35[%c7_17, %c0_18] : memref<24x256xf32, #tpu.memory_space<vmem>>, vector<1x256xf32>
    tpu.vector_store %arg35[%c7_17, %c0_18], %12 {strides = array<i32>} : memref<24x256xf32, #tpu.memory_space<vmem>>, vector<1x256xf32>,
    %c16_19 = arith.constant 16 : index
    %c0_20 = arith.constant 0 : index
    %14 = vector.load %arg35[%c16_19, %c0_20] : memref<24x256xf32, #tpu.memory_space<vmem>>, vector<1x256xf32>
    tpu.vector_store %arg35[%c16_19, %c0_20], %12 {strides = array<i32>} : memref<24x256xf32, #tpu.memory_space<vmem>>, vector<1x256xf32>,
    %cst_21 = arith.constant 0.000000e+00 : f32
    %15 = vector.broadcast %cst_21 : f32 to vector<1x128xf32>
    %c7_22 = arith.constant 7 : index
    %c0_23 = arith.constant 0 : index
    %16 = vector.load %arg36[%c7_22, %c0_23] : memref<24x128xf32, #tpu.memory_space<vmem>>, vector<1x128xf32>
    tpu.vector_store %arg36[%c7_22, %c0_23], %15 {strides = array<i32>} : memref<24x128xf32, #tpu.memory_space<vmem>>, vector<1x128xf32>,
    %c16_24 = arith.constant 16 : index
    %c0_25 = arith.constant 0 : index
    %17 = vector.load %arg36[%c16_24, %c0_25] : memref<24x128xf32, #tpu.memory_space<vmem>>, vector<1x128xf32>
    tpu.vector_store %arg36[%c16_24, %c0_25], %15 {strides = array<i32>} : memref<24x128xf32, #tpu.memory_space<vmem>>, vector<1x128xf32>,
    %c0_26 = arith.constant 0 : index
    %c0_27 = arith.constant 0 : index
    %c0_28 = arith.constant 0 : index
    %18 = vector.load %arg1[%c0_26, %c0_27, %c0_28] : memref<1x8x16xf32, #tpu.memory_space<vmem>>, vector<1x8x16xf32>
    %19 = vector.shape_cast %18 : vector<1x8x16xf32> to vector<8x16xf32>
    %c8 = arith.constant 8 : index
    %c0_29 = arith.constant 0 : index
    %20 = vector.load %arg31[%c8, %c0_29] : memref<24x16xf32, #tpu.memory_space<vmem>>, vector<8x16xf32>
    tpu.vector_store %arg31[%c8, %c0_29], %19 {strides = array<i32>} : memref<24x16xf32, #tpu.memory_space<vmem>>, vector<8x16xf32>,
    %c7_30 = arith.constant 7 : index
    %c0_31 = arith.constant 0 : index
    %21 = vector.load %arg31[%c7_30, %c0_31] : memref<24x16xf32, #tpu.memory_space<vmem>>, vector<8x16xf32>
    %c0_32 = arith.constant 0 : index
    %c0_33 = arith.constant 0 : index
    %22 = vector.load %arg2[%c0_32, %c0_33] : memref<16x64xf32, #tpu.memory_space<vmem>>, vector<16x64xf32>
    %cst_34 = arith.constant dense<0.000000e+00> : vector<8x64xf32>
    %23 = tpu.matmul %21, %22, %cst_34 {dimension_numbers = #tpu.dot_dimension_numbers<[1], [0], [0], [1], [0, 0, 1, 1], [], []>} : vector<8x16xf32>, vector<16x64xf32>, vector<8x64xf32> -> vector<8x64xf32>
    %c8_35 = arith.constant 8 : index
    %c0_36 = arith.constant 0 : index
    %24 = vector.load %arg31[%c8_35, %c0_36] : memref<24x16xf32, #tpu.memory_space<vmem>>, vector<8x16xf32>
    %c0_37 = arith.constant 0 : index
    %c0_38 = arith.constant 0 : index
    %25 = vector.load %arg3[%c0_37, %c0_38] : memref<16x64xf32, #tpu.memory_space<vmem>>, vector<16x64xf32>
    %cst_39 = arith.constant dense<0.000000e+00> : vector<8x64xf32>
    %26 = tpu.matmul %24, %25, %cst_39 {dimension_numbers = #tpu.dot_dimension_numbers<[1], [0], [0], [1], [0, 0, 1, 1], [], []>} : vector<8x16xf32>, vector<16x64xf32>, vector<8x64xf32> -> vector<8x64xf32>
    %27 = arith.addf %23, %26 : vector<8x64xf32>
    %c0_40 = arith.constant 0 : index
    %c0_41 = arith.constant 0 : index
    %28 = vector.load %arg4[%c0_40, %c0_41] : memref<1x64xf32, #tpu.memory_space<vmem>>, vector<1x64xf32>
    %29 = vector.broadcast %28 : vector<1x64xf32> to vector<8x64xf32>
    %30 = arith.addf %27, %29 : vector<8x64xf32>
    %cst_42 = arith.constant 0.000000e+00 : f32
    %31 = vector.broadcast %cst_42 : f32 to vector<8x64xf32>
    %32 = arith.maximumf %30, %31 : vector<8x64xf32>
    %c8_43 = arith.constant 8 : index
    %c0_44 = arith.constant 0 : index
    %33 = vector.load %arg32[%c8_43, %c0_44] : memref<24x64xf32, #tpu.memory_space<vmem>>, vector<8x64xf32>
    tpu.vector_store %arg32[%c8_43, %c0_44], %32 {strides = array<i32>} : memref<24x64xf32, #tpu.memory_space<vmem>>, vector<8x64xf32>,
    %c7_45 = arith.constant 7 : index
    %c0_46 = arith.constant 0 : index
    %34 = vector.load %arg32[%c7_45, %c0_46] : memref<24x64xf32, #tpu.memory_space<vmem>>, vector<8x64xf32>
    %c0_47 = arith.constant 0 : index
    %c0_48 = arith.constant 0 : index
    %35 = vector.load %arg5[%c0_47, %c0_48] : memref<64x64xf32, #tpu.memory_space<vmem>>, vector<64x64xf32>
    %cst_49 = arith.constant dense<0.000000e+00> : vector<8x64xf32>
    %36 = tpu.matmul %34, %35, %cst_49 {dimension_numbers = #tpu.dot_dimension_numbers<[1], [0], [0], [1], [0, 0, 1, 1], [], []>} : vector<8x64xf32>, vector<64x64xf32>, vector<8x64xf32> -> vector<8x64xf32>
    %c8_50 = arith.constant 8 : index
    %c0_51 = arith.constant 0 : index
    %37 = vector.load %arg32[%c8_50, %c0_51] : memref<24x64xf32, #tpu.memory_space<vmem>>, vector<8x64xf32>
    %c0_52 = arith.constant 0 : index
    %c0_53 = arith.constant 0 : index
    %38 = vector.load %arg6[%c0_52, %c0_53] : memref<64x64xf32, #tpu.memory_space<vmem>>, vector<64x64xf32>
    %cst_54 = arith.constant dense<0.000000e+00> : vector<8x64xf32>
    %39 = tpu.matmul %37, %38, %cst_54 {dimension_numbers = #tpu.dot_dimension_numbers<[1], [0], [0], [1], [0, 0, 1, 1], [], []>} : vector<8x64xf32>, vector<64x64xf32>, vector<8x64xf32> -> vector<8x64xf32>
    %40 = arith.addf %36, %39 : vector<8x64xf32>
    %c0_55 = arith.constant 0 : index
    %c0_56 = arith.constant 0 : index
    %41 = vector.load %arg7[%c0_55, %c0_56] : memref<1x64xf32, #tpu.memory_space<vmem>>, vector<1x64xf32>
    %42 = vector.broadcast %41 : vector<1x64xf32> to vector<8x64xf32>
    %43 = arith.addf %40, %42 : vector<8x64xf32>
    %cst_57 = arith.constant 0.000000e+00 : f32
    %44 = vector.broadcast %cst_57 : f32 to vector<8x64xf32>
    %45 = arith.maximumf %43, %44 : vector<8x64xf32>
    %c8_58 = arith.constant 8 : index
    %c0_59 = arith.constant 0 : index
    %46 = vector.load %arg33[%c8_58, %c0_59] : memref<24x64xf32, #tpu.memory_space<vmem>>, vector<8x64xf32>
    tpu.vector_store %arg33[%c8_58, %c0_59], %45 {strides = array<i32>} : memref<24x64xf32, #tpu.memory_space<vmem>>, vector<8x64xf32>,
    %c7_60 = arith.constant 7 : index
    %c0_61 = arith.constant 0 : index
    %47 = vector.load %arg33[%c7_60, %c0_61] : memref<24x64xf32, #tpu.memory_space<vmem>>, vector<8x64xf32>
    %c0_62 = arith.constant 0 : index
    %c0_63 = arith.constant 0 : index
    %48 = vector.load %arg8[%c0_62, %c0_63] : memref<64x64xf32, #tpu.memory_space<vmem>>, vector<64x64xf32>
    %cst_64 = arith.constant dense<0.000000e+00> : vector<8x64xf32>
    %49 = tpu.matmul %47, %48, %cst_64 {dimension_numbers = #tpu.dot_dimension_numbers<[1], [0], [0], [1], [0, 0, 1, 1], [], []>} : vector<8x64xf32>, vector<64x64xf32>, vector<8x64xf32> -> vector<8x64xf32>
    %c8_65 = arith.constant 8 : index
    %c0_66 = arith.constant 0 : index
    %50 = vector.load %arg33[%c8_65, %c0_66] : memref<24x64xf32, #tpu.memory_space<vmem>>, vector<8x64xf32>
    %c0_67 = arith.constant 0 : index
    %c0_68 = arith.constant 0 : index
    %51 = vector.load %arg9[%c0_67, %c0_68] : memref<64x64xf32, #tpu.memory_space<vmem>>, vector<64x64xf32>
    %cst_69 = arith.constant dense<0.000000e+00> : vector<8x64xf32>
    %52 = tpu.matmul %50, %51, %cst_69 {dimension_numbers = #tpu.dot_dimension_numbers<[1], [0], [0], [1], [0, 0, 1, 1], [], []>} : vector<8x64xf32>, vector<64x64xf32>, vector<8x64xf32> -> vector<8x64xf32>
    %53 = arith.addf %49, %52 : vector<8x64xf32>
    %c0_70 = arith.constant 0 : index
    %c0_71 = arith.constant 0 : index
    %54 = vector.load %arg10[%c0_70, %c0_71] : memref<1x64xf32, #tpu.memory_space<vmem>>, vector<1x64xf32>
    %55 = vector.broadcast %54 : vector<1x64xf32> to vector<8x64xf32>
    %56 = arith.addf %53, %55 : vector<8x64xf32>
    %cst_72 = arith.constant 0.000000e+00 : f32
    %57 = vector.broadcast %cst_72 : f32 to vector<8x64xf32>
    %58 = arith.maximumf %56, %57 : vector<8x64xf32>
    %c8_73 = arith.constant 8 : index
    %c0_74 = arith.constant 0 : index
    %59 = vector.load %arg32[%c8_73, %c0_74] : memref<24x64xf32, #tpu.memory_space<vmem>>, vector<8x64xf32>
    tpu.vector_store %arg32[%c8_73, %c0_74], %58 {strides = array<i32>} : memref<24x64xf32, #tpu.memory_space<vmem>>, vector<8x64xf32>,
    %c7_75 = arith.constant 7 : index
    %c0_76 = arith.constant 0 : index
    %60 = vector.load %arg32[%c7_75, %c0_76] : memref<24x64xf32, #tpu.memory_space<vmem>>, vector<8x64xf32>
    %c0_77 = arith.constant 0 : index
    %c0_78 = arith.constant 0 : index
    %61 = vector.load %arg11[%c0_77, %c0_78] : memref<64x64xf32, #tpu.memory_space<vmem>>, vector<64x64xf32>
    %cst_79 = arith.constant dense<0.000000e+00> : vector<8x64xf32>
    %62 = tpu.matmul %60, %61, %cst_79 {dimension_numbers = #tpu.dot_dimension_numbers<[1], [0], [0], [1], [0, 0, 1, 1], [], []>} : vector<8x64xf32>, vector<64x64xf32>, vector<8x64xf32> -> vector<8x64xf32>
    %c8_80 = arith.constant 8 : index
    %c0_81 = arith.constant 0 : index
    %63 = vector.load %arg32[%c8_80, %c0_81] : memref<24x64xf32, #tpu.memory_space<vmem>>, vector<8x64xf32>
    %c0_82 = arith.constant 0 : index
    %c0_83 = arith.constant 0 : index
    %64 = vector.load %arg12[%c0_82, %c0_83] : memref<64x64xf32, #tpu.memory_space<vmem>>, vector<64x64xf32>
    %cst_84 = arith.constant dense<0.000000e+00> : vector<8x64xf32>
    %65 = tpu.matmul %63, %64, %cst_84 {dimension_numbers = #tpu.dot_dimension_numbers<[1], [0], [0], [1], [0, 0, 1, 1], [], []>} : vector<8x64xf32>, vector<64x64xf32>, vector<8x64xf32> -> vector<8x64xf32>
    %66 = arith.addf %62, %65 : vector<8x64xf32>
    %c0_85 = arith.constant 0 : index
    %c0_86 = arith.constant 0 : index
    %67 = vector.load %arg13[%c0_85, %c0_86] : memref<1x64xf32, #tpu.memory_space<vmem>>, vector<1x64xf32>
    %68 = vector.broadcast %67 : vector<1x64xf32> to vector<8x64xf32>
    %69 = arith.addf %66, %68 : vector<8x64xf32>
    %cst_87 = arith.constant 0.000000e+00 : f32
    %70 = vector.broadcast %cst_87 : f32 to vector<8x64xf32>
    %71 = arith.maximumf %69, %70 : vector<8x64xf32>
    %c8_88 = arith.constant 8 : index
    %c0_89 = arith.constant 0 : index
    %72 = vector.load %arg33[%c8_88, %c0_89] : memref<24x64xf32, #tpu.memory_space<vmem>>, vector<8x64xf32>
    tpu.vector_store %arg33[%c8_88, %c0_89], %71 {strides = array<i32>} : memref<24x64xf32, #tpu.memory_space<vmem>>, vector<8x64xf32>,
    %c7_90 = arith.constant 7 : index
    %c0_91 = arith.constant 0 : index
    %73 = vector.load %arg33[%c7_90, %c0_91] : memref<24x64xf32, #tpu.memory_space<vmem>>, vector<8x64xf32>
    %c0_92 = arith.constant 0 : index
    %c0_93 = arith.constant 0 : index
    %74 = vector.load %arg14[%c0_92, %c0_93] : memref<64x512xf32, #tpu.memory_space<vmem>>, vector<64x512xf32>
    %cst_94 = arith.constant dense<0.000000e+00> : vector<8x512xf32>
    %75 = tpu.matmul %73, %74, %cst_94 {dimension_numbers = #tpu.dot_dimension_numbers<[1], [0], [0], [1], [0, 0, 1, 1], [], []>} : vector<8x64xf32>, vector<64x512xf32>, vector<8x512xf32> -> vector<8x512xf32>
    %c8_95 = arith.constant 8 : index
    %c0_96 = arith.constant 0 : index
    %76 = vector.load %arg33[%c8_95, %c0_96] : memref<24x64xf32, #tpu.memory_space<vmem>>, vector<8x64xf32>
    %c0_97 = arith.constant 0 : index
    %c0_98 = arith.constant 0 : index
    %77 = vector.load %arg15[%c0_97, %c0_98] : memref<64x512xf32, #tpu.memory_space<vmem>>, vector<64x512xf32>
    %cst_99 = arith.constant dense<0.000000e+00> : vector<8x512xf32>
    %78 = tpu.matmul %76, %77, %cst_99 {dimension_numbers = #tpu.dot_dimension_numbers<[1], [0], [0], [1], [0, 0, 1, 1], [], []>} : vector<8x64xf32>, vector<64x512xf32>, vector<8x512xf32> -> vector<8x512xf32>
    %79 = arith.addf %75, %78 : vector<8x512xf32>
    %c9 = arith.constant 9 : index
    %c0_100 = arith.constant 0 : index
    %80 = vector.load %arg33[%c9, %c0_100] : memref<24x64xf32, #tpu.memory_space<vmem>>, vector<8x64xf32>
    %c0_101 = arith.constant 0 : index
    %c0_102 = arith.constant 0 : index
    %81 = vector.load %arg16[%c0_101, %c0_102] : memref<64x512xf32, #tpu.memory_space<vmem>>, vector<64x512xf32>
    %cst_103 = arith.constant dense<0.000000e+00> : vector<8x512xf32>
    %82 = tpu.matmul %80, %81, %cst_103 {dimension_numbers = #tpu.dot_dimension_numbers<[1], [0], [0], [1], [0, 0, 1, 1], [], []>} : vector<8x64xf32>, vector<64x512xf32>, vector<8x512xf32> -> vector<8x512xf32>
    %83 = arith.addf %79, %82 : vector<8x512xf32>
    %c0_104 = arith.constant 0 : index
    %c0_105 = arith.constant 0 : index
    %84 = vector.load %arg17[%c0_104, %c0_105] : memref<1x512xf32, #tpu.memory_space<vmem>>, vector<1x512xf32>
    %85 = vector.broadcast %84 : vector<1x512xf32> to vector<8x512xf32>
    %86 = arith.addf %83, %85 : vector<8x512xf32>
    %cst_106 = arith.constant 0.000000e+00 : f32
    %87 = vector.broadcast %cst_106 : f32 to vector<8x512xf32>
    %88 = arith.maximumf %86, %87 : vector<8x512xf32>
    %c8_107 = arith.constant 8 : index
    %c0_108 = arith.constant 0 : index
    %89 = vector.load %arg34[%c8_107, %c0_108] : memref<24x512xf32, #tpu.memory_space<vmem>>, vector<8x512xf32>
    tpu.vector_store %arg34[%c8_107, %c0_108], %88 {strides = array<i32>} : memref<24x512xf32, #tpu.memory_space<vmem>>, vector<8x512xf32>,
    %c7_109 = arith.constant 7 : index
    %c0_110 = arith.constant 0 : index
    %90 = vector.load %arg34[%c7_109, %c0_110] : memref<24x512xf32, #tpu.memory_space<vmem>>, vector<8x512xf32>
    %c0_111 = arith.constant 0 : index
    %c0_112 = arith.constant 0 : index
    %91 = vector.load %arg18[%c0_111, %c0_112] : memref<512x256xf32, #tpu.memory_space<vmem>>, vector<512x256xf32>
    %cst_113 = arith.constant dense<0.000000e+00> : vector<8x256xf32>
    %92 = tpu.matmul %90, %91, %cst_113 {dimension_numbers = #tpu.dot_dimension_numbers<[1], [0], [0], [1], [0, 0, 1, 1], [], []>} : vector<8x512xf32>, vector<512x256xf32>, vector<8x256xf32> -> vector<8x256xf32>
    %c8_114 = arith.constant 8 : index
    %c0_115 = arith.constant 0 : index
    %93 = vector.load %arg34[%c8_114, %c0_115] : memref<24x512xf32, #tpu.memory_space<vmem>>, vector<8x512xf32>
    %c0_116 = arith.constant 0 : index
    %c0_117 = arith.constant 0 : index
    %94 = vector.load %arg19[%c0_116, %c0_117] : memref<512x256xf32, #tpu.memory_space<vmem>>, vector<512x256xf32>
    %cst_118 = arith.constant dense<0.000000e+00> : vector<8x256xf32>
    %95 = tpu.matmul %93, %94, %cst_118 {dimension_numbers = #tpu.dot_dimension_numbers<[1], [0], [0], [1], [0, 0, 1, 1], [], []>} : vector<8x512xf32>, vector<512x256xf32>, vector<8x256xf32> -> vector<8x256xf32>
    %96 = arith.addf %92, %95 : vector<8x256xf32>
    %c9_119 = arith.constant 9 : index
    %c0_120 = arith.constant 0 : index
    %97 = vector.load %arg34[%c9_119, %c0_120] : memref<24x512xf32, #tpu.memory_space<vmem>>, vector<8x512xf32>
    %c0_121 = arith.constant 0 : index
    %c0_122 = arith.constant 0 : index
    %98 = vector.load %arg20[%c0_121, %c0_122] : memref<512x256xf32, #tpu.memory_space<vmem>>, vector<512x256xf32>
    %cst_123 = arith.constant dense<0.000000e+00> : vector<8x256xf32>
    %99 = tpu.matmul %97, %98, %cst_123 {dimension_numbers = #tpu.dot_dimension_numbers<[1], [0], [0], [1], [0, 0, 1, 1], [], []>} : vector<8x512xf32>, vector<512x256xf32>, vector<8x256xf32> -> vector<8x256xf32>
    %100 = arith.addf %96, %99 : vector<8x256xf32>
    %c0_124 = arith.constant 0 : index
    %c0_125 = arith.constant 0 : index
    %101 = vector.load %arg21[%c0_124, %c0_125] : memref<1x256xf32, #tpu.memory_space<vmem>>, vector<1x256xf32>
    %102 = vector.broadcast %101 : vector<1x256xf32> to vector<8x256xf32>
    %103 = arith.addf %100, %102 : vector<8x256xf32>
    %cst_126 = arith.constant 0.000000e+00 : f32
    %104 = vector.broadcast %cst_126 : f32 to vector<8x256xf32>
    %105 = arith.maximumf %103, %104 : vector<8x256xf32>
    %c8_127 = arith.constant 8 : index
    %c0_128 = arith.constant 0 : index
    %106 = vector.load %arg35[%c8_127, %c0_128] : memref<24x256xf32, #tpu.memory_space<vmem>>, vector<8x256xf32>
    tpu.vector_store %arg35[%c8_127, %c0_128], %105 {strides = array<i32>} : memref<24x256xf32, #tpu.memory_space<vmem>>, vector<8x256xf32>,
    %c7_129 = arith.constant 7 : index
    %c0_130 = arith.constant 0 : index
    %107 = vector.load %arg35[%c7_129, %c0_130] : memref<24x256xf32, #tpu.memory_space<vmem>>, vector<8x256xf32>
    %c0_131 = arith.constant 0 : index
    %c0_132 = arith.constant 0 : index
    %108 = vector.load %arg22[%c0_131, %c0_132] : memref<256x128xf32, #tpu.memory_space<vmem>>, vector<256x128xf32>
    %cst_133 = arith.constant dense<0.000000e+00> : vector<8x128xf32>
    %109 = tpu.matmul %107, %108, %cst_133 {dimension_numbers = #tpu.dot_dimension_numbers<[1], [0], [0], [1], [0, 0, 1, 1], [], []>} : vector<8x256xf32>, vector<256x128xf32>, vector<8x128xf32> -> vector<8x128xf32>
    %c8_134 = arith.constant 8 : index
    %c0_135 = arith.constant 0 : index
    %110 = vector.load %arg35[%c8_134, %c0_135] : memref<24x256xf32, #tpu.memory_space<vmem>>, vector<8x256xf32>
    %c0_136 = arith.constant 0 : index
    %c0_137 = arith.constant 0 : index
    %111 = vector.load %arg23[%c0_136, %c0_137] : memref<256x128xf32, #tpu.memory_space<vmem>>, vector<256x128xf32>
    %cst_138 = arith.constant dense<0.000000e+00> : vector<8x128xf32>
    %112 = tpu.matmul %110, %111, %cst_138 {dimension_numbers = #tpu.dot_dimension_numbers<[1], [0], [0], [1], [0, 0, 1, 1], [], []>} : vector<8x256xf32>, vector<256x128xf32>, vector<8x128xf32> -> vector<8x128xf32>
    %113 = arith.addf %109, %112 : vector<8x128xf32>
    %c9_139 = arith.constant 9 : index
    %c0_140 = arith.constant 0 : index
    %114 = vector.load %arg35[%c9_139, %c0_140] : memref<24x256xf32, #tpu.memory_space<vmem>>, vector<8x256xf32>
    %c0_141 = arith.constant 0 : index
    %c0_142 = arith.constant 0 : index
    %115 = vector.load %arg24[%c0_141, %c0_142] : memref<256x128xf32, #tpu.memory_space<vmem>>, vector<256x128xf32>
    %cst_143 = arith.constant dense<0.000000e+00> : vector<8x128xf32>
    %116 = tpu.matmul %114, %115, %cst_143 {dimension_numbers = #tpu.dot_dimension_numbers<[1], [0], [0], [1], [0, 0, 1, 1], [], []>} : vector<8x256xf32>, vector<256x128xf32>, vector<8x128xf32> -> vector<8x128xf32>
    %117 = arith.addf %113, %116 : vector<8x128xf32>
    %c0_144 = arith.constant 0 : index
    %c0_145 = arith.constant 0 : index
    %118 = vector.load %arg25[%c0_144, %c0_145] : memref<1x128xf32, #tpu.memory_space<vmem>>, vector<1x128xf32>
    %119 = vector.broadcast %118 : vector<1x128xf32> to vector<8x128xf32>
    %120 = arith.addf %117, %119 : vector<8x128xf32>
    %cst_146 = arith.constant 0.000000e+00 : f32
    %121 = vector.broadcast %cst_146 : f32 to vector<8x128xf32>
    %122 = arith.maximumf %120, %121 : vector<8x128xf32>
    %c8_147 = arith.constant 8 : index
    %c0_148 = arith.constant 0 : index
    %123 = vector.load %arg36[%c8_147, %c0_148] : memref<24x128xf32, #tpu.memory_space<vmem>>, vector<8x128xf32>
    tpu.vector_store %arg36[%c8_147, %c0_148], %122 {strides = array<i32>} : memref<24x128xf32, #tpu.memory_space<vmem>>, vector<8x128xf32>,
    %c7_149 = arith.constant 7 : index
    %c0_150 = arith.constant 0 : index
    %124 = vector.load %arg36[%c7_149, %c0_150] : memref<24x128xf32, #tpu.memory_space<vmem>>, vector<8x128xf32>
    %c0_151 = arith.constant 0 : index
    %c0_152 = arith.constant 0 : index
    %125 = vector.load %arg26[%c0_151, %c0_152] : memref<128x16xf32, #tpu.memory_space<vmem>>, vector<128x16xf32>
    %cst_153 = arith.constant dense<0.000000e+00> : vector<8x16xf32>
    %126 = tpu.matmul %124, %125, %cst_153 {dimension_numbers = #tpu.dot_dimension_numbers<[1], [0], [0], [1], [0, 0, 1, 1], [], []>} : vector<8x128xf32>, vector<128x16xf32>, vector<8x16xf32> -> vector<8x16xf32>
    %c8_154 = arith.constant 8 : index
    %c0_155 = arith.constant 0 : index
    %127 = vector.load %arg36[%c8_154, %c0_155] : memref<24x128xf32, #tpu.memory_space<vmem>>, vector<8x128xf32>
    %c0_156 = arith.constant 0 : index
    %c0_157 = arith.constant 0 : index
    %128 = vector.load %arg27[%c0_156, %c0_157] : memref<128x16xf32, #tpu.memory_space<vmem>>, vector<128x16xf32>
    %cst_158 = arith.constant dense<0.000000e+00> : vector<8x16xf32>
    %129 = tpu.matmul %127, %128, %cst_158 {dimension_numbers = #tpu.dot_dimension_numbers<[1], [0], [0], [1], [0, 0, 1, 1], [], []>} : vector<8x128xf32>, vector<128x16xf32>, vector<8x16xf32> -> vector<8x16xf32>
    %130 = arith.addf %126, %129 : vector<8x16xf32>
    %c9_159 = arith.constant 9 : index
    %c0_160 = arith.constant 0 : index
    %131 = vector.load %arg36[%c9_159, %c0_160] : memref<24x128xf32, #tpu.memory_space<vmem>>, vector<8x128xf32>
    %c0_161 = arith.constant 0 : index
    %c0_162 = arith.constant 0 : index
    %132 = vector.load %arg28[%c0_161, %c0_162] : memref<128x16xf32, #tpu.memory_space<vmem>>, vector<128x16xf32>
    %cst_163 = arith.constant dense<0.000000e+00> : vector<8x16xf32>
    %133 = tpu.matmul %131, %132, %cst_163 {dimension_numbers = #tpu.dot_dimension_numbers<[1], [0], [0], [1], [0, 0, 1, 1], [], []>} : vector<8x128xf32>, vector<128x16xf32>, vector<8x16xf32> -> vector<8x16xf32>
    %134 = arith.addf %130, %133 : vector<8x16xf32>
    %c0_164 = arith.constant 0 : index
    %c0_165 = arith.constant 0 : index
    %135 = vector.load %arg29[%c0_164, %c0_165] : memref<1x16xf32, #tpu.memory_space<vmem>>, vector<1x16xf32>
    %136 = vector.broadcast %135 : vector<1x16xf32> to vector<8x16xf32>
    %137 = arith.addf %134, %136 : vector<8x16xf32>
    %cst_166 = arith.constant 0.000000e+00 : f32
    %138 = vector.broadcast %cst_166 : f32 to vector<8x16xf32>
    %139 = arith.maximumf %137, %138 : vector<8x16xf32>
    %c0_167 = arith.constant 0 : index
    %c0_168 = arith.constant 0 : index
    %c0_169 = arith.constant 0 : index
    %140 = vector.load %arg30[%c0_167, %c0_168, %c0_169] : memref<1x8x16xf32, #tpu.memory_space<vmem>>, vector<1x8x16xf32>
    %141 = vector.shape_cast %140 : vector<1x8x16xf32> to vector<8x16xf32>
    %142 = vector.shape_cast %139 : vector<8x16xf32> to vector<1x8x16xf32>
    tpu.vector_store %arg30[%c0_167, %c0_168, %c0_169], %142 {strides = array<i32>} : memref<1x8x16xf32, #tpu.memory_space<vmem>>, vector<1x8x16xf32>,
    return
  }
  func.func @transform_0(%arg0: i32) -> (i32, i32, i32) {
    %c0_i32 = arith.constant 0 : i32
    %c0_i32_0 = arith.constant 0 : i32
    %c0_i32_1 = arith.constant 0 : i32
    return %arg0, %c0_i32, %c0_i32_0 : i32, i32, i32
  }
  func.func @transform_1(%arg0: i32) -> (i32, i32) {
    %c0_i32 = arith.constant 0 : i32
    %c0_i32_0 = arith.constant 0 : i32
    %c0_i32_1 = arith.constant 0 : i32
    return %c0_i32, %c0_i32_0 : i32, i32
  }
  func.func @transform_2(%arg0: i32) -> (i32, i32) {
    %c0_i32 = arith.constant 0 : i32
    %c0_i32_0 = arith.constant 0 : i32
    %c0_i32_1 = arith.constant 0 : i32
    return %c0_i32, %c0_i32_0 : i32, i32
  }
  func.func @transform_3(%arg0: i32) -> (i32, i32) {
    %c0_i32 = arith.constant 0 : i32
    %c0_i32_0 = arith.constant 0 : i32
    %c0_i32_1 = arith.constant 0 : i32
    return %c0_i32, %c0_i32_0 : i32, i32
  }
  func.func @transform_4(%arg0: i32) -> (i32, i32) {
    %c0_i32 = arith.constant 0 : i32
    %c0_i32_0 = arith.constant 0 : i32
    %c0_i32_1 = arith.constant 0 : i32
    return %c0_i32, %c0_i32_0 : i32, i32
  }
  func.func @transform_5(%arg0: i32) -> (i32, i32) {
    %c0_i32 = arith.constant 0 : i32
    %c0_i32_0 = arith.constant 0 : i32
    %c0_i32_1 = arith.constant 0 : i32
    return %c0_i32, %c0_i32_0 : i32, i32
  }
  func.func @transform_6(%arg0: i32) -> (i32, i32) {
    %c0_i32 = arith.constant 0 : i32
    %c0_i32_0 = arith.constant 0 : i32
    %c0_i32_1 = arith.constant 0 : i32
    return %c0_i32, %c0_i32_0 : i32, i32
  }
  func.func @transform_7(%arg0: i32) -> (i32, i32) {
    %c0_i32 = arith.constant 0 : i32
    %c0_i32_0 = arith.constant 0 : i32
    %c0_i32_1 = arith.constant 0 : i32
    return %c0_i32, %c0_i32_0 : i32, i32
  }
  func.func @transform_8(%arg0: i32) -> (i32, i32) {
    %c0_i32 = arith.constant 0 : i32
    %c0_i32_0 = arith.constant 0 : i32
    %c0_i32_1 = arith.constant 0 : i32
    return %c0_i32, %c0_i32_0 : i32, i32
  }
  func.func @transform_9(%arg0: i32) -> (i32, i32) {
    %c0_i32 = arith.constant 0 : i32
    %c0_i32_0 = arith.constant 0 : i32
    %c0_i32_1 = arith.constant 0 : i32
    return %c0_i32, %c0_i32_0 : i32, i32
  }
  func.func @transform_10(%arg0: i32) -> (i32, i32) {
    %c0_i32 = arith.constant 0 : i32
    %c0_i32_0 = arith.constant 0 : i32
    %c0_i32_1 = arith.constant 0 : i32
    return %c0_i32, %c0_i32_0 : i32, i32
  }
  func.func @transform_11(%arg0: i32) -> (i32, i32) {
    %c0_i32 = arith.constant 0 : i32
    %c0_i32_0 = arith.constant 0 : i32
    %c0_i32_1 = arith.constant 0 : i32
    return %c0_i32, %c0_i32_0 : i32, i32
  }
  func.func @transform_12(%arg0: i32) -> (i32, i32) {
    %c0_i32 = arith.constant 0 : i32
    %c0_i32_0 = arith.constant 0 : i32
    %c0_i32_1 = arith.constant 0 : i32
    return %c0_i32, %c0_i32_0 : i32, i32
  }
  func.func @transform_13(%arg0: i32) -> (i32, i32) {
    %c0_i32 = arith.constant 0 : i32
    %c0_i32_0 = arith.constant 0 : i32
    %c0_i32_1 = arith.constant 0 : i32
    return %c0_i32, %c0_i32_0 : i32, i32
  }
  func.func @transform_14(%arg0: i32) -> (i32, i32) {
    %c0_i32 = arith.constant 0 : i32
    %c0_i32_0 = arith.constant 0 : i32
    %c0_i32_1 = arith.constant 0 : i32
    return %c0_i32, %c0_i32_0 : i32, i32
  }
  func.func @transform_15(%arg0: i32) -> (i32, i32) {
    %c0_i32 = arith.constant 0 : i32
    %c0_i32_0 = arith.constant 0 : i32
    %c0_i32_1 = arith.constant 0 : i32
    return %c0_i32, %c0_i32_0 : i32, i32
  }
  func.func @transform_16(%arg0: i32) -> (i32, i32) {
    %c0_i32 = arith.constant 0 : i32
    %c0_i32_0 = arith.constant 0 : i32
    %c0_i32_1 = arith.constant 0 : i32
    return %c0_i32, %c0_i32_0 : i32, i32
  }
  func.func @transform_17(%arg0: i32) -> (i32, i32) {
    %c0_i32 = arith.constant 0 : i32
    %c0_i32_0 = arith.constant 0 : i32
    %c0_i32_1 = arith.constant 0 : i32
    return %c0_i32, %c0_i32_0 : i32, i32
  }
  func.func @transform_18(%arg0: i32) -> (i32, i32) {
    %c0_i32 = arith.constant 0 : i32
    %c0_i32_0 = arith.constant 0 : i32
    %c0_i32_1 = arith.constant 0 : i32
    return %c0_i32, %c0_i32_0 : i32, i32
  }
  func.func @transform_19(%arg0: i32) -> (i32, i32) {
    %c0_i32 = arith.constant 0 : i32
    %c0_i32_0 = arith.constant 0 : i32
    %c0_i32_1 = arith.constant 0 : i32
    return %c0_i32, %c0_i32_0 : i32, i32
  }
  func.func @transform_20(%arg0: i32) -> (i32, i32) {
    %c0_i32 = arith.constant 0 : i32
    %c0_i32_0 = arith.constant 0 : i32
    %c0_i32_1 = arith.constant 0 : i32
    return %c0_i32, %c0_i32_0 : i32, i32
  }
  func.func @transform_21(%arg0: i32) -> (i32, i32) {
    %c0_i32 = arith.constant 0 : i32
    %c0_i32_0 = arith.constant 0 : i32
    %c0_i32_1 = arith.constant 0 : i32
    return %c0_i32, %c0_i32_0 : i32, i32
  }
  func.func @transform_22(%arg0: i32) -> (i32, i32) {
    %c0_i32 = arith.constant 0 : i32
    %c0_i32_0 = arith.constant 0 : i32
    %c0_i32_1 = arith.constant 0 : i32
    return %c0_i32, %c0_i32_0 : i32, i32
  }
  func.func @transform_23(%arg0: i32) -> (i32, i32) {
    %c0_i32 = arith.constant 0 : i32
    %c0_i32_0 = arith.constant 0 : i32
    %c0_i32_1 = arith.constant 0 : i32
    return %c0_i32, %c0_i32_0 : i32, i32
  }
  func.func @transform_24(%arg0: i32) -> (i32, i32) {
    %c0_i32 = arith.constant 0 : i32
    %c0_i32_0 = arith.constant 0 : i32
    %c0_i32_1 = arith.constant 0 : i32
    return %c0_i32, %c0_i32_0 : i32, i32
  }
  func.func @transform_25(%arg0: i32) -> (i32, i32) {
    %c0_i32 = arith.constant 0 : i32
    %c0_i32_0 = arith.constant 0 : i32
    %c0_i32_1 = arith.constant 0 : i32
    return %c0_i32, %c0_i32_0 : i32, i32
  }
  func.func @transform_26(%arg0: i32) -> (i32, i32) {
    %c0_i32 = arith.constant 0 : i32
    %c0_i32_0 = arith.constant 0 : i32
    %c0_i32_1 = arith.constant 0 : i32
    return %c0_i32, %c0_i32_0 : i32, i32
  }
  func.func @transform_27(%arg0: i32) -> (i32, i32) {
    %c0_i32 = arith.constant 0 : i32
    %c0_i32_0 = arith.constant 0 : i32
    %c0_i32_1 = arith.constant 0 : i32
    return %c0_i32, %c0_i32_0 : i32, i32
  }
  func.func @transform_28(%arg0: i32) -> (i32, i32) {
    %c0_i32 = arith.constant 0 : i32
    %c0_i32_0 = arith.constant 0 : i32
    %c0_i32_1 = arith.constant 0 : i32
    return %c0_i32, %c0_i32_0 : i32, i32
  }
  func.func @transform_29(%arg0: i32) -> (i32, i32, i32) {
    %c0_i32 = arith.constant 0 : i32
    %c0_i32_0 = arith.constant 0 : i32
    %c0_i32_1 = arith.constant 0 : i32
    return %arg0, %c0_i32, %c0_i32_0 : i32, i32, i32
  }
}

</mosaic_0001>

<bundles_post_ra>
// kernel: squeeze.1
= control target key start
LH: loop header
LB: loop body
LE: loop exit
PB: predicated region body
PF: predicated region fallthrough
CT: control target
= control target key end

     0   :  { %s67_s8 = smov 80   ;;  %vm8_vm0 = vcmask 130048   ;;  %s68_s11 = smov 96   ;;  %s118_s0 = inlined_call_operand.vmem [shape: f32[2,128], index: 0, kind: input, shape index: {}]   ;;  %s119_s1 = inlined_call_operand.vmem [shape: f32[2,8,16], index: 1, kind: output, shape index: {}]  }
   0x1   :  { %v5_v0 = vld [vmem:[%s118_s0] sm:$0x3]  ;;  %s66_s0 = smov 112   ;;  %s69_s12 = smov 64  }
   0x2   :  { %6 = vst [vmem:[#allocation0] sm:$0x3] %v5_v0  ;;  %s70_s13 = smov 48   ;;  %s71_s14 = smov 32  }
   0x3   :  { %s72_s15 = smov 16  }
   0x9   :  { %v10_v1 = vld [vmem:[#allocation0] sm:$0x3]  }
   0xa   :  { %v22_v2 = vld [vmem:[#allocation0] sm:$0x3]   ;;  %11 = vrot.lane.b32.xlu0 %v10_v1, %s66_s0 }
   0xb   :  { %23 = vrot.lane.b32.xlu1 %v22_v2, %s67_s8  ;;  %v16_v3 = vld [vmem:[#allocation0] sm:$0x3]  }
   0xc   :  { %v28_v4 = vld [vmem:[#allocation0] sm:$0x3]  }
   0xd   :  { %v7_v5 = vld [vmem:[#allocation0] sm:$0x3]  }
   0xe   :  { %9 = vst.msk [vmem:[%s119_s1] ss:$8 sm:$0x3] %vm8_vm0, %v7_v5   ;;  %17 = vrot.lane.b32.xlu0 %v16_v3, %s68_s11  ;;  %v34_v6 = vld [vmem:[#allocation0] sm:$0x3]  }
   0xf   :  { %29 = vrot.lane.b32.xlu1 %v28_v4, %s69_s12  ;;  %v40_v7 = vld [vmem:[#allocation0] sm:$0x3]  }
  0x10   :  { %v46_v8 = vld [vmem:[#allocation0] sm:$0x3]  }
  0x12   :  { %35 = vrot.lane.b32.xlu0 %v34_v6, %s70_s13 }
  0x13   :  { %41 = vrot.lane.b32.xlu1 %v40_v7, %s71_s14 }
  0x16   :  { %47 = vrot.lane.b32.xlu0 %v46_v8, %s72_s15 }
  0x7c   :  { %v12_v9 = vpop.permute.xlu0 %11  }
  0x7d   :  { %v24_v10 = vpop.permute.xlu1 %23   ;;  %52 = vst.msk [vmem:[%s119_s1 + $0x1] ss:$8 sm:$0x3] %vm8_vm0, %v12_v9  }
  0x7e   :  { %54 = vst.msk [vmem:[%s119_s1 + $0x3] ss:$8 sm:$0x3] %vm8_vm0, %v24_v10  }
  0x80   :  { %v18_v11 = vpop.permute.xlu0 %17  }
  0x81   :  { %v30_v12 = vpop.permute.xlu1 %29   ;;  %53 = vst.msk [vmem:[%s119_s1 + $0x2] ss:$8 sm:$0x3] %vm8_vm0, %v18_v11  }
  0x82   :  { %55 = vst.msk [vmem:[%s119_s1 + $0x4] ss:$8 sm:$0x3] %vm8_vm0, %v30_v12  }
  0x84   :  { %v36_v13 = vpop.permute.xlu0 %35  }
  0x85   :  { %v42_v14 = vpop.permute.xlu1 %41   ;;  %56 = vst.msk [vmem:[%s119_s1 + $0x5] ss:$8 sm:$0x3] %vm8_vm0, %v36_v13  }
  0x86   :  { %57 = vst.msk [vmem:[%s119_s1 + $0x6] ss:$8 sm:$0x3] %vm8_vm0, %v42_v14  }
  0x88   :  { %v48_v15 = vpop.permute.xlu0 %47  }
  0x89   :  { %58 = vst.msk [vmem:[%s119_s1 + $0x7] ss:$8 sm:$0x3] %vm8_vm0, %v48_v15  }

// kernel: _lambda_.1
= control target key start
LH: loop header
LB: loop body
LE: loop exit
PB: predicated region body
PF: predicated region fallthrough
CT: control target
= control target key end

     0   :  { %s5607_s6 = smov 1   ;;  %s5608_s10 = smov 2   ;;  %s6277_s0 = inlined_call_operand.smem [shape: u32[30], index: -1, kind: input, shape index: {}] }
   0x1   :  { %s5672_s5 = sld [smem:[%s6277_s0]]   ;;  %s5609_s14 = smov 3  }
   0x2   :  { %s5677_s9 = sld [smem:[%s6277_s0 + %s5607_s6]]   ;;  %s5610_s18 = smov 4  }
   0x3   :  { %s5682_s13 = sld [smem:[%s6277_s0 + %s5608_s10]]   ;;  %s5611_s22 = smov 5  }
   0x4   :  { %s5687_s17 = sld [smem:[%s6277_s0 + %s5609_s14]]   ;;  %s5612_s26 = smov 6  }
   0x5   :  { %s5692_s21 = sld [smem:[%s6277_s0 + %s5610_s18]]   ;;  %s5613_s30 = smov 7  }
   0x6   :  { %s5697_s25 = sld [smem:[%s6277_s0 + %s5611_s22]]   ;;  %s5614_s4 = smov 8  }
   0x7   :  { %6291 = sst [smem:[#allocation50_spill]] %s5672_s5  ;;  %s5615_s10 = smov 9  }
   0x8   :  { %6292 = sst [smem:[#allocation51_spill]] %s5677_s9  ;;  %s5616_s15 = smov 10  }
   0x9   :  { %6293 = sst [smem:[#allocation52_spill]] %s5682_s13  ;;  %s5617_s20 = smov 11  }
   0xa   :  { %s5702_s29 = sld [smem:[%s6277_s0 + %s5612_s26]]   ;;  %s5618_s26 = smov 12  }
   0xb   :  { %s5707_s3 = sld [smem:[%s6277_s0 + %s5613_s30]]   ;;  %s5619_s1 = smov 13  }
   0xc   :  { %s5712_s8 = sld [smem:[%s6277_s0 + %s5614_s4]]   ;;  %s5620_s7 = smov 14  }
   0xd   :  { %s5717_s14 = sld [smem:[%s6277_s0 + %s5615_s10]]   ;;  %s5622_s22 = smov 16  }
   0xe   :  { %s5722_s19 = sld [smem:[%s6277_s0 + %s5616_s15]]   ;;  %s5621_s15 = smov 15  }
   0xf   :  { %s5727_s24 = sld [smem:[%s6277_s0 + %s5617_s20]]   ;;  %s5623_s28 = smov 17  }
  0x10   :  { %s5732_s30 = sld [smem:[%s6277_s0 + %s5618_s26]]  }
  0x11   :  { %6294 = sst [smem:[#allocation53_spill]] %s5707_s3 }
  0x12   :  { %6295 = sst [smem:[#allocation54_spill]] %s5712_s8 }
  0x13   :  { %6296 = sst [smem:[#allocation55_spill]] %s5717_s14 }
  0x14   :  { %s5737_s6 = sld [smem:[%s6277_s0 + %s5619_s1]]  }
  0x15   :  { %s5742_s12 = sld [smem:[%s6277_s0 + %s5620_s7]]   ;;  %s5624_s7 = smov 18  }
  0x16   :  { %6297 = sst [smem:[#allocation56_spill]] %s5732_s30 }
  0x17   :  { %s5747_s20 = sld [smem:[%s6277_s0 + %s5621_s15]]   ;;  %s5625_s15 = smov 19  }
  0x18   :  { %s5752_s27 = sld [smem:[%s6277_s0 + %s5622_s22]]   ;;  %s5626_s22 = smov 20  }
  0x19   :  { %s5757_s4 = sld [smem:[%s6277_s0 + %s5623_s28]]   ;;  %s5627_s28 = smov 21  }
  0x1a   :  { %6298 = sst [smem:[#allocation57_spill]] %s5737_s6 }
  0x1b   :  { %s5762_s30 = sld [smem:[%s6277_s0 + %s5624_s7]]   ;;  %s5628_s7 = smov 22  }
  0x1c   :  { %s5767_s14 = sld [smem:[%s6277_s0 + %s5625_s15]]   ;;  %s5629_s15 = smov 23  }
  0x1d   :  { %6299 = sst [smem:[#allocation58_spill]] %s5747_s20 }
  0x1e   :  { %6300 = sst [smem:[#allocation59_spill]] %s5752_s27 }
  0x1f   :  { %6301 = sst [smem:[#allocation60_spill]] %s5757_s4 }
  0x20   :  { %s5772_s27 = sld [smem:[%s6277_s0 + %s5626_s22]]   ;;  %s5630_s22 = smov 24  }
  0x21   :  { %6302 = sst [smem:[#allocation61_spill]] %s5762_s30 }
  0x22   :  { %s5777_s9 = sld [smem:[%s6277_s0 + %s5627_s28]]   ;;  %s5631_s28 = smov 25  }
  0x23   :  { %s5782_s13 = sld [smem:[%s6277_s0 + %s5628_s7]]   ;;  %s5632_s7 = smov 26  }
  0x24   :  { %s5787_s5 = sld [smem:[%s6277_s0 + %s5629_s15]]   ;;  %s5633_s15 = smov 27  }
  0x25   :  { %s5802_s30 = sld [smem:[%s6277_s0 + %s5632_s7]]  }
  0x26   :  { %6303 = sst [smem:[#allocation62_spill]] %s5772_s27 }
  0x27   :  { %s5792_s27 = sld [smem:[%s6277_s0 + %s5630_s22]]   ;;  %s5634_s22 = smov 28  }
  0x28   :  { %6304 = sst [smem:[#allocation63_spill]] %s5777_s9 }
  0x29   :  { %s5797_s9 = sld [smem:[%s6277_s0 + %s5631_s28]]   ;;  %s5635_s28 = smov 29  }
  0x2a   :  { %6305 = sst [smem:[#allocation64_spill]] %s5787_s5 }
  0x2b   :  { %s5807_s5 = sld [smem:[%s6277_s0 + %s5633_s15]]  }
  0x2c   :  { %s5817_s20 = sld [smem:[%s6277_s0 + %s5635_s28]]  }
  0x2d   :  { %6306 = sst [smem:[#allocation65_spill]] %s5792_s27 }
  0x2e   :  { %s5812_s27 = sld [smem:[%s6277_s0 + %s5634_s22]]  }
  0x2f   :  { %64 = vsyncpa [#allocation9], 0 }
  0x30   :  { %65 = vsyncpa [#allocation11], 0 }
  0x31   :  { %66 = vsyncpa [#allocation14], 0 }
  0x32   :  { %67 = vsyncpa [#allocation17], 0 }
  0x33   :  { %68 = vsyncpa [#allocation20], 0 }
  0x34   :  { %69 = vsyncpa [#allocation23], 0 }
  0x35   :  { %70 = vsyncpa [#allocation26], 0 }
  0x36   :  { %71 = vsyncpa [#allocation29], 0 }
  0x37   :  { %72 = vsyncpa [#allocation32], 0 }
  0x38   :  { %73 = vsyncpa [#allocation35], 0 }
  0x39   :  { %74 = vsyncpa [#allocation38], 0  ;;  %s5819_s7 = smov 0  }
  0x3a LB: > { %s5636_s0 = smov [#allocation10]   ;;  %s5825_s11 = sadd.s32 4294967295, %s5605_s7   ;;  %s5605_s7 = sphi %s5819_s7, %s80_s7  }
  0x3b   : > { %s754_s10 = sshll.u32 %s5636_s0, 4  ;;  %p4273_p0 = scmp.ge.s32.totalorder %s5605_s7, 1  ;;  %s755_s10 = int_to_ptr.vmem [resolvable:$true] %s754_s10 }
  0x3c   : > { %p725_p1 = scmp.lt.s32.totalorder %s5605_s7, 3  ;;  %p6288_p2 = scmp.eq.s32.totalorder %s5825_s11, 0 }
  0x3d   : > { %s5637_s16 = smov [#allocation13]   ;;  %s5638_s23 = smov [#allocation16]  }
  0x3e   : > { %p5830_p3 = pnand %p4273_p0, %p725_p1  ;;  %s781_s18 = sshll.u32 %s5637_s16, 4  ;;  %s5836_s18 = int_to_ptr.vmem [resolvable:$true] %s781_s18 }
  0x3f   : > { %s804_s26 = sshll.u32 %s5638_s23, 4  ;;  %s5639_s28 = smov [#allocation19]   ;;  %s5844_s26 = int_to_ptr.vmem [resolvable:$true] %s804_s26 }
  0x40   : > { %p4869_p4 = pneg %p5830_p3  ;;  %s5846_s1 = sshll.u32 %s5639_s28, 4  ;;  %s834_s1 = int_to_ptr.vmem [resolvable:$true] %s5846_s1 }
  0x41   : > { %s5046_s0 = scalar_lea.vmem %s755_s10, 1024  ;;  %p5054_p10 = scmp.lt.s32.totalorder %s755_s10, %s755_s10 }
  0x42   : > { %p5840_p5 = pnand %p6288_p2, %p4869_p4  ;;  %p5047_p7 = scmp.ne.s32.totalorder %s755_s10, %s5046_s0 }
  0x43   : > { %p5055_p11 = scmp.lt.s32.totalorder %s5046_s0, %s5046_s0 }
  0x44   : > { %p5850_p6 = pneg %p5840_p5 }
  0x45   : > { %p5056_p12 = por %p5055_p11, %p5054_p10 }
  0x46   : > { %p5049_p8 = pnand %p5047_p7, %p5850_p6 }
  0x48   : > { %p5050_p9 = pneg %p5049_p8 }
  0x4a   : > { %p5057_p13 = pnand %p5056_p12, %p5050_p9 }
  0x4c   : > { %5060 = shalt.err (!%p5057_p13)
}
  0x4d   : > { %s6284_s16 = smov 128   ;;  %s6286_s23 = smov 8  }
  0x4e   : > { %4875 = dma.hbm_to_vmem [thread:$0]  (!%p5840_p5), %s5692_s21, 1024, %s755_s10, [#allocation11], %s6284_s16, %s6284_s16, %s6286_s23  }
  0x4f   : > { %s5072_s28 = scalar_lea.vmem %s5836_s18, 16  ;;  %s5079_s0 = scalar_lea.vmem %s5836_s18, 32 }
  0x50   : > { %p5073_p0 = scmp.ne.s32.totalorder %s5836_s18, %s5072_s28  ;;  %p5080_p7 = scmp.lt.s32.totalorder %s5836_s18, %s5836_s18 }
  0x51   : > { %p5081_p8 = scmp.lt.s32.totalorder %s5079_s0, %s5072_s28 }
  0x52   : > { %p5075_p1 = pnand %p5073_p0, %p5850_p6 }
  0x53   : > { %p5082_p9 = por %p5081_p8, %p5080_p7 }
  0x54   : > { %p5076_p4 = pneg %p5075_p1 }
  0x56   : > { %p5083_p10 = pnand %p5082_p9, %p5076_p4 }
  0x58   : > { %5086 = shalt.err (!%p5083_p10)
}
  0x59   : > { %4881 = dma.hbm_to_vmem [thread:$0]  (!%p5840_p5), %s5702_s29, 16, %s5836_s18, [#allocation14]  }
  0x5a   : > { %s5098_s10 = scalar_lea.vmem %s5844_s26, 1024  ;;  %p5106_p0 = scmp.lt.s32.totalorder %s5844_s26, %s5844_s26 }
  0x5b   : > { %p5099_p11 = scmp.ne.s32.totalorder %s5844_s26, %s5098_s10  ;;  %p5107_p1 = scmp.lt.s32.totalorder %s5098_s10, %s5098_s10 }
  0x5d   : > { %p5101_p12 = pnand %p5099_p11, %p5850_p6  ;;  %p5108_p7 = por %p5107_p1, %p5106_p0 }
  0x5f   : > { %p5102_p13 = pneg %p5101_p12 }
  0x61   : > { %p5109_p4 = pnand %p5108_p7, %p5102_p13 }
  0x63   : > { %5112 = shalt.err (!%p5109_p4)
}
  0x64   : > { %s6310_s8 = sld [smem:[#allocation54_spill]]  ;;  %s5124_s18 = scalar_lea.vmem %s834_s1, 1024 }
  0x65   : > { %p5125_p8 = scmp.ne.s32.totalorder %s834_s1, %s5124_s18  ;;  %p5132_p11 = scmp.lt.s32.totalorder %s834_s1, %s834_s1 }
  0x66   : > { %p5133_p12 = scmp.lt.s32.totalorder %s5124_s18, %s5124_s18 }
  0x67   : > { %p5127_p9 = pnand %p5125_p8, %p5850_p6 }
  0x68   : > { %p5134_p13 = por %p5133_p12, %p5132_p11 }
  0x69   : > { %p5128_p10 = pneg %p5127_p9 }
  0x6a   : > { %4887 = dma.hbm_to_vmem [thread:$0]  (!%p5840_p5), %s6310_s8, 1024, %s5844_s26, [#allocation17], %s6284_s16, %s6284_s16, %s6286_s23  }
  0x6b   : > { %p5135_p0 = pnand %p5134_p13, %p5128_p10 }
  0x6d   : > { %5138 = shalt.err (!%p5135_p0)
}
  0x6e   : > { %4893 = dma.hbm_to_vmem [thread:$0]  (!%p5840_p5), %s5727_s24, 1024, %s834_s1, [#allocation20], %s6284_s16, %s6284_s16, %s6286_s23  }
  0x6f   : > { %s5642_s26 = smov [#allocation22]   ;;  %s5643_s0 = smov [#allocation25]  }
  0x70   : > { %s862_s28 = sshll.u32 %s5642_s26, 4  ;;  %s891_s10 = sshll.u32 %s5643_s0, 4  ;;  %s863_s28 = int_to_ptr.vmem [resolvable:$true] %s862_s28  ;;  %s892_s10 = int_to_ptr.vmem [resolvable:$true] %s891_s10 }
  0x71   : > { %s5150_s8 = scalar_lea.vmem %s863_s28, 4096  ;;  %p5158_p8 = scmp.lt.s32.totalorder %s863_s28, %s863_s28 }
  0x72   : > { %p5151_p1 = scmp.ne.s32.totalorder %s863_s28, %s5150_s8  ;;  %p5159_p9 = scmp.lt.s32.totalorder %s5150_s8, %s5150_s8 }
  0x74   : > { %p5153_p7 = pnand %p5151_p1, %p5850_p6  ;;  %p5160_p10 = por %p5159_p9, %p5158_p8 }
  0x76   : > { %p5154_p4 = pneg %p5153_p7 }
  0x78   : > { %p5161_p11 = pnand %p5160_p10, %p5154_p4 }
  0x7a   : > { %5164 = shalt.err (!%p5161_p11)
}
  0x7b   : > { %s6280_s18 = smov 512   ;;  %s6282_s1 = smov 32  }
  0x7c   : > { %4899 = dma.hbm_to_vmem [thread:$0]  (!%p5840_p5), %s5742_s12, 4096, %s863_s28, [#allocation23], %s6280_s18, %s6280_s18, %s6282_s1  }
  0x7d   : > { %s5176_s26 = scalar_lea.vmem %s892_s10, 16384  ;;  %p5184_p1 = scmp.lt.s32.totalorder %s892_s10, %s892_s10 }
  0x7e   : > { %p5177_p12 = scmp.ne.s32.totalorder %s892_s10, %s5176_s26  ;;  %p5185_p7 = scmp.lt.s32.totalorder %s5176_s26, %s5176_s26 }
  0x80   : > { %p5179_p13 = pnand %p5177_p12, %p5850_p6  ;;  %p5186_p4 = por %p5185_p7, %p5184_p1 }
  0x82   : > { %p5180_p0 = pneg %p5179_p13 }
  0x84   : > { %p5187_p8 = pnand %p5186_p4, %p5180_p0 }
  0x86   : > { %5190 = shalt.err (!%p5187_p8)
}
  0x87   : > { %s6289_s8 = smov 256   ;;  %s6311_s4 = sld [smem:[#allocation60_spill]] }
  0x88   : > { %s6290_s0 = smov 16   ;;  %s5648_s28 = smov [#allocation28]  }
  0x89   : > { %s917_s18 = sshll.u32 %s5648_s28, 4  ;;  %s5649_s1 = smov [#allocation31]   ;;  %s918_s18 = int_to_ptr.vmem [resolvable:$true] %s917_s18 }
  0x8a   : > { %s946_s16 = sshll.u32 %s5649_s1, 4  ;;  %s5202_s23 = scalar_lea.vmem %s918_s18, 16384  ;;  %s947_s16 = int_to_ptr.vmem [resolvable:$true] %s946_s16 }
  0x8b   : > { %p5203_p9 = scmp.ne.s32.totalorder %s918_s18, %s5202_s23  ;;  %p5210_p12 = scmp.lt.s32.totalorder %s918_s18, %s918_s18 }
  0x8c   : > { %p5211_p13 = scmp.lt.s32.totalorder %s5202_s23, %s5202_s23 }
  0x8d   : > { %4905 = dma.hbm_to_vmem [thread:$0]  (!%p5840_p5), %s6311_s4, 16384, %s892_s10, [#allocation26], %s6289_s8, %s6289_s8, %s6290_s0  }
  0x8e   : > { %p5205_p10 = pnand %p5203_p9, %p5850_p6  ;;  %p5212_p0 = por %p5211_p13, %p5210_p12 }
  0x90   : > { %p5206_p11 = pneg %p5205_p10 }
  0x92   : > { %p5213_p1 = pnand %p5212_p0, %p5206_p11 }
  0x94   : > { %5216 = shalt.err (!%p5213_p1)
}
  0x95   : > { %4911 = dma.hbm_to_vmem [thread:$0]  (!%p5840_p5), %s5767_s14, 16384, %s918_s18, [#allocation29], %s6289_s8, %s6289_s8, %s6290_s0  }
  0x96   : > { %s5228_s10 = scalar_lea.vmem %s947_s16, 4096  ;;  %p5236_p9 = scmp.lt.s32.totalorder %s947_s16, %s947_s16 }
  0x97   : > { %p5229_p7 = scmp.ne.s32.totalorder %s947_s16, %s5228_s10  ;;  %p5237_p10 = scmp.lt.s32.totalorder %s5228_s10, %s5228_s10 }
  0x99   : > { %p5231_p4 = pnand %p5229_p7, %p5850_p6  ;;  %p5238_p2 = por %p5237_p10, %p5236_p9 }
  0x9b   : > { %p5232_p8 = pneg %p5231_p4 }
  0x9d   : > { %p5239_p12 = pnand %p5238_p2, %p5232_p8 }
  0x9f   : > { %5242 = shalt.err (!%p5239_p12)
}
  0xa0   : > { %s6312_s23 = smov 8   ;;  %s6313_s1 = smov 128  }
  0xa1   : > { %4917 = dma.hbm_to_vmem [thread:$0]  (!%p5840_p5), %s5782_s13, 4096, %s947_s16, [#allocation32], %s6313_s1, %s6313_s1, %s6312_s23  }
  0xa2   : > { %s5650_s18 = smov [#allocation34]   ;;  %s5651_s28 = smov [#allocation8]  }
  0xa3   : > { %s975_s26 = sshll.u32 %s5650_s18, 4  ;;  %s744_s8 = sshll.u32 %s5651_s28, 4  ;;  %s976_s26 = int_to_ptr.vmem [resolvable:$true] %s975_s26  ;;  %s745_s8 = int_to_ptr.vmem [resolvable:$true] %s744_s8 }
  0xa4   : > { %s5254_s0 = scalar_lea.vmem %s976_s26, 2048  ;;  %p5262_p2 = scmp.lt.s32.totalorder %s976_s26, %s976_s26 }
  0xa5   : > { %p5255_p11 = scmp.ne.s32.totalorder %s976_s26, %s5254_s0  ;;  %p5263_p1 = scmp.lt.s32.totalorder %s5254_s0, %s5254_s0 }
  0xa7   : > { %p5257_p13 = pnand %p5255_p11, %p5850_p6  ;;  %p5264_p7 = por %p5263_p1, %p5262_p2 }
  0xa9   : > { %p5258_p0 = pneg %p5257_p13 }
  0xab   : > { %p5265_p4 = pnand %p5264_p7, %p5258_p0 }
  0xad   : > { %5268 = shalt.err (!%p5265_p4)
}
  0xae   : > { %4923 = dma.hbm_to_vmem [thread:$0]  (!%p5840_p5), %s5797_s9, 2048, %s976_s26, [#allocation35], %s6313_s1, %s6313_s1, %s6312_s23  }
  0xaf   : > { %s5280_s16 = scalar_lea.vmem %s745_s8, 16  ;;  %s5287_s10 = scalar_lea.vmem %s745_s8, 32 }
  0xb0   : > { %p5281_p8 = scmp.ne.s32.totalorder %s745_s8, %s5280_s16  ;;  %p5288_p12 = scmp.lt.s32.totalorder %s745_s8, %s745_s8 }
  0xb1   : > { %p5289_p11 = scmp.lt.s32.totalorder %s5287_s10, %s5280_s16 }
  0xb2   : > { %p5283_p9 = pnand %p5281_p8, %p5850_p6 }
  0xb3   : > { %p5290_p13 = por %p5289_p11, %p5288_p12 }
  0xb4   : > { %p5284_p10 = pneg %p5283_p9 }
  0xb6   : > { %p5291_p0 = pnand %p5290_p13, %p5284_p10 }
  0xb8   : > { %5294 = shalt.err (!%p5291_p0)
}
  0xb9   : > { %4872 = dma.hbm_to_vmem [thread:$0]  (!%p5840_p5), %s5687_s17, 16, %s745_s8, [#allocation9]  }
  0xba   : > { %s5652_s0 = smov [#allocation12]   ;;  %s5653_s26 = smov [#allocation15]  }
  0xbb   : > { %s767_s18 = sshll.u32 %s5652_s0, 4  ;;  %s791_s28 = sshll.u32 %s5653_s26, 4  ;;  %s768_s18 = int_to_ptr.vmem [resolvable:$true] %s767_s18  ;;  %s792_s28 = int_to_ptr.vmem [resolvable:$true] %s791_s28 }
  0xbc   : > { %s5306_s4 = scalar_lea.vmem %s768_s18, 1024  ;;  %p5314_p4 = scmp.lt.s32.totalorder %s768_s18, %s768_s18 }
  0xbd   : > { %p5307_p2 = scmp.ne.s32.totalorder %s768_s18, %s5306_s4  ;;  %p5315_p8 = scmp.lt.s32.totalorder %s5306_s4, %s5306_s4 }
  0xbf   : > { %p5309_p1 = pnand %p5307_p2, %p5850_p6  ;;  %p5316_p9 = por %p5315_p8, %p5314_p4 }
  0xc1   : > { %p5310_p7 = pneg %p5309_p1 }
  0xc3   : > { %p5317_p10 = pnand %p5316_p9, %p5310_p7 }
  0xc5   : > { %5320 = shalt.err (!%p5317_p10)
}
  0xc6   : > { %4878 = dma.hbm_to_vmem [thread:$0]  (!%p5840_p5), %s5697_s25, 1024, %s768_s18, [#allocation11], %s6313_s1, %s6313_s1, %s6312_s23  }
  0xc7   : > { %s5332_s8 = scalar_lea.vmem %s792_s28, 1024  ;;  %p5340_p0 = scmp.lt.s32.totalorder %s792_s28, %s792_s28 }
  0xc8   : > { %p5333_p12 = scmp.ne.s32.totalorder %s792_s28, %s5332_s8  ;;  %p5341_p2 = scmp.lt.s32.totalorder %s5332_s8, %s5332_s8 }
  0xca   : > { %p5335_p11 = pnand %p5333_p12, %p5850_p6  ;;  %p5342_p1 = por %p5341_p2, %p5340_p0 }
  0xcc   : > { %p5336_p13 = pneg %p5335_p11 }
  0xce   : > { %p5343_p4 = pnand %p5342_p1, %p5336_p13 }
  0xd0   : > { %5346 = shalt.err (!%p5343_p4)
}
  0xd1   : > { %s6314_s3 = sld [smem:[#allocation53_spill]]  ;;  %s5654_s4 = smov [#allocation18]  }
  0xd2   : > { %s820_s16 = sshll.u32 %s5654_s4, 4  ;;  %s5655_s10 = smov [#allocation21]   ;;  %s821_s16 = int_to_ptr.vmem [resolvable:$true] %s820_s16 }
  0xd3   : > { %s849_s0 = sshll.u32 %s5655_s10, 4  ;;  %s5358_s18 = scalar_lea.vmem %s821_s16, 1024  ;;  %s850_s0 = int_to_ptr.vmem [resolvable:$true] %s849_s0 }
  0xd4   : > { %p5359_p7 = scmp.ne.s32.totalorder %s821_s16, %s5358_s18  ;;  %p5366_p10 = scmp.lt.s32.totalorder %s821_s16, %s821_s16 }
  0xd5   : > { %p5367_p12 = scmp.lt.s32.totalorder %s5358_s18, %s5358_s18 }
  0xd6   : > { %p5361_p8 = pnand %p5359_p7, %p5850_p6 }
  0xd7   : > { %4884 = dma.hbm_to_vmem [thread:$0]  (!%p5840_p5), %s6314_s3, 1024, %s792_s28, [#allocation14], %s6313_s1, %s6313_s1, %s6312_s23  }
  0xd8   : > { %p5362_p9 = pneg %p5361_p8  ;;  %p5368_p11 = por %p5367_p12, %p5366_p10 }
  0xda   : > { %p5369_p13 = pnand %p5368_p11, %p5362_p9 }
  0xdc   : > { %5372 = shalt.err (!%p5369_p13)
}
  0xdd   : > { %4890 = dma.hbm_to_vmem [thread:$0]  (!%p5840_p5), %s5722_s19, 1024, %s821_s16, [#allocation17], %s6313_s1, %s6313_s1, %s6312_s23  }
  0xde   : > { %s5384_s26 = scalar_lea.vmem %s850_s0, 4096  ;;  %p5392_p4 = scmp.lt.s32.totalorder %s850_s0, %s850_s0 }
  0xdf   : > { %p5385_p0 = scmp.ne.s32.totalorder %s850_s0, %s5384_s26  ;;  %p5393_p7 = scmp.lt.s32.totalorder %s5384_s26, %s5384_s26 }
  0xe1   : > { %p5387_p2 = pnand %p5385_p0, %p5850_p6  ;;  %p5394_p8 = por %p5393_p7, %p5392_p4 }
  0xe3   : > { %p5388_p1 = pneg %p5387_p2 }
  0xe5   : > { %p5395_p10 = pnand %p5394_p8, %p5388_p1 }
  0xe7   : > { %5398 = shalt.err (!%p5395_p10)
}
  0xe8   : > { %s6315_s28 = smov 32   ;;  %s6316_s8 = smov 512  }
  0xe9   : > { %s6317_s6 = sld [smem:[#allocation57_spill]]  ;;  %s5656_s4 = smov [#allocation24]  }
  0xea   : > { %s875_s16 = sshll.u32 %s5656_s4, 4  ;;  %s5657_s10 = smov [#allocation27]   ;;  %s876_s16 = int_to_ptr.vmem [resolvable:$true] %s875_s16 }
  0xeb   : > { %s904_s18 = sshll.u32 %s5657_s10, 4  ;;  %s5410_s3 = scalar_lea.vmem %s876_s16, 4096  ;;  %s905_s18 = int_to_ptr.vmem [resolvable:$true] %s904_s18 }
  0xec   : > { %p5411_p9 = scmp.ne.s32.totalorder %s876_s16, %s5410_s3  ;;  %p5418_p13 = scmp.lt.s32.totalorder %s876_s16, %s876_s16 }
  0xed   : > { %p5419_p0 = scmp.lt.s32.totalorder %s5410_s3, %s5410_s3 }
  0xee   : > { %p5413_p12 = pnand %p5411_p9, %p5850_p6 }
  0xef   : > { %4896 = dma.hbm_to_vmem [thread:$0]  (!%p5840_p5), %s6317_s6, 4096, %s850_s0, [#allocation20], %s6316_s8, %s6316_s8, %s6315_s28  }
  0xf0   : > { %p5414_p11 = pneg %p5413_p12  ;;  %p5420_p2 = por %p5419_p0, %p5418_p13 }
  0xf2   : > { %p5421_p1 = pnand %p5420_p2, %p5414_p11 }
  0xf4   : > { %5424 = shalt.err (!%p5421_p1)
}
  0xf5   : > { %s6318_s0 = sld [smem:[#allocation58_spill]]  ;;  %s5436_s26 = scalar_lea.vmem %s905_s18, 16384 }
  0xf6   : > { %p5437_p4 = scmp.ne.s32.totalorder %s905_s18, %s5436_s26  ;;  %p5444_p10 = scmp.lt.s32.totalorder %s905_s18, %s905_s18 }
  0xf7   : > { %p5445_p9 = scmp.lt.s32.totalorder %s5436_s26, %s5436_s26 }
  0xf8   : > { %p5439_p7 = pnand %p5437_p4, %p5850_p6 }
  0xf9   : > { %p5446_p12 = por %p5445_p9, %p5444_p10 }
  0xfa   : > { %p5440_p8 = pneg %p5439_p7 }
  0xfb   : > { %4902 = dma.hbm_to_vmem [thread:$0]  (!%p5840_p5), %s6318_s0, 4096, %s876_s16, [#allocation23], %s6316_s8, %s6316_s8, %s6315_s28  }
  0xfc   : > { %p5447_p13 = pnand %p5446_p12, %p5440_p8 }
  0xfe   : > { %5450 = shalt.err (!%p5447_p13)
}
  0xff   : > { %s6319_s3 = smov 16   ;;  %s6320_s4 = smov 256  }
 0x100   : > { %s6321_s10 = sld [smem:[#allocation61_spill]]  ;;  %s5658_s28 = smov [#allocation30]  }
 0x101   : > { %s933_s8 = sshll.u32 %s5658_s28, 4  ;;  %s5659_s16 = smov [#allocation33]   ;;  %s934_s8 = int_to_ptr.vmem [resolvable:$true] %s933_s8 }
 0x102   : > { %s959_s0 = sshll.u32 %s5659_s16, 4  ;;  %s5462_s6 = scalar_lea.vmem %s934_s8, 4096  ;;  %s960_s0 = int_to_ptr.vmem [resolvable:$true] %s959_s0 }
 0x103   : > { %p5463_p11 = scmp.ne.s32.totalorder %s934_s8, %s5462_s6  ;;  %p5470_p1 = scmp.lt.s32.totalorder %s934_s8, %s934_s8 }
 0x104   : > { %p5471_p4 = scmp.lt.s32.totalorder %s5462_s6, %s5462_s6 }
 0x105   : > { %p5465_p0 = pnand %p5463_p11, %p5850_p6 }
 0x106   : > { %4908 = dma.hbm_to_vmem [thread:$0]  (!%p5840_p5), %s6321_s10, 16384, %s905_s18, [#allocation26], %s6320_s4, %s6320_s4, %s6319_s3  }
 0x107   : > { %p5466_p2 = pneg %p5465_p0  ;;  %p5472_p7 = por %p5471_p4, %p5470_p1 }
 0x109   : > { %p5473_p8 = pnand %p5472_p7, %p5466_p2 }
 0x10b   : > { %5476 = shalt.err (!%p5473_p8)
}
 0x10c   : > { %s6322_s18 = sld [smem:[#allocation63_spill]]  ;;  %s5488_s26 = scalar_lea.vmem %s960_s0, 4096 }
 0x10d   : > { %p5489_p10 = scmp.ne.s32.totalorder %s960_s0, %s5488_s26  ;;  %p5496_p13 = scmp.lt.s32.totalorder %s960_s0, %s960_s0 }
 0x10e   : > { %p5497_p11 = scmp.lt.s32.totalorder %s5488_s26, %s5488_s26 }
 0x10f   : > { %p5491_p9 = pnand %p5489_p10, %p5850_p6 }
 0x110   : > { %p5498_p0 = por %p5497_p11, %p5496_p13 }
 0x111   : > { %p5492_p12 = pneg %p5491_p9 }
 0x112   : > { %4914 = dma.hbm_to_vmem [thread:$0]  (!%p5840_p5), %s6322_s18, 4096, %s934_s8, [#allocation29], %s6313_s1, %s6313_s1, %s6312_s23  }
 0x113   : > { %p5499_p1 = pnand %p5498_p0, %p5492_p12 }
 0x115   : > { %5502 = shalt.err (!%p5499_p1)
}
 0x116   : > { %s6323_s6 = sld [smem:[#allocation64_spill]]  ;;  %s5660_s3 = smov [#allocation36]  }
 0x117   : > { %s988_s4 = sshll.u32 %s5660_s3, 4  ;;  %s5661_s10 = smov [#allocation37]   ;;  %s989_s4 = int_to_ptr.vmem [resolvable:$true] %s988_s4 }
 0x118   : > { %s1001_s28 = sshll.u32 %s5661_s10, 4  ;;  %s5514_s8 = scalar_lea.vmem %s989_s4, 2048  ;;  %s1002_s28 = int_to_ptr.vmem [resolvable:$true] %s1001_s28 }
 0x119   : > { %p5515_p2 = scmp.ne.s32.totalorder %s989_s4, %s5514_s8  ;;  %p5522_p8 = scmp.lt.s32.totalorder %s989_s4, %s989_s4 }
 0x11a   : > { %p5523_p10 = scmp.lt.s32.totalorder %s5514_s8, %s5514_s8 }
 0x11b   : > { %p5517_p4 = pnand %p5515_p2, %p5850_p6 }
 0x11c   : > { %4920 = dma.hbm_to_vmem [thread:$0]  (!%p5840_p5), %s6323_s6, 4096, %s960_s0, [#allocation32], %s6313_s1, %s6313_s1, %s6312_s23  }
 0x11d   : > { %p5518_p7 = pneg %p5517_p4  ;;  %p5524_p9 = por %p5523_p10, %p5522_p8 }
 0x11f   : > { %p5525_p12 = pnand %p5524_p9, %p5518_p7 }
 0x121   : > { %5528 = shalt.err (!%p5525_p12)
}
 0x122   : > { %4926 = dma.hbm_to_vmem [thread:$0]  (!%p5840_p5), %s5802_s30, 2048, %s989_s4, [#allocation35], %s6313_s1, %s6313_s1, %s6312_s23  }
 0x123   : > { %s5540_s16 = scalar_lea.vmem %s1002_s28, 2048  ;;  %p5548_p1 = scmp.lt.s32.totalorder %s1002_s28, %s1002_s28 }
 0x124   : > { %p5541_p13 = scmp.ne.s32.totalorder %s1002_s28, %s5540_s16  ;;  %p5549_p2 = scmp.lt.s32.totalorder %s5540_s16, %s5540_s16 }
 0x126   : > { %p5543_p11 = pnand %p5541_p13, %p5850_p6  ;;  %p5550_p4 = por %p5549_p2, %p5548_p1 }
 0x128   : > { %p5544_p0 = pneg %p5543_p11 }
 0x12a   : > { %p5551_p8 = pnand %p5550_p4, %p5544_p0 }
 0x12c   : > { %5554 = shalt.err (!%p5551_p8)
}
 0x12d   : > { %4929 = dma.hbm_to_vmem [thread:$0]  (!%p5840_p5), %s5807_s5, 2048, %s1002_s28, [#allocation38], %s6313_s1, %s6313_s1, %s6312_s23  }
 0x12e   : > { %1027 = sbr.rel (%p5830_p3) target bundleno = 2230 (0x8b6), region = 136  ;;  %p6324_p7 = scmp.eq.s32.totalorder (!%p5830_p3), %s5825_s11, 0 }
 0x133   : > { %5560 = dma.done.wait (%p6324_p7), [#allocation9], 16   ;;  %p6325_p6 = pmov %p6324_p7 }
 0x135   : > { %5562 = vsyncadd (%p6325_p6), [#allocation9], 4294967280  ;;  %p6326_p10 = pmov %p6325_p6 }
 0x136   : > { %p6327_p9 = pmov %p6325_p6 }
 0x137   : > { %5564 = dma.done.wait (%p6326_p10), [#allocation11], 2048  }
 0x138   : > { %5566 = vsyncadd (%p6327_p9), [#allocation11], 4294965248  ;;  %p6328_p12 = pmov %p6325_p6 }
 0x139   : > { %p6329_p5 = pmov %p6325_p6 }
 0x13a   : > { %5568 = dma.done.wait (%p6328_p12), [#allocation14], 1040  }
 0x13b   : > { %5570 = vsyncadd (%p6329_p5), [#allocation14], 4294966256  ;;  %p6330_p3 = pmov %p6329_p5 }
 0x13d   : > { %5572 = dma.done.wait (%p6330_p3), [#allocation17], 2048   ;;  %p6331_p13 = pmov %p6330_p3 }
 0x13e   : > { %p6332_p11 = pmov %p6330_p3 }
 0x13f   : > { %5574 = vsyncadd (%p6331_p13), [#allocation17], 4294965248 }
 0x140   : > { %5576 = dma.done.wait (%p6332_p11), [#allocation20], 5120   ;;  %p6333_p0 = pmov %p6330_p3 }
 0x142   : > { %5578 = vsyncadd (%p6333_p0), [#allocation20], 4294962176  ;;  %p6334_p1 = pmov %p6333_p0 }
 0x143   : > { %p6335_p2 = pmov %p6333_p0 }
 0x144   : > { %5580 = dma.done.wait (%p6334_p1), [#allocation23], 8192  }
 0x145   : > { %5582 = vsyncadd (%p6335_p2), [#allocation23], 4294959104  ;;  %p6336_p4 = pmov %p6333_p0 }
 0x146   : > { %p6337_p8 = pmov %p6333_p0 }
 0x147   : > { %5584 = dma.done.wait (%p6336_p4), [#allocation26], 32768  }
 0x148   : > { %5586 = vsyncadd (%p6337_p8), [#allocation26], 4294934528  ;;  %p6338_p7 = pmov %p6333_p0 }
 0x149   : > { %p6339_p6 = pmov %p6333_p0 }
 0x14a   : > { %5588 = dma.done.wait (%p6338_p7), [#allocation29], 20480  }
 0x14b   : > { %5590 = vsyncadd (%p6339_p6), [#allocation29], 4294946816  ;;  %p6340_p10 = pmov %p6333_p0 }
 0x14c   : > { %p6341_p9 = pmov %p6333_p0 }
 0x14d   : > { %5592 = dma.done.wait (%p6340_p10), [#allocation32], 8192  }
 0x14e   : > { %5594 = vsyncadd (%p6341_p9), [#allocation32], 4294959104  ;;  %p6342_p12 = pmov %p6333_p0 }
 0x14f   : > { %p6343_p5 = pmov %p6333_p0 }
 0x150   : > { %5596 = dma.done.wait (%p6342_p12), [#allocation35], 4096  }
 0x151   : > { %5598 = vsyncadd (%p6343_p5), [#allocation35], 4294963200  ;;  %p6344_p3 = pmov %p6333_p0 }
 0x152   : > { %p6345_p13 = pmov %p6333_p0 }
 0x153   : > { %5600 = dma.done.wait (%p6344_p3), [#allocation38], 2048  }
 0x154   : > { %5602 = vsyncadd (%p6345_p13), [#allocation38], 4294965248  ;;  %s6346_s15 = sld [smem:[#allocation50_spill]]  ;;  %p1177_p11 = scmp.lt.s32.totalorder %s5825_s11, 1  ;;  %v5662_v0 = vmov 0.0   ;;  %vm1185_vm0 = vcmask 122880  }
 0x155   : > { %s6347_s22 = sld [smem:[#allocation52_spill]]  ;;  %4556 = vmatprep.subr.mxu0 %v5662_v0  ;;  %1211 = vst [vmem:[#allocation7 + $0x7] sm:$0x1] %v5662_v0  ;;  %1212 = vst [vmem:[#allocation7 + $0x10] sm:$0x1] %v5662_v0  ;;  %4563 = vmatprep.subr.mxu1 %v5662_v0  ;;  %vm5663_vm1 = vmmov 0  }
 0x156   : > { %s6348_s2 = sld [smem:[#allocation51_spill]]  ;;  %4560 = vmatprep.mubr.msk.f32.mxu0 %vm5663_vm1, %v5662_v0  ;;  %4567 = vmatprep.mubr.msk.f32.mxu1 %vm5663_vm1, %v5662_v0  ;;  %s6355_s11 = smov (!%p1177_p11, %s5825_s11), 1  ;;  %1186 = vst.msk [vmem:[#allocation2 + $0x7] sm:$0x1] %vm1185_vm0, %v5662_v0  ;;  %vm1214_vm2 = vcmask 130048   ;;  %v1396_v8 = vld [vmem:[#allocation12 + $0x38] sm:$0xff] }
 0x157   : > { %s4316_s23 = sshll.u32 %s6355_s11, 3  ;;  %v1387_v9 = vld [vmem:[#allocation10 + $0x38] sm:$0xff]  ;;  %v1395_v10 = vld [vmem:[#allocation12 + $0x30] sm:$0xff]  ;;  %v1394_v12 = vld [vmem:[#allocation12 + $0x28] sm:$0xff]  ;;  %vm1188_vm3 = vcmask 516096   ;;  %vm1377_vm4 = vcmask 523264  }
 0x158   : > { %v1386_v11 = vld [vmem:[#allocation10 + $0x30] sm:$0xff]  ;;  %v1385_v13 = vld [vmem:[#allocation10 + $0x28] sm:$0xff]  ;;  %v1393_v14 = vld [vmem:[#allocation12 + $0x20] sm:$0xff]  ;;  %1189 = vst.msk [vmem:[#allocation3 + $0x7] sm:$0x1] %vm1188_vm3, %v5662_v0  ;;  %s6349_s0 = sld [smem:[#allocation55_spill]]  ;;  %s1184_s4 = scalar_lea.vmem %s5817_s20, %s4316_s23 }
 0x159   : > { %v1384_v15 = vld [vmem:[#allocation10 + $0x20] sm:$0xff]  ;;  %v1392_v16 = vld [vmem:[#allocation12 + $0x18] sm:$0xff]  ;;  %v1391_v18 = vld [vmem:[#allocation12 + $0x10] sm:$0xff]  ;;  %1191 = vst.msk [vmem:[#allocation4 + $0x7] sm:$0x1] %vm1188_vm3, %v5662_v0  ;;  %s6350_s18 = sld [smem:[#allocation56_spill]] }
 0x15a   : > { %s1180_s1 = scalar_lea.vmem %s6346_s15, %s4316_s23  ;;  %v1383_v17 = vld [vmem:[#allocation10 + $0x18] sm:$0xff]  ;;  %1192 = vst.msk [vmem:[#allocation4 + $0x10] sm:$0x1] %vm1188_vm3, %v5662_v0  ;;  %v1382_v19 = vld [vmem:[#allocation10 + $0x10] sm:$0xff]  ;;  %v1390_v20 = vld [vmem:[#allocation12 + $0x8] sm:$0xff]  ;;  %s6351_s26 = sld [smem:[#allocation59_spill]] }
 0x15b   : > { %v1221_v1 = vld [vmem:[%s6347_s22 + $0x8] sm:$0xff]  ;;  %v1220_v3 = vld [vmem:[%s6347_s22] sm:$0xff]  ;;  %v1389_v22 = vld [vmem:[#allocation12] sm:$0xff]  ;;  %vm2891_vm7 = vcmask 1040384   ;;  %vm3194_vm8 = vcmask 1046528   ;;  %s6352_s6 = sld [smem:[#allocation62_spill]] }
 0x15c   : > { %v1218_v2 = vld [vmem:[%s6348_s2 + $0x8] sm:$0xff]  ;;  %4557 = vmatpush3.msra.mxu0 %v1221_v1  ;;  %v1217_v4 = vld [vmem:[%s6348_s2] sm:$0xff]  ;;  %v1380_v23 = vld [vmem:[#allocation10] sm:$0xff]  ;;  %s6353_s3 = sld [smem:[#allocation65_spill]] }
 0x15d   : > { %4564 = vmatpush3.msra.mxu1 %v1218_v2  ;;  %v1213_v5 = vld [vmem:[%s1180_s1] sm:$0xff]  ;;  %4558 = vmatprep.subr.mxu0 %v5662_v0  ;;  %v4320_v26 = vld [vmem:[#allocation8] ss:$0 sm:$0xff]  ;;  %v1567_v40 = vld [vmem:[#allocation16 + $0x20] sm:$0xff] }
 0x15e   : > { %4565 = vmatprep.subr.mxu1 %v5662_v0  ;;  %1215 = vst.msk [vmem:[#allocation2 + $0x8] sm:$0xff] %vm1214_vm2, %v1213_v5  ;;  %4559 = vmatpush3.msra.mxu0 %v1220_v3  ;;  %v1381_v21 = vld [vmem:[#allocation10 + $0x8] sm:$0xff]  ;;  %v1570_v34 = vld [vmem:[#allocation16 + $0x38] sm:$0xff]  ;;  %v1569_v36 = vld [vmem:[#allocation16 + $0x30] sm:$0xff] }
 0x15f   : > { %4566 = vmatpush3.msra.mxu1 %v1217_v4  ;;  %4570 = vmatprep.subr.mxu0 %v5662_v0  ;;  %v1561_v35 = vld [vmem:[#allocation15 + $0x38] sm:$0xff]  ;;  %v1560_v37 = vld [vmem:[#allocation15 + $0x30] sm:$0xff]  ;;  %v1568_v38 = vld [vmem:[#allocation16 + $0x28] sm:$0xff] }
 0x160   : > { %4589 = vmatprep.subr.mxu1 %v5662_v0  ;;  %v1559_v39 = vld [vmem:[#allocation15 + $0x28] sm:$0xff]  ;;  %v1558_v41 = vld [vmem:[#allocation15 + $0x20] sm:$0xff]  ;;  %v1566_v42 = vld [vmem:[#allocation16 + $0x18] sm:$0xff] }
 0x161   : > { %v1557_v43 = vld [vmem:[#allocation15 + $0x18] sm:$0xff]  ;;  %v1565_v44 = vld [vmem:[#allocation16 + $0x10] sm:$0xff]  ;;  %v1564_v46 = vld [vmem:[#allocation16 + $0x8] sm:$0xff] }
 0x162   : > { %v1556_v45 = vld [vmem:[#allocation15 + $0x10] sm:$0xff]  ;;  %v1555_v47 = vld [vmem:[#allocation15 + $0x8] sm:$0xff]  ;;  %v1563_v48 = vld [vmem:[#allocation16] sm:$0xff] }
 0x163   : > { %v1554_v49 = vld [vmem:[#allocation15] sm:$0xff]  ;;  %v4323_v52 = vld [vmem:[#allocation13] ss:$0 sm:$0xff]  ;;  %v1743_v62 = vld [vmem:[#allocation19 + $0x30] sm:$0xff] }
 0x164   : > { %v1744_v60 = vld [vmem:[#allocation19 + $0x38] sm:$0xff]  ;;  %v1734_v63 = vld [vmem:[#allocation18 + $0x30] sm:$0xff]  ;;  %v1742_v1 = vld [vmem:[#allocation19 + $0x28] sm:$0xff] }
 0x165   : > { %v1219_v6 = vld [vmem:[#allocation2 + $0x8] sm:$0xff]  ;;  %v1733_v2 = vld [vmem:[#allocation18 + $0x28] sm:$0xff]  ;;  %v1741_v3 = vld [vmem:[#allocation19 + $0x20] sm:$0xff] }
 0x166   : > { %v1216_v7 = vld [vmem:[#allocation2 + $0x7] sm:$0xff]  ;;  %4561 = vmatmul.mubr.msk.f32.vlgmr.msra.gmra.mxu0 %vm1214_vm2, %v1219_v6  ;;  %v1732_v4 = vld [vmem:[#allocation18 + $0x20] sm:$0xff] }
 0x167   : > { %4568 = vmatmul.mubr.msk.f32.vlgmr.msra.gmra.mxu1 %vm1214_vm2, %v1216_v7  ;;  %4586 = vmatprep.mubr.msk.f32.mxu0 %vm5663_vm1, %v5662_v0  ;;  %v1735_v61 = vld [vmem:[#allocation18 + $0x38] sm:$0xff]  ;;  %v1739_v7 = vld [vmem:[#allocation19 + $0x10] sm:$0xff] }
 0x168   : > { %4605 = vmatprep.mubr.msk.f32.mxu1 %vm5663_vm1, %v5662_v0  ;;  %4571 = vmatpush3.msra.mxu0 %v1396_v8  ;;  %v1740_v5 = vld [vmem:[#allocation19 + $0x18] sm:$0xff]  ;;  %v1730_v8 = vld [vmem:[#allocation18 + $0x10] sm:$0xff] }
 0x169   : > { %4590 = vmatpush3.msra.mxu1 %v1387_v9  ;;  %4572 = vmatprep.subr.mxu0 %v5662_v0  ;;  %v1731_v6 = vld [vmem:[#allocation18 + $0x18] sm:$0xff]  ;;  %v1738_v9 = vld [vmem:[#allocation19 + $0x8] sm:$0xff] }
 0x16a   : > { %4591 = vmatprep.subr.mxu1 %v5662_v0  ;;  %4573 = vmatpush3.msra.mxu0 %v1395_v10  ;;  %v1729_v10 = vld [vmem:[#allocation18 + $0x8] sm:$0xff] }
 0x16b   : > { %4592 = vmatpush3.msra.mxu1 %v1386_v11  ;;  %4574 = vmatprep.subr.mxu0 %v5662_v0  ;;  %v1737_v11 = vld [vmem:[#allocation19] sm:$0xff] }
 0x16c   : > { %4593 = vmatprep.subr.mxu1 %v5662_v0  ;;  %4575 = vmatpush3.msra.mxu0 %v1394_v12  ;;  %v1728_v12 = vld [vmem:[#allocation18] sm:$0xff] }
 0x16d   : > { %4594 = vmatpush3.msra.mxu1 %v1385_v13  ;;  %4576 = vmatprep.subr.mxu0 %v5662_v0  ;;  %v1964_v13 = vld [vmem:[#allocation22 + $0xe8] sm:$0xff] }
 0x16e   : > { %4595 = vmatprep.subr.mxu1 %v5662_v0  ;;  %4577 = vmatpush3.msra.mxu0 %v1393_v14  ;;  %v1966_v14 = vld [vmem:[#allocation22 + $0xf8] sm:$0xff] }
 0x16f   : > { %4596 = vmatpush3.msra.mxu1 %v1384_v15  ;;  %4578 = vmatprep.subr.mxu0 %v5662_v0 }
 0x170   : > { %4597 = vmatprep.subr.mxu1 %v5662_v0  ;;  %4579 = vmatpush3.msra.mxu0 %v1392_v16 }
 0x171   : > { %4598 = vmatpush3.msra.mxu1 %v1383_v17  ;;  %4580 = vmatprep.subr.mxu0 %v5662_v0  ;;  %v4326_v17 = vld [vmem:[%s6349_s0] ss:$0 sm:$0xff] }
 0x172   : > { %4599 = vmatprep.subr.mxu1 %v5662_v0  ;;  %4581 = vmatpush3.msra.mxu0 %v1391_v18 }
 0x173   : > { %4600 = vmatpush3.msra.mxu1 %v1382_v19  ;;  %4582 = vmatprep.subr.mxu0 %v5662_v0 }
 0x174   : > { %4601 = vmatprep.subr.mxu1 %v5662_v0  ;;  %4583 = vmatpush3.msra.mxu0 %v1390_v20 }
 0x175   : > { %4602 = vmatpush3.msra.mxu1 %v1381_v21  ;;  %4584 = vmatprep.subr.mxu0 %v5662_v0 }
 0x176   : > { %4603 = vmatprep.subr.mxu1 %v5662_v0  ;;  %4585 = vmatpush3.msra.mxu0 %v1389_v22 }
 0x177   : > { %4604 = vmatpush3.msra.mxu1 %v1380_v23  ;;  %4608 = vmatprep.subr.mxu0 %v5662_v0  ;;  %v1963_v23 = vld [vmem:[#allocation22 + $0xe0] sm:$0xff] }
 0x178   : > { %4627 = vmatprep.subr.mxu1 %v5662_v0 }
 0x226   : > { %v1291_v24 = vpop.f32.mrf.mxu0 }
 0x227   : > { %v1364_v25 = vpop.f32.mrf.mxu1 }
 0x228   : > { %v1365_v27 = vadd.f32 %v1364_v25, %v1291_v24  ;;  %v4562_v28 = vpop.f32.mrf.mxu0  ;;  %v1965_v24 = vld [vmem:[#allocation22 + $0xf0] sm:$0xff] }
 0x229   : > { %v4569_v29 = vpop.f32.mrf.mxu1  ;;  %v1962_v28 = vld [vmem:[#allocation22 + $0xd8] sm:$0xff] }
 0x22a   : > { %v1375_v30 = vadd.f32 %v4320_v26, %v1365_v27  ;;  %v1960_v27 = vld [vmem:[#allocation22 + $0xc8] sm:$0xff]  ;;  %v1959_v29 = vld [vmem:[#allocation22 + $0xc0] sm:$0xff] }
 0x22c   : > { %v1376_v31 = vmax.f32 %v1375_v30, 0.0  ;;  %v1961_v30 = vld [vmem:[#allocation22 + $0xd0] sm:$0xff] }
 0x22e   : > { %1378 = vst.msk [vmem:[#allocation3 + $0x8] sm:$0xff] %vm1377_vm4, %v1376_v31  ;;  %v1956_v31 = vld [vmem:[#allocation22 + $0xa8] sm:$0xff] }
 0x235   : > { %v1388_v32 = vld [vmem:[#allocation3 + $0x8] sm:$0xff] }
 0x236   : > { %v1379_v33 = vld [vmem:[#allocation3 + $0x7] sm:$0xff]  ;;  %4587 = vmatmul.mubr.msk.f32.vlgmr.msra.gmra.mxu0 %vm1377_vm4, %v1388_v32  ;;  %v1958_v32 = vld [vmem:[#allocation22 + $0xb8] sm:$0xff] }
 0x237   : > { %4606 = vmatmul.mubr.msk.f32.vlgmr.msra.gmra.mxu1 %vm1377_vm4, %v1379_v33  ;;  %4624 = vmatprep.mubr.msk.f32.mxu0 %vm5663_vm1, %v5662_v0  ;;  %v1955_v33 = vld [vmem:[#allocation22 + $0xa0] sm:$0xff] }
 0x238   : > { %4643 = vmatprep.mubr.msk.f32.mxu1 %vm5663_vm1, %v5662_v0  ;;  %4609 = vmatpush3.msra.mxu0 %v1570_v34  ;;  %v1957_v34 = vld [vmem:[#allocation22 + $0xb0] sm:$0xff] }
 0x239   : > { %4628 = vmatpush3.msra.mxu1 %v1561_v35  ;;  %4610 = vmatprep.subr.mxu0 %v5662_v0  ;;  %v1952_v35 = vld [vmem:[#allocation22 + $0x88] sm:$0xff] }
 0x23a   : > { %4629 = vmatprep.subr.mxu1 %v5662_v0  ;;  %4611 = vmatpush3.msra.mxu0 %v1569_v36  ;;  %v1954_v36 = vld [vmem:[#allocation22 + $0x98] sm:$0xff] }
 0x23b   : > { %4630 = vmatpush3.msra.mxu1 %v1560_v37  ;;  %4612 = vmatprep.subr.mxu0 %v5662_v0  ;;  %v1951_v37 = vld [vmem:[#allocation22 + $0x80] sm:$0xff] }
 0x23c   : > { %4631 = vmatprep.subr.mxu1 %v5662_v0  ;;  %4613 = vmatpush3.msra.mxu0 %v1568_v38  ;;  %v1953_v38 = vld [vmem:[#allocation22 + $0x90] sm:$0xff] }
 0x23d   : > { %4632 = vmatpush3.msra.mxu1 %v1559_v39  ;;  %4614 = vmatprep.subr.mxu0 %v5662_v0  ;;  %v1948_v39 = vld [vmem:[#allocation22 + $0x68] sm:$0xff] }
 0x23e   : > { %4633 = vmatprep.subr.mxu1 %v5662_v0  ;;  %4615 = vmatpush3.msra.mxu0 %v1567_v40  ;;  %v1950_v40 = vld [vmem:[#allocation22 + $0x78] sm:$0xff] }
 0x23f   : > { %4634 = vmatpush3.msra.mxu1 %v1558_v41  ;;  %4616 = vmatprep.subr.mxu0 %v5662_v0  ;;  %v1947_v41 = vld [vmem:[#allocation22 + $0x60] sm:$0xff] }
 0x240   : > { %4635 = vmatprep.subr.mxu1 %v5662_v0  ;;  %4617 = vmatpush3.msra.mxu0 %v1566_v42  ;;  %v1949_v42 = vld [vmem:[#allocation22 + $0x70] sm:$0xff] }
 0x241   : > { %4636 = vmatpush3.msra.mxu1 %v1557_v43  ;;  %4618 = vmatprep.subr.mxu0 %v5662_v0  ;;  %v1944_v43 = vld [vmem:[#allocation22 + $0x48] sm:$0xff] }
 0x242   : > { %4637 = vmatprep.subr.mxu1 %v5662_v0  ;;  %4619 = vmatpush3.msra.mxu0 %v1565_v44  ;;  %v1946_v44 = vld [vmem:[#allocation22 + $0x58] sm:$0xff] }
 0x243   : > { %4638 = vmatpush3.msra.mxu1 %v1556_v45  ;;  %4620 = vmatprep.subr.mxu0 %v5662_v0  ;;  %v1943_v45 = vld [vmem:[#allocation22 + $0x40] sm:$0xff] }
 0x244   : > { %4639 = vmatprep.subr.mxu1 %v5662_v0  ;;  %4621 = vmatpush3.msra.mxu0 %v1564_v46  ;;  %v1945_v46 = vld [vmem:[#allocation22 + $0x50] sm:$0xff] }
 0x245   : > { %4640 = vmatpush3.msra.mxu1 %v1555_v47  ;;  %4622 = vmatprep.subr.mxu0 %v5662_v0  ;;  %v1940_v47 = vld [vmem:[#allocation22 + $0x28] sm:$0xff] }
 0x246   : > { %4641 = vmatprep.subr.mxu1 %v5662_v0  ;;  %4623 = vmatpush3.msra.mxu0 %v1563_v48  ;;  %v1942_v48 = vld [vmem:[#allocation22 + $0x38] sm:$0xff] }
 0x247   : > { %4642 = vmatpush3.msra.mxu1 %v1554_v49  ;;  %4646 = vmatprep.subr.mxu0 %v5662_v0  ;;  %v1939_v49 = vld [vmem:[#allocation22 + $0x20] sm:$0xff] }
 0x248   : > { %4665 = vmatprep.subr.mxu1 %v5662_v0 }
 0x2f6   : > { %v1466_v50 = vpop.f32.mrf.mxu0 }
 0x2f7   : > { %v1539_v51 = vpop.f32.mrf.mxu1 }
 0x2f8   : > { %v1540_v53 = vadd.f32 %v1539_v51, %v1466_v50  ;;  %v4588_v54 = vpop.f32.mrf.mxu0  ;;  %v1941_v50 = vld [vmem:[#allocation22 + $0x30] sm:$0xff]  ;;  %v1936_v51 = vld [vmem:[#allocation22 + $0x8] sm:$0xff] }
 0x2f9   : > { %v4607_v55 = vpop.f32.mrf.mxu1  ;;  %v1937_v54 = vld [vmem:[#allocation22 + $0x10] sm:$0xff] }
 0x2fa   : > { %v1550_v56 = vadd.f32 %v4323_v52, %v1540_v53  ;;  %v1938_v52 = vld [vmem:[#allocation22 + $0x18] sm:$0xff]  ;;  %v1935_v53 = vld [vmem:[#allocation22] sm:$0xff]  ;;  %v1931_v55 = vld [vmem:[#allocation21 + $0xe8] sm:$0xff] }
 0x2fc   : > { %v1551_v57 = vmax.f32 %v1550_v56, 0.0  ;;  %v1933_v56 = vld [vmem:[#allocation21 + $0xf8] sm:$0xff] }
 0x2fe   : > { %1552 = vst.msk [vmem:[#allocation4 + $0x8] sm:$0xff] %vm1377_vm4, %v1551_v57 }
 0x305   : > { %v1562_v58 = vld [vmem:[#allocation4 + $0x8] sm:$0xff] }
 0x306   : > { %v1553_v59 = vld [vmem:[#allocation4 + $0x7] sm:$0xff]  ;;  %4625 = vmatmul.mubr.msk.f32.vlgmr.msra.gmra.mxu0 %vm1377_vm4, %v1562_v58 }
 0x307   : > { %4644 = vmatmul.mubr.msk.f32.vlgmr.msra.gmra.mxu1 %vm1377_vm4, %v1553_v59  ;;  %4662 = vmatprep.mubr.msk.f32.mxu0 %vm5663_vm1, %v5662_v0  ;;  %v4329_v59 = vld [vmem:[%s6350_s18] ss:$0 sm:$0xff] }
 0x308   : > { %4681 = vmatprep.mubr.msk.f32.mxu1 %vm5663_vm1, %v5662_v0  ;;  %4647 = vmatpush3.msra.mxu0 %v1744_v60 }
 0x309   : > { %4666 = vmatpush3.msra.mxu1 %v1735_v61  ;;  %4648 = vmatprep.subr.mxu0 %v5662_v0 }
 0x30a   : > { %4667 = vmatprep.subr.mxu1 %v5662_v0  ;;  %4649 = vmatpush3.msra.mxu0 %v1743_v62 }
 0x30b   : > { %4668 = vmatpush3.msra.mxu1 %v1734_v63  ;;  %4650 = vmatprep.subr.mxu0 %v5662_v0 }
 0x30c   : > { %4669 = vmatprep.subr.mxu1 %v5662_v0  ;;  %4651 = vmatpush3.msra.mxu0 %v1742_v1 }
 0x30d   : > { %4670 = vmatpush3.msra.mxu1 %v1733_v2  ;;  %4652 = vmatprep.subr.mxu0 %v5662_v0  ;;  %v1930_v2 = vld [vmem:[#allocation21 + $0xe0] sm:$0xff] }
 0x30e   : > { %4671 = vmatprep.subr.mxu1 %v5662_v0  ;;  %4653 = vmatpush3.msra.mxu0 %v1741_v3  ;;  %v1932_v3 = vld [vmem:[#allocation21 + $0xf0] sm:$0xff] }
 0x30f   : > { %4672 = vmatpush3.msra.mxu1 %v1732_v4  ;;  %4654 = vmatprep.subr.mxu0 %v5662_v0 }
 0x310   : > { %4673 = vmatprep.subr.mxu1 %v5662_v0  ;;  %4655 = vmatpush3.msra.mxu0 %v1740_v5  ;;  %v1927_v5 = vld [vmem:[#allocation21 + $0xc8] sm:$0xff] }
 0x311   : > { %4674 = vmatpush3.msra.mxu1 %v1731_v6  ;;  %4656 = vmatprep.subr.mxu0 %v5662_v0  ;;  %v1929_v6 = vld [vmem:[#allocation21 + $0xd8] sm:$0xff] }
 0x312   : > { %4675 = vmatprep.subr.mxu1 %v5662_v0  ;;  %4657 = vmatpush3.msra.mxu0 %v1739_v7  ;;  %v1926_v7 = vld [vmem:[#allocation21 + $0xc0] sm:$0xff] }
 0x313   : > { %4676 = vmatpush3.msra.mxu1 %v1730_v8  ;;  %4658 = vmatprep.subr.mxu0 %v5662_v0  ;;  %v1928_v8 = vld [vmem:[#allocation21 + $0xd0] sm:$0xff] }
 0x314   : > { %4677 = vmatprep.subr.mxu1 %v5662_v0  ;;  %4659 = vmatpush3.msra.mxu0 %v1738_v9  ;;  %v1923_v9 = vld [vmem:[#allocation21 + $0xa8] sm:$0xff] }
 0x315   : > { %4678 = vmatpush3.msra.mxu1 %v1729_v10  ;;  %4660 = vmatprep.subr.mxu0 %v5662_v0  ;;  %v1925_v10 = vld [vmem:[#allocation21 + $0xb8] sm:$0xff] }
 0x316   : > { %4679 = vmatprep.subr.mxu1 %v5662_v0  ;;  %4661 = vmatpush3.msra.mxu0 %v1737_v11  ;;  %v1922_v11 = vld [vmem:[#allocation21 + $0xa0] sm:$0xff] }
 0x317   : > { %4680 = vmatpush3.msra.mxu1 %v1728_v12  ;;  %1986 = vmatprep.subr.mxu0 %v1964_v13  ;;  %v1924_v12 = vld [vmem:[#allocation21 + $0xb0] sm:$0xff]  ;;  %v1919_v13 = vld [vmem:[#allocation21 + $0x88] sm:$0xff] }
 0x318   : > { %2057 = vmatprep.subr.mxu1 %v1966_v14  ;;  %v1921_v14 = vld [vmem:[#allocation21 + $0x98] sm:$0xff] }
 0x3c6   : > { %v1640_v15 = vpop.f32.mrf.mxu0 }
 0x3c7   : > { %v1713_v16 = vpop.f32.mrf.mxu1 }
 0x3c8   : > { %v1714_v18 = vadd.f32 %v1713_v16, %v1640_v15  ;;  %v4626_v19 = vpop.f32.mrf.mxu0  ;;  %v1918_v15 = vld [vmem:[#allocation21 + $0x80] sm:$0xff]  ;;  %v1920_v16 = vld [vmem:[#allocation21 + $0x90] sm:$0xff] }
 0x3c9   : > { %v4645_v20 = vpop.f32.mrf.mxu1  ;;  %v1914_v19 = vld [vmem:[#allocation21 + $0x60] sm:$0xff] }
 0x3ca   : > { %v1724_v21 = vadd.f32 %v4326_v17, %v1714_v18  ;;  %v1915_v17 = vld [vmem:[#allocation21 + $0x68] sm:$0xff]  ;;  %v1917_v18 = vld [vmem:[#allocation21 + $0x78] sm:$0xff]  ;;  %v1916_v20 = vld [vmem:[#allocation21 + $0x70] sm:$0xff] }
 0x3cc   : > { %v1725_v22 = vmax.f32 %v1724_v21, 0.0  ;;  %v1911_v21 = vld [vmem:[#allocation21 + $0x48] sm:$0xff] }
 0x3ce   : > { %1726 = vst.msk [vmem:[#allocation3 + $0x8] sm:$0xff] %vm1377_vm4, %v1725_v22  ;;  %v1913_v22 = vld [vmem:[#allocation21 + $0x58] sm:$0xff] }
 0x3d5   : > { %v1736_v25 = vld [vmem:[#allocation3 + $0x8] sm:$0xff] }
 0x3d6   : > { %v1727_v26 = vld [vmem:[#allocation3 + $0x7] sm:$0xff]  ;;  %4663 = vmatmul.mubr.msk.f32.vlgmr.msra.gmra.mxu0 %vm1377_vm4, %v1736_v25 }
 0x3d7   : > { %4682 = vmatmul.mubr.msk.f32.vlgmr.msra.gmra.mxu1 %vm1377_vm4, %v1727_v26  ;;  %1987 = vmatpush1.msra.mxu0 %v1963_v23  ;;  %v1910_v23 = vld [vmem:[#allocation21 + $0x40] sm:$0xff]  ;;  %v1907_v25 = vld [vmem:[#allocation21 + $0x28] sm:$0xff]  ;;  %v1909_v26 = vld [vmem:[#allocation21 + $0x38] sm:$0xff] }
 0x3d8   : > { %2058 = vmatpush1.msra.mxu1 %v1965_v24  ;;  %2034 = vmatprep.mubr.f32.mxu0 %v5662_v0  ;;  %v1912_v24 = vld [vmem:[#allocation21 + $0x50] sm:$0xff] }
 0x3d9   : > { %2105 = vmatprep.mubr.f32.mxu1 %v5662_v0  ;;  %1988 = vmatprep.subr.mxu0 %v1960_v27  ;;  %v1906_v27 = vld [vmem:[#allocation21 + $0x20] sm:$0xff] }
 0x3da   : > { %2059 = vmatprep.subr.mxu1 %v1962_v28  ;;  %1989 = vmatpush1.msra.mxu0 %v1959_v29  ;;  %v1908_v28 = vld [vmem:[#allocation21 + $0x30] sm:$0xff]  ;;  %v1903_v29 = vld [vmem:[#allocation21 + $0x8] sm:$0xff] }
 0x3db   : > { %2060 = vmatpush1.msra.mxu1 %v1961_v30  ;;  %1990 = vmatprep.subr.mxu0 %v1956_v31  ;;  %v1905_v30 = vld [vmem:[#allocation21 + $0x18] sm:$0xff]  ;;  %v1902_v31 = vld [vmem:[#allocation21] sm:$0xff] }
 0x3dc   : > { %2061 = vmatprep.subr.mxu1 %v1958_v32  ;;  %1991 = vmatpush1.msra.mxu0 %v1955_v33  ;;  %v1904_v32 = vld [vmem:[#allocation21 + $0x10] sm:$0xff]  ;;  %v2287_v33 = vld [vmem:[#allocation24 + $0xe8] sm:$0xff] }
 0x3dd   : > { %2062 = vmatpush1.msra.mxu1 %v1957_v34  ;;  %1992 = vmatprep.subr.mxu0 %v1952_v35  ;;  %v2289_v34 = vld [vmem:[#allocation24 + $0xf8] sm:$0xff] }
 0x3de   : > { %2063 = vmatprep.subr.mxu1 %v1954_v36  ;;  %1993 = vmatpush1.msra.mxu0 %v1951_v37  ;;  %v2286_v36 = vld [vmem:[#allocation24 + $0xe0] sm:$0xff]  ;;  %v2288_v37 = vld [vmem:[#allocation24 + $0xf0] sm:$0xff] }
 0x3df   : > { %2064 = vmatpush1.msra.mxu1 %v1953_v38  ;;  %1994 = vmatprep.subr.mxu0 %v1948_v39  ;;  %v2283_v38 = vld [vmem:[#allocation24 + $0xc8] sm:$0xff]  ;;  %v2285_v39 = vld [vmem:[#allocation24 + $0xd8] sm:$0xff] }
 0x3e0   : > { %2065 = vmatprep.subr.mxu1 %v1950_v40  ;;  %1995 = vmatpush1.msra.mxu0 %v1947_v41  ;;  %v2282_v40 = vld [vmem:[#allocation24 + $0xc0] sm:$0xff]  ;;  %v2284_v41 = vld [vmem:[#allocation24 + $0xd0] sm:$0xff] }
 0x3e1   : > { %2066 = vmatpush1.msra.mxu1 %v1949_v42  ;;  %1996 = vmatprep.subr.mxu0 %v1944_v43  ;;  %v2279_v42 = vld [vmem:[#allocation24 + $0xa8] sm:$0xff]  ;;  %v2281_v43 = vld [vmem:[#allocation24 + $0xb8] sm:$0xff] }
 0x3e2   : > { %2067 = vmatprep.subr.mxu1 %v1946_v44  ;;  %1997 = vmatpush1.msra.mxu0 %v1943_v45  ;;  %v2278_v44 = vld [vmem:[#allocation24 + $0xa0] sm:$0xff]  ;;  %v2280_v45 = vld [vmem:[#allocation24 + $0xb0] sm:$0xff] }
 0x3e3   : > { %2068 = vmatpush1.msra.mxu1 %v1945_v46  ;;  %1998 = vmatprep.subr.mxu0 %v1940_v47  ;;  %v2275_v46 = vld [vmem:[#allocation24 + $0x88] sm:$0xff]  ;;  %v2277_v47 = vld [vmem:[#allocation24 + $0x98] sm:$0xff] }
 0x3e4   : > { %2069 = vmatprep.subr.mxu1 %v1942_v48  ;;  %1999 = vmatpush1.msra.mxu0 %v1939_v49  ;;  %v2274_v48 = vld [vmem:[#allocation24 + $0x80] sm:$0xff]  ;;  %v2276_v49 = vld [vmem:[#allocation24 + $0x90] sm:$0xff] }
 0x3e5   : > { %2070 = vmatpush1.msra.mxu1 %v1941_v50  ;;  %2000 = vmatprep.subr.mxu0 %v1936_v51  ;;  %v2271_v50 = vld [vmem:[#allocation24 + $0x68] sm:$0xff]  ;;  %v2273_v51 = vld [vmem:[#allocation24 + $0x78] sm:$0xff] }
 0x3e6   : > { %2071 = vmatprep.subr.mxu1 %v1938_v52  ;;  %2001 = vmatpush1.msra.mxu0 %v1935_v53  ;;  %v2270_v52 = vld [vmem:[#allocation24 + $0x60] sm:$0xff]  ;;  %v2272_v53 = vld [vmem:[#allocation24 + $0x70] sm:$0xff] }
 0x3e7   : > { %2072 = vmatpush1.msra.mxu1 %v1937_v54  ;;  %2131 = vmatprep.subr.mxu0 %v1931_v55  ;;  %v2267_v54 = vld [vmem:[#allocation24 + $0x48] sm:$0xff]  ;;  %v2269_v55 = vld [vmem:[#allocation24 + $0x58] sm:$0xff] }
 0x3e8   : > { %2202 = vmatprep.subr.mxu1 %v1933_v56  ;;  %v2266_v56 = vld [vmem:[#allocation24 + $0x40] sm:$0xff] }
 0x496   : > { %v1814_v57 = vpop.f32.mrf.mxu0 }
 0x497   : > { %v1887_v58 = vpop.f32.mrf.mxu1 }
 0x498   : > { %v1888_v60 = vadd.f32 %v1887_v58, %v1814_v57  ;;  %v4664_v61 = vpop.f32.mrf.mxu0  ;;  %v2268_v57 = vld [vmem:[#allocation24 + $0x50] sm:$0xff]  ;;  %v2263_v58 = vld [vmem:[#allocation24 + $0x28] sm:$0xff] }
 0x499   : > { %v4683_v62 = vpop.f32.mrf.mxu1  ;;  %v2264_v61 = vld [vmem:[#allocation24 + $0x30] sm:$0xff] }
 0x49a   : > { %v1898_v63 = vadd.f32 %v4329_v59, %v1888_v60  ;;  %v2265_v59 = vld [vmem:[#allocation24 + $0x38] sm:$0xff]  ;;  %v2262_v60 = vld [vmem:[#allocation24 + $0x20] sm:$0xff]  ;;  %v2259_v62 = vld [vmem:[#allocation24 + $0x8] sm:$0xff] }
 0x49c   : > { %v1899_v1 = vmax.f32 %v1898_v63, 0.0  ;;  %v2261_v63 = vld [vmem:[#allocation24 + $0x18] sm:$0xff] }
 0x49e   : > { %1900 = vst.msk [vmem:[#allocation4 + $0x8] sm:$0xff] %vm1377_vm4, %v1899_v1  ;;  %v2258_v1 = vld [vmem:[#allocation24] sm:$0xff] }
 0x4a5   : > { %v1934_v4 = vld [vmem:[#allocation4 + $0x8] sm:$0xff] }
 0x4a6   : > { %4330 = vmatmul.mubr.msk.f32.vlgmr.msra.gmra.mxu0 %vm1377_vm4, %v1934_v4  ;;  %4331 = vmatmul.mubr.msk.f32.vlgmr.msra.gmra.mxu1 %vm1377_vm4, %v1934_v4  ;;  %v1901_v35 = vld [vmem:[#allocation4 + $0x7] sm:$0xff]  ;;  %v2708_v4 = vld [vmem:[#allocation27 + $0x2f8] sm:$0xff] }
 0x4a7   : > { %2132 = vmatpush1.msra.mxu0 %v1930_v2  ;;  %2203 = vmatpush1.msra.mxu1 %v1932_v3  ;;  %v2260_v2 = vld [vmem:[#allocation24 + $0x10] sm:$0xff]  ;;  %v2644_v3 = vld [vmem:[#allocation27 + $0xf8] sm:$0xff] }
 0x4a8   : > { %2133 = vmatprep.subr.mxu0 %v1927_v5  ;;  %2204 = vmatprep.subr.mxu1 %v1929_v6  ;;  %v2257_v5 = vld [vmem:[#allocation4 + $0x9] sm:$0xff]  ;;  %v2643_v6 = vld [vmem:[#allocation27 + $0xf0] sm:$0xff] }
 0x4a9   : > { %2134 = vmatpush1.msra.mxu0 %v1926_v7  ;;  %2205 = vmatpush1.msra.mxu1 %v1928_v8  ;;  %v2707_v7 = vld [vmem:[#allocation27 + $0x2f0] sm:$0xff]  ;;  %v2642_v8 = vld [vmem:[#allocation27 + $0xe8] sm:$0xff] }
 0x4aa   : > { %2135 = vmatprep.subr.mxu0 %v1923_v9  ;;  %2206 = vmatprep.subr.mxu1 %v1925_v10  ;;  %v2706_v9 = vld [vmem:[#allocation27 + $0x2e8] sm:$0xff]  ;;  %v2641_v10 = vld [vmem:[#allocation27 + $0xe0] sm:$0xff] }
 0x4ab   : > { %2136 = vmatpush1.msra.mxu0 %v1922_v11  ;;  %2207 = vmatpush1.msra.mxu1 %v1924_v12  ;;  %v2705_v11 = vld [vmem:[#allocation27 + $0x2e0] sm:$0xff]  ;;  %v2640_v12 = vld [vmem:[#allocation27 + $0xd8] sm:$0xff] }
 0x4ac   : > { %2137 = vmatprep.subr.mxu0 %v1919_v13  ;;  %2208 = vmatprep.subr.mxu1 %v1921_v14  ;;  %v2704_v13 = vld [vmem:[#allocation27 + $0x2d8] sm:$0xff]  ;;  %v2639_v14 = vld [vmem:[#allocation27 + $0xd0] sm:$0xff] }
 0x4ad   : > { %2138 = vmatpush1.msra.mxu0 %v1918_v15  ;;  %2209 = vmatpush1.msra.mxu1 %v1920_v16  ;;  %v2703_v15 = vld [vmem:[#allocation27 + $0x2d0] sm:$0xff]  ;;  %v2638_v16 = vld [vmem:[#allocation27 + $0xc8] sm:$0xff] }
 0x4ae   : > { %2139 = vmatprep.subr.mxu0 %v1915_v17  ;;  %2210 = vmatprep.subr.mxu1 %v1917_v18  ;;  %v2702_v17 = vld [vmem:[#allocation27 + $0x2c8] sm:$0xff]  ;;  %v2637_v18 = vld [vmem:[#allocation27 + $0xc0] sm:$0xff] }
 0x4af   : > { %2140 = vmatpush1.msra.mxu0 %v1914_v19  ;;  %2211 = vmatpush1.msra.mxu1 %v1916_v20  ;;  %v2701_v19 = vld [vmem:[#allocation27 + $0x2c0] sm:$0xff]  ;;  %v2636_v20 = vld [vmem:[#allocation27 + $0xb8] sm:$0xff] }
 0x4b0   : > { %2141 = vmatprep.subr.mxu0 %v1911_v21  ;;  %2212 = vmatprep.subr.mxu1 %v1913_v22  ;;  %v2700_v21 = vld [vmem:[#allocation27 + $0x2b8] sm:$0xff]  ;;  %v2635_v22 = vld [vmem:[#allocation27 + $0xb0] sm:$0xff] }
 0x4b1   : > { %2142 = vmatpush1.msra.mxu0 %v1910_v23  ;;  %2213 = vmatpush1.msra.mxu1 %v1912_v24  ;;  %v2699_v23 = vld [vmem:[#allocation27 + $0x2b0] sm:$0xff]  ;;  %v2634_v24 = vld [vmem:[#allocation27 + $0xa8] sm:$0xff] }
 0x4b2   : > { %2143 = vmatprep.subr.mxu0 %v1907_v25  ;;  %2214 = vmatprep.subr.mxu1 %v1909_v26  ;;  %v2698_v25 = vld [vmem:[#allocation27 + $0x2a8] sm:$0xff]  ;;  %v2633_v26 = vld [vmem:[#allocation27 + $0xa0] sm:$0xff] }
 0x4b3   : > { %2144 = vmatpush1.msra.mxu0 %v1906_v27  ;;  %2215 = vmatpush1.msra.mxu1 %v1908_v28  ;;  %v2697_v27 = vld [vmem:[#allocation27 + $0x2a0] sm:$0xff]  ;;  %v2632_v28 = vld [vmem:[#allocation27 + $0x98] sm:$0xff] }
 0x4b4   : > { %2145 = vmatprep.subr.mxu0 %v1903_v29  ;;  %2216 = vmatprep.subr.mxu1 %v1905_v30  ;;  %v2696_v29 = vld [vmem:[#allocation27 + $0x298] sm:$0xff]  ;;  %v2631_v30 = vld [vmem:[#allocation27 + $0x90] sm:$0xff] }
 0x4b5   : > { %2146 = vmatpush1.msra.mxu0 %v1902_v31  ;;  %2179 = vmatprep.mubr.f32.mxu0 %v5662_v0  ;;  %v2695_v31 = vld [vmem:[#allocation27 + $0x290] sm:$0xff] }
 0x4b6   : > { %2217 = vmatpush1.msra.mxu1 %v1904_v32  ;;  %2250 = vmatprep.mubr.f32.mxu1 %v5662_v0  ;;  %v2630_v32 = vld [vmem:[#allocation27 + $0x88] sm:$0xff] }
 0x4b7   : > { %4332 = vmatmul.mubr.msk.f32.vlgmr.msra.gmra.mxu0 %vm1377_vm4, %v1901_v35  ;;  %4333 = vmatmul.mubr.msk.f32.vlgmr.msra.gmra.mxu1 %vm1377_vm4, %v1901_v35  ;;  %v2693_v35 = vld [vmem:[#allocation27 + $0x280] sm:$0xff] }
 0x4b8   : > { %2309 = vmatprep.subr.mxu0 %v2287_v33  ;;  %2380 = vmatprep.subr.mxu1 %v2289_v34  ;;  %v2694_v33 = vld [vmem:[#allocation27 + $0x288] sm:$0xff]  ;;  %v2629_v34 = vld [vmem:[#allocation27 + $0x80] sm:$0xff] }
 0x4b9   : > { %2310 = vmatpush1.msra.mxu0 %v2286_v36  ;;  %2381 = vmatpush1.msra.mxu1 %v2288_v37  ;;  %v2628_v36 = vld [vmem:[#allocation27 + $0x78] sm:$0xff] }
 0x4ba   : > { %2311 = vmatprep.subr.mxu0 %v2283_v38  ;;  %2382 = vmatprep.subr.mxu1 %v2285_v39  ;;  %v2692_v37 = vld [vmem:[#allocation27 + $0x278] sm:$0xff]  ;;  %v2627_v38 = vld [vmem:[#allocation27 + $0x70] sm:$0xff] }
 0x4bb   : > { %2312 = vmatpush1.msra.mxu0 %v2282_v40  ;;  %2383 = vmatpush1.msra.mxu1 %v2284_v41  ;;  %v2691_v39 = vld [vmem:[#allocation27 + $0x270] sm:$0xff]  ;;  %v2626_v40 = vld [vmem:[#allocation27 + $0x68] sm:$0xff] }
 0x4bc   : > { %2313 = vmatprep.subr.mxu0 %v2279_v42  ;;  %2384 = vmatprep.subr.mxu1 %v2281_v43  ;;  %v2690_v41 = vld [vmem:[#allocation27 + $0x268] sm:$0xff]  ;;  %v2625_v42 = vld [vmem:[#allocation27 + $0x60] sm:$0xff] }
 0x4bd   : > { %2314 = vmatpush1.msra.mxu0 %v2278_v44  ;;  %2385 = vmatpush1.msra.mxu1 %v2280_v45  ;;  %v2689_v43 = vld [vmem:[#allocation27 + $0x260] sm:$0xff]  ;;  %v2624_v44 = vld [vmem:[#allocation27 + $0x58] sm:$0xff] }
 0x4be   : > { %2315 = vmatprep.subr.mxu0 %v2275_v46  ;;  %2386 = vmatprep.subr.mxu1 %v2277_v47  ;;  %v2688_v45 = vld [vmem:[#allocation27 + $0x258] sm:$0xff]  ;;  %v2623_v46 = vld [vmem:[#allocation27 + $0x50] sm:$0xff] }
 0x4bf   : > { %2316 = vmatpush1.msra.mxu0 %v2274_v48  ;;  %2387 = vmatpush1.msra.mxu1 %v2276_v49  ;;  %v2687_v47 = vld [vmem:[#allocation27 + $0x250] sm:$0xff]  ;;  %v2622_v48 = vld [vmem:[#allocation27 + $0x48] sm:$0xff] }
 0x4c0   : > { %2317 = vmatprep.subr.mxu0 %v2271_v50  ;;  %2388 = vmatprep.subr.mxu1 %v2273_v51  ;;  %v2686_v49 = vld [vmem:[#allocation27 + $0x248] sm:$0xff]  ;;  %v2621_v50 = vld [vmem:[#allocation27 + $0x40] sm:$0xff] }
 0x4c1   : > { %2318 = vmatpush1.msra.mxu0 %v2270_v52  ;;  %2389 = vmatpush1.msra.mxu1 %v2272_v53  ;;  %v2685_v51 = vld [vmem:[#allocation27 + $0x240] sm:$0xff]  ;;  %v2620_v52 = vld [vmem:[#allocation27 + $0x38] sm:$0xff] }
 0x4c2   : > { %2319 = vmatprep.subr.mxu0 %v2267_v54  ;;  %2390 = vmatprep.subr.mxu1 %v2269_v55  ;;  %v2684_v53 = vld [vmem:[#allocation27 + $0x238] sm:$0xff]  ;;  %v2619_v54 = vld [vmem:[#allocation27 + $0x30] sm:$0xff] }
 0x4c3   : > { %2320 = vmatpush1.msra.mxu0 %v2266_v56  ;;  %2391 = vmatpush1.msra.mxu1 %v2268_v57  ;;  %v2683_v55 = vld [vmem:[#allocation27 + $0x230] sm:$0xff]  ;;  %v2618_v56 = vld [vmem:[#allocation27 + $0x28] sm:$0xff] }
 0x4c4   : > { %2321 = vmatprep.subr.mxu0 %v2263_v58  ;;  %2392 = vmatprep.subr.mxu1 %v2265_v59  ;;  %v2682_v57 = vld [vmem:[#allocation27 + $0x228] sm:$0xff]  ;;  %v2617_v58 = vld [vmem:[#allocation27 + $0x20] sm:$0xff] }
 0x4c5   : > { %2322 = vmatpush1.msra.mxu0 %v2262_v60  ;;  %2393 = vmatpush1.msra.mxu1 %v2264_v61  ;;  %v2681_v59 = vld [vmem:[#allocation27 + $0x220] sm:$0xff]  ;;  %v2616_v60 = vld [vmem:[#allocation27 + $0x18] sm:$0xff] }
 0x4c6   : > { %2323 = vmatprep.subr.mxu0 %v2259_v62  ;;  %2394 = vmatprep.subr.mxu1 %v2261_v63  ;;  %v2680_v61 = vld [vmem:[#allocation27 + $0x218] sm:$0xff]  ;;  %v2615_v62 = vld [vmem:[#allocation27 + $0x10] sm:$0xff] }
 0x4c7   : > { %2324 = vmatpush1.msra.mxu0 %v2258_v1  ;;  %2357 = vmatprep.mubr.f32.mxu0 %v5662_v0  ;;  %v2679_v63 = vld [vmem:[#allocation27 + $0x210] sm:$0xff]  ;;  %v2614_v1 = vld [vmem:[#allocation27 + $0x8] sm:$0xff] }
 0x4c8   : > { %2395 = vmatpush1.msra.mxu1 %v2260_v2  ;;  %2428 = vmatprep.mubr.f32.mxu1 %v5662_v0  ;;  %v2678_v2 = vld [vmem:[#allocation27 + $0x208] sm:$0xff] }
 0x4c9   : > { %4334 = vmatmul.mubr.msk.f32.vlgmr.msra.gmra.mxu0 %vm1377_vm4, %v2257_v5  ;;  %4335 = vmatmul.mubr.msk.f32.vlgmr.msra.gmra.mxu1 %vm1377_vm4, %v2257_v5  ;;  %v2676_v5 = vld [vmem:[#allocation27 + $0x1f8] sm:$0xff] }
 0x4ca   : > { %2741 = vmatprep.subr.mxu0 %v2644_v3  ;;  %2812 = vmatprep.subr.mxu1 %v2708_v4  ;;  %v2613_v3 = vld [vmem:[#allocation27] sm:$0xff] }
 0x4cb   : > { %2742 = vmatpush1.msra.mxu0 %v2643_v6  ;;  %2813 = vmatpush1.msra.mxu1 %v2707_v7  ;;  %v2677_v4 = vld [vmem:[#allocation27 + $0x200] sm:$0xff]  ;;  %v2740_v6 = vld [vmem:[#allocation27 + $0x3f8] sm:$0xff]  ;;  %v2675_v7 = vld [vmem:[#allocation27 + $0x1f0] sm:$0xff] }
 0x4cc   : > { %2743 = vmatprep.subr.mxu0 %v2642_v8  ;;  %2814 = vmatprep.subr.mxu1 %v2706_v9  ;;  %v2739_v8 = vld [vmem:[#allocation27 + $0x3f0] sm:$0xff]  ;;  %v2674_v9 = vld [vmem:[#allocation27 + $0x1e8] sm:$0xff] }
 0x4cd   : > { %2744 = vmatpush1.msra.mxu0 %v2641_v10  ;;  %2815 = vmatpush1.msra.mxu1 %v2705_v11  ;;  %v2738_v10 = vld [vmem:[#allocation27 + $0x3e8] sm:$0xff]  ;;  %v2673_v11 = vld [vmem:[#allocation27 + $0x1e0] sm:$0xff] }
 0x4ce   : > { %2745 = vmatprep.subr.mxu0 %v2640_v12  ;;  %2816 = vmatprep.subr.mxu1 %v2704_v13  ;;  %v2737_v12 = vld [vmem:[#allocation27 + $0x3e0] sm:$0xff]  ;;  %v2672_v13 = vld [vmem:[#allocation27 + $0x1d8] sm:$0xff] }
 0x4cf   : > { %2746 = vmatpush1.msra.mxu0 %v2639_v14  ;;  %2817 = vmatpush1.msra.mxu1 %v2703_v15  ;;  %v2736_v14 = vld [vmem:[#allocation27 + $0x3d8] sm:$0xff]  ;;  %v2671_v15 = vld [vmem:[#allocation27 + $0x1d0] sm:$0xff] }
 0x4d0   : > { %2747 = vmatprep.subr.mxu0 %v2638_v16  ;;  %2818 = vmatprep.subr.mxu1 %v2702_v17  ;;  %v2735_v16 = vld [vmem:[#allocation27 + $0x3d0] sm:$0xff]  ;;  %v2670_v17 = vld [vmem:[#allocation27 + $0x1c8] sm:$0xff] }
 0x4d1   : > { %2748 = vmatpush1.msra.mxu0 %v2637_v18  ;;  %2819 = vmatpush1.msra.mxu1 %v2701_v19  ;;  %v2734_v18 = vld [vmem:[#allocation27 + $0x3c8] sm:$0xff]  ;;  %v2669_v19 = vld [vmem:[#allocation27 + $0x1c0] sm:$0xff] }
 0x4d2   : > { %2749 = vmatprep.subr.mxu0 %v2636_v20  ;;  %2820 = vmatprep.subr.mxu1 %v2700_v21  ;;  %v2733_v20 = vld [vmem:[#allocation27 + $0x3c0] sm:$0xff]  ;;  %v2668_v21 = vld [vmem:[#allocation27 + $0x1b8] sm:$0xff] }
 0x4d3   : > { %2750 = vmatpush1.msra.mxu0 %v2635_v22  ;;  %2821 = vmatpush1.msra.mxu1 %v2699_v23  ;;  %v2732_v22 = vld [vmem:[#allocation27 + $0x3b8] sm:$0xff]  ;;  %v2667_v23 = vld [vmem:[#allocation27 + $0x1b0] sm:$0xff] }
 0x4d4   : > { %2751 = vmatprep.subr.mxu0 %v2634_v24  ;;  %2822 = vmatprep.subr.mxu1 %v2698_v25  ;;  %v2731_v24 = vld [vmem:[#allocation27 + $0x3b0] sm:$0xff]  ;;  %v2666_v25 = vld [vmem:[#allocation27 + $0x1a8] sm:$0xff] }
 0x4d5   : > { %2752 = vmatpush1.msra.mxu0 %v2633_v26  ;;  %2823 = vmatpush1.msra.mxu1 %v2697_v27  ;;  %v1193_v26 = vlaneseq  ;;  %v2730_v27 = vld [vmem:[#allocation27 + $0x3a8] sm:$0xff] }
 0x4d6   : > { %2753 = vmatprep.subr.mxu0 %v2632_v28  ;;  %2824 = vmatprep.subr.mxu1 %v2696_v29  ;;  %v2665_v28 = vld [vmem:[#allocation27 + $0x1a0] sm:$0xff] }
 0x4d7   : > { %2754 = vmatpush1.msra.mxu0 %v2631_v30  ;;  %2825 = vmatpush1.msra.mxu1 %v2695_v31  ;;  %v2729_v29 = vld [vmem:[#allocation27 + $0x3a0] sm:$0xff]  ;;  %v2664_v30 = vld [vmem:[#allocation27 + $0x198] sm:$0xff]  ;;  %vm1195_vm5 = vcmp.lt.s32.totalorder %v1193_v26, 512  ;;  %vm1203_vm6 = vcmp.lt.s32.totalorder %v1193_v26, 256 }
 0x4d8   : > { %2755 = vmatprep.subr.mxu0 %v2630_v32  ;;  %2826 = vmatprep.subr.mxu1 %v2694_v33  ;;  %v2728_v31 = vld [vmem:[#allocation27 + $0x398] sm:$0xff]  ;;  %v2663_v32 = vld [vmem:[#allocation27 + $0x190] sm:$0xff]  ;;  %1198 = vst.msk [vmem:[#allocation5 + $0x7] ss:$8 sm:$0xf] %vm1195_vm5, %v5662_v0 }
 0x4d9   : > { %2756 = vmatpush1.msra.mxu0 %v2629_v34  ;;  %2827 = vmatpush1.msra.mxu1 %v2693_v35  ;;  %v2727_v33 = vld [vmem:[#allocation27 + $0x390] sm:$0xff]  ;;  %v2662_v34 = vld [vmem:[#allocation27 + $0x188] sm:$0xff]  ;;  %1201 = vst.msk [vmem:[#allocation5 + $0x40] ss:$8 sm:$0xf] %vm1195_vm5, %v5662_v0 }
 0x4da   : > { %2757 = vmatprep.subr.mxu0 %v2628_v36  ;;  %2828 = vmatprep.subr.mxu1 %v2692_v37  ;;  %v2726_v35 = vld [vmem:[#allocation27 + $0x388] sm:$0xff]  ;;  %1206 = vst.msk [vmem:[#allocation6 + $0x7] ss:$8 sm:$0x3] %vm1203_vm6, %v5662_v0  ;;  %v2661_v36 = vld [vmem:[#allocation27 + $0x180] sm:$0xff] }
 0x4db   : > { %2758 = vmatpush1.msra.mxu0 %v2627_v38  ;;  %2829 = vmatpush1.msra.mxu1 %v2691_v39  ;;  %1209 = vst.msk [vmem:[#allocation6 + $0x20] ss:$8 sm:$0x3] %vm1203_vm6, %v5662_v0  ;;  %v2725_v37 = vld [vmem:[#allocation27 + $0x380] sm:$0xff]  ;;  %v2660_v38 = vld [vmem:[#allocation27 + $0x178] sm:$0xff] }
 0x4dc   : > { %2759 = vmatprep.subr.mxu0 %v2626_v40  ;;  %2830 = vmatprep.subr.mxu1 %v2690_v41  ;;  %v2724_v39 = vld [vmem:[#allocation27 + $0x378] sm:$0xff]  ;;  %v2659_v40 = vld [vmem:[#allocation27 + $0x170] sm:$0xff] }
 0x4dd   : > { %2760 = vmatpush1.msra.mxu0 %v2625_v42  ;;  %2831 = vmatpush1.msra.mxu1 %v2689_v43  ;;  %v2723_v41 = vld [vmem:[#allocation27 + $0x370] sm:$0xff]  ;;  %v2658_v42 = vld [vmem:[#allocation27 + $0x168] sm:$0xff] }
 0x4de   : > { %2761 = vmatprep.subr.mxu0 %v2624_v44  ;;  %2832 = vmatprep.subr.mxu1 %v2688_v45  ;;  %v2722_v43 = vld [vmem:[#allocation27 + $0x368] sm:$0xff]  ;;  %v2657_v44 = vld [vmem:[#allocation27 + $0x160] sm:$0xff] }
 0x4df   : > { %2762 = vmatpush1.msra.mxu0 %v2623_v46  ;;  %2833 = vmatpush1.msra.mxu1 %v2687_v47  ;;  %v2721_v45 = vld [vmem:[#allocation27 + $0x360] sm:$0xff]  ;;  %v2656_v46 = vld [vmem:[#allocation27 + $0x158] sm:$0xff] }
 0x4e0   : > { %2763 = vmatprep.subr.mxu0 %v2622_v48  ;;  %2834 = vmatprep.subr.mxu1 %v2686_v49  ;;  %v2720_v47 = vld [vmem:[#allocation27 + $0x358] sm:$0xff]  ;;  %v2655_v48 = vld [vmem:[#allocation27 + $0x150] sm:$0xff] }
 0x4e1   : > { %2764 = vmatpush1.msra.mxu0 %v2621_v50  ;;  %2835 = vmatpush1.msra.mxu1 %v2685_v51  ;;  %v2719_v49 = vld [vmem:[#allocation27 + $0x350] sm:$0xff]  ;;  %v2654_v50 = vld [vmem:[#allocation27 + $0x148] sm:$0xff] }
 0x4e2   : > { %2765 = vmatprep.subr.mxu0 %v2620_v52  ;;  %2836 = vmatprep.subr.mxu1 %v2684_v53  ;;  %v2718_v51 = vld [vmem:[#allocation27 + $0x348] sm:$0xff]  ;;  %v2653_v52 = vld [vmem:[#allocation27 + $0x140] sm:$0xff] }
 0x4e3   : > { %2766 = vmatpush1.msra.mxu0 %v2619_v54  ;;  %2837 = vmatpush1.msra.mxu1 %v2683_v55  ;;  %v2717_v53 = vld [vmem:[#allocation27 + $0x340] sm:$0xff]  ;;  %v2652_v54 = vld [vmem:[#allocation27 + $0x138] sm:$0xff] }
 0x4e4   : > { %2767 = vmatprep.subr.mxu0 %v2618_v56  ;;  %2838 = vmatprep.subr.mxu1 %v2682_v57  ;;  %v2716_v55 = vld [vmem:[#allocation27 + $0x338] sm:$0xff]  ;;  %v2651_v56 = vld [vmem:[#allocation27 + $0x130] sm:$0xff] }
 0x4e5   : > { %2768 = vmatpush1.msra.mxu0 %v2617_v58  ;;  %2839 = vmatpush1.msra.mxu1 %v2681_v59  ;;  %v2715_v57 = vld [vmem:[#allocation27 + $0x330] sm:$0xff]  ;;  %v2650_v58 = vld [vmem:[#allocation27 + $0x128] sm:$0xff] }
 0x4e6   : > { %2769 = vmatprep.subr.mxu0 %v2616_v60  ;;  %2840 = vmatprep.subr.mxu1 %v2680_v61  ;;  %v2714_v59 = vld [vmem:[#allocation27 + $0x328] sm:$0xff]  ;;  %v2649_v60 = vld [vmem:[#allocation27 + $0x120] sm:$0xff] }
 0x4e7   : > { %2770 = vmatpush1.msra.mxu0 %v2615_v62  ;;  %2841 = vmatpush1.msra.mxu1 %v2679_v63  ;;  %v2713_v61 = vld [vmem:[#allocation27 + $0x320] sm:$0xff]  ;;  %v2648_v62 = vld [vmem:[#allocation27 + $0x118] sm:$0xff] }
 0x4e8   : > { %2771 = vmatprep.subr.mxu0 %v2614_v1  ;;  %2842 = vmatprep.subr.mxu1 %v2678_v2  ;;  %v2712_v63 = vld [vmem:[#allocation27 + $0x318] sm:$0xff]  ;;  %v2647_v1 = vld [vmem:[#allocation27 + $0x110] sm:$0xff] }
 0x4e9   : > { %2772 = vmatpush1.msra.mxu0 %v2613_v3  ;;  %2843 = vmatpush1.msra.mxu1 %v2677_v4  ;;  %v2711_v2 = vld [vmem:[#allocation27 + $0x310] sm:$0xff]  ;;  %v2646_v3 = vld [vmem:[#allocation27 + $0x108] sm:$0xff] }
 0x4ea   : > { %2773 = vmatprep.subr.mxu0 %v2676_v5  ;;  %2844 = vmatprep.subr.mxu1 %v2740_v6  ;;  %v2710_v4 = vld [vmem:[#allocation27 + $0x308] sm:$0xff]  ;;  %v2645_v5 = vld [vmem:[#allocation27 + $0x100] sm:$0xff] }
 0x4eb   : > { %2774 = vmatpush2.msra.mxu0 %v2675_v7  ;;  %2845 = vmatpush2.msra.mxu1 %v2739_v8  ;;  %v2709_v6 = vld [vmem:[#allocation27 + $0x300] sm:$0xff]  ;;  %v2512_v7 = vld [vmem:[#allocation25 + $0xf8] sm:$0xff] }
 0x4ec   : > { %2775 = vmatprep.subr.mxu0 %v2674_v9  ;;  %2846 = vmatprep.subr.mxu1 %v2738_v10  ;;  %v2576_v8 = vld [vmem:[#allocation25 + $0x2f8] sm:$0xff] }
 0x4ed   : > { %2776 = vmatpush2.msra.mxu0 %v2673_v11  ;;  %2847 = vmatpush2.msra.mxu1 %v2737_v12  ;;  %v6186_v11 = vshrl.u32 %v1193_v26, 7 }
 0x4ee   : > { %2777 = vmatprep.subr.mxu0 %v2672_v13  ;;  %2848 = vmatprep.subr.mxu1 %v2736_v14 }
 0x4ef   : > { %2778 = vmatpush2.msra.mxu0 %v2671_v15  ;;  %2849 = vmatpush2.msra.mxu1 %v2735_v16  ;;  %v2443_v16 = vsub.s32 0, %v6186_v11 }
 0x4f0   : > { %2779 = vmatprep.subr.mxu0 %v2670_v17  ;;  %2850 = vmatprep.subr.mxu1 %v2734_v18  ;;  %v2451_v17 = vsub.s32 2, %v6186_v11  ;;  %v2439_v18 = vld [vmem:[%s6351_s26] sm:$0xf] }
 0x4f1   : > { %2780 = vmatpush2.msra.mxu0 %v2669_v19  ;;  %2851 = vmatpush2.msra.mxu1 %v2733_v20  ;;  %v2447_v19 = vsub.s32 1, %v6186_v11  ;;  %v2455_v20 = vsub.s32 3, %v6186_v11  ;;  %v3612_v11 = vld [vmem:[#allocation33 + $0x68] sm:$0xff] }
 0x4f2   : > { %2781 = vmatprep.subr.mxu0 %v2668_v21  ;;  %2852 = vmatprep.subr.mxu1 %v2732_v22  ;;  %v2452_v26 = vrot.slane %v2439_v18, %v2451_v17  ;;  %v2565_v17 = vld [vmem:[#allocation25 + $0x2a0] sm:$0xff] }
 0x4f3   : > { %2782 = vmatpush2.msra.mxu0 %v2667_v23  ;;  %2853 = vmatpush2.msra.mxu1 %v2731_v24 }
 0x4f4   : > { %2783 = vmatprep.subr.mxu0 %v2666_v25  ;;  %2854 = vmatprep.subr.mxu1 %v2730_v27  ;;  %v2444_v25 = vrot.slane %v2439_v18, %v2443_v16 }
 0x4f5   : > { %2784 = vmatpush2.msra.mxu0 %v2665_v28  ;;  %2855 = vmatpush2.msra.mxu1 %v2729_v29  ;;  %v2448_v29 = vrot.slane %v2439_v18, %v2447_v19 }
 0x4f6   : > { %2785 = vmatprep.subr.mxu0 %v2664_v30  ;;  %2856 = vmatprep.subr.mxu1 %v2728_v31  ;;  %v2456_v30 = vrot.slane %v2439_v18, %v2455_v20  ;;  %v2500_v18 = vld [vmem:[#allocation25 + $0x98] sm:$0xff] }
 0x4f7   : > { %2786 = vmatpush2.msra.mxu0 %v2663_v32  ;;  %2857 = vmatpush2.msra.mxu1 %v2727_v33  ;;  %v2564_v20 = vld [vmem:[#allocation25 + $0x298] sm:$0xff] }
 0x4f8   : > { %2787 = vmatprep.subr.mxu0 %v2662_v34  ;;  %2858 = vmatprep.subr.mxu1 %v2726_v35 }
 0x4f9   : > { %2788 = vmatpush2.msra.mxu0 %v2661_v36  ;;  %2859 = vmatpush2.msra.mxu1 %v2725_v37 }
 0x4fa   : > { %2789 = vmatprep.subr.mxu0 %v2660_v38  ;;  %2860 = vmatprep.subr.mxu1 %v2724_v39 }
 0x4fb   : > { %2790 = vmatpush2.msra.mxu0 %v2659_v40  ;;  %2861 = vmatpush2.msra.mxu1 %v2723_v41 }
 0x4fc   : > { %2791 = vmatprep.subr.mxu0 %v2658_v42  ;;  %2862 = vmatprep.subr.mxu1 %v2722_v43 }
 0x4fd   : > { %2792 = vmatpush2.msra.mxu0 %v2657_v44  ;;  %2863 = vmatpush2.msra.mxu1 %v2721_v45 }
 0x4fe   : > { %2793 = vmatprep.subr.mxu0 %v2656_v46  ;;  %2864 = vmatprep.subr.mxu1 %v2720_v47  ;;  %v2511_v47 = vld [vmem:[#allocation25 + $0xf0] sm:$0xff] }
 0x4ff   : > { %2794 = vmatpush2.msra.mxu0 %v2655_v48  ;;  %2865 = vmatpush2.msra.mxu1 %v2719_v49  ;;  %v2575_v48 = vld [vmem:[#allocation25 + $0x2f0] sm:$0xff]  ;;  %v2510_v49 = vld [vmem:[#allocation25 + $0xe8] sm:$0xff] }
 0x500   : > { %2795 = vmatprep.subr.mxu0 %v2654_v50  ;;  %2866 = vmatprep.subr.mxu1 %v2718_v51  ;;  %v2574_v50 = vld [vmem:[#allocation25 + $0x2e8] sm:$0xff]  ;;  %v2509_v51 = vld [vmem:[#allocation25 + $0xe0] sm:$0xff] }
 0x501   : > { %2796 = vmatpush2.msra.mxu0 %v2653_v52  ;;  %2867 = vmatpush2.msra.mxu1 %v2717_v53  ;;  %v2573_v52 = vld [vmem:[#allocation25 + $0x2e0] sm:$0xff] }
 0x502   : > { %2797 = vmatprep.subr.mxu0 %v2652_v54  ;;  %2868 = vmatprep.subr.mxu1 %v2716_v55  ;;  %v2474_v53 = vld [vmem:[#allocation5 + $0x8] sm:$0x80]  ;;  %v2508_v54 = vld [vmem:[#allocation25 + $0xd8] sm:$0xff] }
 0x503   : > { %2798 = vmatpush2.msra.mxu0 %v2651_v56  ;;  %2869 = vmatpush2.msra.mxu1 %v2715_v57  ;;  %v2572_v55 = vld [vmem:[#allocation25 + $0x2d8] sm:$0xff]  ;;  %v2476_v56 = vld [vmem:[#allocation5 + $0x18] sm:$0x80] }
 0x504   : > { %2799 = vmatprep.subr.mxu0 %v2650_v58  ;;  %2870 = vmatprep.subr.mxu1 %v2714_v59  ;;  %v2507_v57 = vld [vmem:[#allocation25 + $0xd0] sm:$0xff]  ;;  %v2506_v59 = vld [vmem:[#allocation25 + $0xc8] sm:$0xff] }
 0x505   : > { %2800 = vmatpush2.msra.mxu0 %v2649_v60  ;;  %2871 = vmatpush2.msra.mxu1 %v2713_v61  ;;  %v2571_v58 = vld [vmem:[#allocation25 + $0x2d0] sm:$0xff]  ;;  %v2570_v60 = vld [vmem:[#allocation25 + $0x2c8] sm:$0xff]  ;;  %v2505_v61 = vld [vmem:[#allocation25 + $0xc0] sm:$0xff] }
 0x506   : > { %2801 = vmatprep.subr.mxu0 %v2648_v62  ;;  %2872 = vmatprep.subr.mxu1 %v2712_v63  ;;  %v2569_v62 = vld [vmem:[#allocation25 + $0x2c0] sm:$0xff]  ;;  %v2895_v63 = vrot.slane %v2474_v53, 7  ;;  %v2483_v53 = vld [vmem:[#allocation25 + $0x10] sm:$0xff] }
 0x507   : > { %2802 = vmatpush2.msra.mxu0 %v2647_v1  ;;  %2873 = vmatpush2.msra.mxu1 %v2711_v2  ;;  %v2901_v1 = vrot.slane %v2476_v56, 7  ;;  %v2504_v2 = vld [vmem:[#allocation25 + $0xb8] sm:$0xff]  ;;  %v2546_v56 = vld [vmem:[#allocation25 + $0x208] sm:$0xff] }
 0x508   : > { %2803 = vmatprep.subr.mxu0 %v2646_v3  ;;  %2874 = vmatprep.subr.mxu1 %v2710_v4  ;;  %v2568_v3 = vld [vmem:[#allocation25 + $0x2b8] sm:$0xff]  ;;  %v2503_v4 = vld [vmem:[#allocation25 + $0xb0] sm:$0xff] }
 0x509   : > { %2804 = vmatpush2.msra.mxu0 %v2645_v5  ;;  %2875 = vmatpush2.msra.mxu1 %v2709_v6 }
 0x50a   : > { %2908 = vmatprep.subr.mxu0 %v2512_v7  ;;  %2979 = vmatprep.subr.mxu1 %v2576_v8  ;;  %v2567_v7 = vld [vmem:[#allocation25 + $0x2b0] sm:$0xff] }
 0x566   : > { %v2036_v9 = vpop.f32.mrf.mxu0  ;;  %v2107_v10 = vpop.f32.mrf.mxu1 }
 0x568   : > { %v2038_v12 = vpop.f32.mrf.mxu0  ;;  %v2109_v13 = vpop.f32.mrf.mxu1 }
 0x577   : > { %v2181_v14 = vpop.f32.mrf.mxu0  ;;  %v2252_v15 = vpop.f32.mrf.mxu1 }
 0x578   : > { %v2182_v23 = vadd.f32 %v2181_v14, %v2036_v9  ;;  %v2253_v24 = vadd.f32 %v2252_v15, %v2107_v10  ;;  %v2502_v10 = vld [vmem:[#allocation25 + $0xa8] sm:$0xff]  ;;  %v2501_v15 = vld [vmem:[#allocation25 + $0xa0] sm:$0xff] }
 0x579   : > { %v2183_v21 = vpop.f32.mrf.mxu0  ;;  %v2254_v22 = vpop.f32.mrf.mxu1 }
 0x57a   : > { %v2184_v31 = vadd.f32 %v2183_v21, %v2038_v12  ;;  %v2255_v32 = vadd.f32 %v2254_v22, %v2109_v13  ;;  %v2566_v12 = vld [vmem:[#allocation25 + $0x2a8] sm:$0xff]  ;;  %v2499_v21 = vld [vmem:[#allocation25 + $0x90] sm:$0xff] }
 0x57b   : > { %v2563_v22 = vld [vmem:[#allocation25 + $0x290] sm:$0xff] }
 0x589   : > { %v2359_v27 = vpop.f32.mrf.mxu0  ;;  %v2430_v28 = vpop.f32.mrf.mxu1 }
 0x58a   : > { %v2435_v33 = vadd.f32 %v2359_v27, %v2182_v23  ;;  %v2437_v34 = vadd.f32 %v2430_v28, %v2253_v24  ;;  %v2498_v23 = vld [vmem:[#allocation25 + $0x88] sm:$0xff]  ;;  %v2496_v27 = vld [vmem:[#allocation25 + $0x78] sm:$0xff] }
 0x58b   : > { %v2361_v35 = vpop.f32.mrf.mxu0  ;;  %v2432_v36 = vpop.f32.mrf.mxu1  ;;  %v2562_v24 = vld [vmem:[#allocation25 + $0x288] sm:$0xff]  ;;  %v2560_v28 = vld [vmem:[#allocation25 + $0x278] sm:$0xff] }
 0x58c   : > { %v2461_v37 = vadd.f32 %v2444_v25, %v2435_v33  ;;  %v2463_v38 = vadd.f32 %v2452_v26, %v2437_v34  ;;  %v2436_v39 = vadd.f32 %v2361_v35, %v2184_v31  ;;  %v2438_v40 = vadd.f32 %v2432_v36, %v2255_v32  ;;  %v2497_v25 = vld [vmem:[#allocation25 + $0x80] sm:$0xff]  ;;  %v2494_v31 = vld [vmem:[#allocation25 + $0x68] sm:$0xff]  ;;  %v2492_v35 = vld [vmem:[#allocation25 + $0x58] sm:$0xff] }
 0x58d   : > { %v2561_v26 = vld [vmem:[#allocation25 + $0x280] sm:$0xff]  ;;  %v2558_v32 = vld [vmem:[#allocation25 + $0x268] sm:$0xff]  ;;  %v2556_v36 = vld [vmem:[#allocation25 + $0x258] sm:$0xff] }
 0x58e   : > { %v2465_v41 = vmax.f32 %v2461_v37, 0.0  ;;  %v2467_v42 = vmax.f32 %v2463_v38, 0.0  ;;  %v2462_v43 = vadd.f32 %v2448_v29, %v2436_v39  ;;  %v2464_v44 = vadd.f32 %v2456_v30, %v2438_v40  ;;  %v2495_v29 = vld [vmem:[#allocation25 + $0x70] sm:$0xff]  ;;  %v2493_v33 = vld [vmem:[#allocation25 + $0x60] sm:$0xff]  ;;  %v2490_v39 = vld [vmem:[#allocation25 + $0x48] sm:$0xff] }
 0x58f   : > { %v2559_v30 = vld [vmem:[#allocation25 + $0x270] sm:$0xff]  ;;  %v2557_v34 = vld [vmem:[#allocation25 + $0x260] sm:$0xff]  ;;  %v2554_v40 = vld [vmem:[#allocation25 + $0x248] sm:$0xff] }
 0x590   : > { %2469 = vst [vmem:[#allocation5 + $0x20] sm:$0xff] %v2465_v41  ;;  %2471 = vst [vmem:[#allocation5 + $0x30] sm:$0xff] %v2467_v42  ;;  %v2466_v45 = vmax.f32 %v2462_v43, 0.0  ;;  %v2468_v46 = vmax.f32 %v2464_v44, 0.0  ;;  %v2491_v37 = vld [vmem:[#allocation25 + $0x50] sm:$0xff]  ;;  %v2488_v43 = vld [vmem:[#allocation25 + $0x38] sm:$0xff] }
 0x591   : > { %v2555_v38 = vld [vmem:[#allocation25 + $0x250] sm:$0xff]  ;;  %v2552_v44 = vld [vmem:[#allocation25 + $0x238] sm:$0xff] }
 0x592   : > { %2470 = vst [vmem:[#allocation5 + $0x28] sm:$0xff] %v2466_v45  ;;  %2472 = vst [vmem:[#allocation5 + $0x38] sm:$0xff] %v2468_v46  ;;  %2805 = vmatprep.mubr.f32.mxu0 %v2466_v45  ;;  %2876 = vmatprep.mubr.f32.mxu1 %v2468_v46  ;;  %v2487_v45 = vld [vmem:[#allocation25 + $0x30] sm:$0xff] }
 0x593   : > { %2806 = vmatmul.mubr.f32.vlgmr.msra.gmra.mxu0 %v2465_v41  ;;  %2877 = vmatmul.mubr.f32.vlgmr.msra.gmra.mxu1 %v2467_v42  ;;  %v2489_v41 = vld [vmem:[#allocation25 + $0x40] sm:$0xff]  ;;  %v2551_v46 = vld [vmem:[#allocation25 + $0x230] sm:$0xff] }
 0x594   : > { %2909 = vmatpush1.msra.mxu0 %v2511_v47  ;;  %2980 = vmatpush1.msra.mxu1 %v2575_v48  ;;  %v2553_v42 = vld [vmem:[#allocation25 + $0x240] sm:$0xff]  ;;  %v2486_v47 = vld [vmem:[#allocation25 + $0x28] sm:$0xff] }
 0x595   : > { %2910 = vmatprep.subr.mxu0 %v2510_v49  ;;  %2981 = vmatprep.subr.mxu1 %v2574_v50  ;;  %v2550_v48 = vld [vmem:[#allocation25 + $0x228] sm:$0xff]  ;;  %v2485_v49 = vld [vmem:[#allocation25 + $0x20] sm:$0xff] }
 0x596   : > { %2911 = vmatpush1.msra.mxu0 %v2509_v51  ;;  %2982 = vmatpush1.msra.mxu1 %v2573_v52  ;;  %v2549_v50 = vld [vmem:[#allocation25 + $0x220] sm:$0xff]  ;;  %v2484_v51 = vld [vmem:[#allocation25 + $0x18] sm:$0xff] }
 0x597   : > { %2912 = vmatprep.subr.mxu0 %v2508_v54  ;;  %2983 = vmatprep.subr.mxu1 %v2572_v55  ;;  %v2548_v52 = vld [vmem:[#allocation25 + $0x218] sm:$0xff]  ;;  %v2547_v54 = vld [vmem:[#allocation25 + $0x210] sm:$0xff]  ;;  %v2482_v55 = vld [vmem:[#allocation25 + $0x8] sm:$0xff] }
 0x598   : > { %2913 = vmatpush1.msra.mxu0 %v2507_v57  ;;  %2984 = vmatpush1.msra.mxu1 %v2571_v58  ;;  %v2481_v57 = vld [vmem:[#allocation25] sm:$0xff] }
 0x599   : > { %v2478_v5 = vld [vmem:[#allocation5 + $0x28] sm:$0x7f]  ;;  %v2480_v6 = vld [vmem:[#allocation5 + $0x38] sm:$0x7f]  ;;  %2914 = vmatprep.subr.mxu0 %v2506_v59  ;;  %2985 = vmatprep.subr.mxu1 %v2570_v60 }
 0x59a   : > { %v2896_v8 = vrot.slane %v2478_v5, 7  ;;  %v2902_v9 = vrot.slane %v2480_v6, 7  ;;  %2915 = vmatpush1.msra.mxu0 %v2505_v61  ;;  %2986 = vmatpush1.msra.mxu1 %v2569_v62  ;;  %v2545_v58 = vld [vmem:[#allocation25 + $0x200] sm:$0xff]  ;;  %v2544_v59 = vld [vmem:[#allocation25 + $0x1f8] sm:$0xff]  ;;  %v2543_v61 = vld [vmem:[#allocation25 + $0x1f0] sm:$0xff] }
 0x59b   : > { %2916 = vmatprep.subr.mxu0 %v2504_v2  ;;  %2987 = vmatprep.subr.mxu1 %v2568_v3  ;;  %v2608_v60 = vld [vmem:[#allocation25 + $0x3f8] sm:$0xff]  ;;  %v2607_v62 = vld [vmem:[#allocation25 + $0x3f0] sm:$0xff]  ;;  %v2541_v2 = vld [vmem:[#allocation25 + $0x1e0] sm:$0xff] }
 0x59c   : > { %v2897_v13 = vsel %vm2891_vm7, %v2895_v63, %v2896_v8  ;;  %v2903_v14 = vsel %vm2891_vm7, %v2901_v1, %v2902_v9  ;;  %2917 = vmatpush1.msra.mxu0 %v2503_v4  ;;  %2988 = vmatpush1.msra.mxu1 %v2567_v7  ;;  %v2542_v63 = vld [vmem:[#allocation25 + $0x1e8] sm:$0xff]  ;;  %v2605_v3 = vld [vmem:[#allocation25 + $0x3e0] sm:$0xff]  ;;  %v2540_v4 = vld [vmem:[#allocation25 + $0x1d8] sm:$0xff] }
 0x59d   : > { %2972 = vmatprep.mubr.f32.mxu0 %v2897_v13  ;;  %3043 = vmatprep.mubr.f32.mxu1 %v2903_v14  ;;  %v2606_v1 = vld [vmem:[#allocation25 + $0x3e8] sm:$0xff]  ;;  %v2604_v5 = vld [vmem:[#allocation25 + $0x3d8] sm:$0xff]  ;;  %v2539_v6 = vld [vmem:[#allocation25 + $0x1d0] sm:$0xff] }
 0x59e   : > { %2918 = vmatprep.subr.mxu0 %v2502_v10  ;;  %2989 = vmatprep.subr.mxu1 %v2566_v12  ;;  %v2603_v7 = vld [vmem:[#allocation25 + $0x3d0] sm:$0xff]  ;;  %v2538_v8 = vld [vmem:[#allocation25 + $0x1c8] sm:$0xff]  ;;  %v2537_v10 = vld [vmem:[#allocation25 + $0x1c0] sm:$0xff] }
 0x59f   : > { %2919 = vmatpush1.msra.mxu0 %v2501_v15  ;;  %2990 = vmatpush1.msra.mxu1 %v2565_v17  ;;  %v2602_v9 = vld [vmem:[#allocation25 + $0x3c8] sm:$0xff]  ;;  %v2601_v12 = vld [vmem:[#allocation25 + $0x3c0] sm:$0xff]  ;;  %v2536_v13 = vld [vmem:[#allocation25 + $0x1b8] sm:$0xff] }
 0x5a0   : > { %2920 = vmatprep.subr.mxu0 %v2500_v18  ;;  %2991 = vmatprep.subr.mxu1 %v2564_v20  ;;  %v2600_v14 = vld [vmem:[#allocation25 + $0x3b8] sm:$0xff]  ;;  %v2535_v15 = vld [vmem:[#allocation25 + $0x1b0] sm:$0xff]  ;;  %v2534_v18 = vld [vmem:[#allocation25 + $0x1a8] sm:$0xff] }
 0x5a1   : > { %2921 = vmatpush1.msra.mxu0 %v2499_v21  ;;  %2992 = vmatpush1.msra.mxu1 %v2563_v22  ;;  %v2599_v17 = vld [vmem:[#allocation25 + $0x3b0] sm:$0xff]  ;;  %v2598_v20 = vld [vmem:[#allocation25 + $0x3a8] sm:$0xff]  ;;  %v2533_v21 = vld [vmem:[#allocation25 + $0x1a0] sm:$0xff] }
 0x5a2   : > { %2922 = vmatprep.subr.mxu0 %v2498_v23  ;;  %2993 = vmatprep.subr.mxu1 %v2562_v24  ;;  %v2597_v22 = vld [vmem:[#allocation25 + $0x3a0] sm:$0xff]  ;;  %v2532_v23 = vld [vmem:[#allocation25 + $0x198] sm:$0xff] }
 0x5a3   : > { %2923 = vmatpush1.msra.mxu0 %v2497_v25  ;;  %2994 = vmatpush1.msra.mxu1 %v2561_v26  ;;  %v2596_v24 = vld [vmem:[#allocation25 + $0x398] sm:$0xff]  ;;  %v2531_v25 = vld [vmem:[#allocation25 + $0x190] sm:$0xff] }
 0x5a4   : > { %2924 = vmatprep.subr.mxu0 %v2496_v27  ;;  %2995 = vmatprep.subr.mxu1 %v2560_v28  ;;  %v2595_v26 = vld [vmem:[#allocation25 + $0x390] sm:$0xff]  ;;  %v2530_v27 = vld [vmem:[#allocation25 + $0x188] sm:$0xff] }
 0x5a5   : > { %2925 = vmatpush1.msra.mxu0 %v2495_v29  ;;  %2996 = vmatpush1.msra.mxu1 %v2559_v30  ;;  %v2594_v28 = vld [vmem:[#allocation25 + $0x388] sm:$0xff]  ;;  %v2529_v29 = vld [vmem:[#allocation25 + $0x180] sm:$0xff] }
 0x5a6   : > { %2926 = vmatprep.subr.mxu0 %v2494_v31  ;;  %2997 = vmatprep.subr.mxu1 %v2558_v32  ;;  %v2593_v30 = vld [vmem:[#allocation25 + $0x380] sm:$0xff]  ;;  %v2528_v31 = vld [vmem:[#allocation25 + $0x178] sm:$0xff] }
 0x5a7   : > { %2927 = vmatpush1.msra.mxu0 %v2493_v33  ;;  %2998 = vmatpush1.msra.mxu1 %v2557_v34  ;;  %v2592_v32 = vld [vmem:[#allocation25 + $0x378] sm:$0xff]  ;;  %v2527_v33 = vld [vmem:[#allocation25 + $0x170] sm:$0xff] }
 0x5a8   : > { %2928 = vmatprep.subr.mxu0 %v2492_v35  ;;  %2999 = vmatprep.subr.mxu1 %v2556_v36  ;;  %v2591_v34 = vld [vmem:[#allocation25 + $0x370] sm:$0xff]  ;;  %v2526_v35 = vld [vmem:[#allocation25 + $0x168] sm:$0xff] }
 0x5a9   : > { %2929 = vmatpush1.msra.mxu0 %v2491_v37  ;;  %3000 = vmatpush1.msra.mxu1 %v2555_v38  ;;  %v2590_v36 = vld [vmem:[#allocation25 + $0x368] sm:$0xff]  ;;  %v2525_v37 = vld [vmem:[#allocation25 + $0x160] sm:$0xff] }
 0x5aa   : > { %2930 = vmatprep.subr.mxu0 %v2490_v39  ;;  %3001 = vmatprep.subr.mxu1 %v2554_v40  ;;  %v2589_v38 = vld [vmem:[#allocation25 + $0x360] sm:$0xff]  ;;  %v2524_v39 = vld [vmem:[#allocation25 + $0x158] sm:$0xff] }
 0x5ab   : > { %2931 = vmatpush1.msra.mxu0 %v2489_v41  ;;  %3002 = vmatpush1.msra.mxu1 %v2553_v42  ;;  %v2588_v40 = vld [vmem:[#allocation25 + $0x358] sm:$0xff]  ;;  %v2523_v41 = vld [vmem:[#allocation25 + $0x150] sm:$0xff] }
 0x5ac   : > { %2932 = vmatprep.subr.mxu0 %v2488_v43  ;;  %3003 = vmatprep.subr.mxu1 %v2552_v44  ;;  %v2587_v42 = vld [vmem:[#allocation25 + $0x350] sm:$0xff]  ;;  %v2522_v43 = vld [vmem:[#allocation25 + $0x148] sm:$0xff] }
 0x5ad   : > { %2933 = vmatpush1.msra.mxu0 %v2487_v45  ;;  %3004 = vmatpush1.msra.mxu1 %v2551_v46  ;;  %v2586_v44 = vld [vmem:[#allocation25 + $0x348] sm:$0xff]  ;;  %v2521_v45 = vld [vmem:[#allocation25 + $0x140] sm:$0xff] }
 0x5ae   : > { %2934 = vmatprep.subr.mxu0 %v2486_v47  ;;  %3005 = vmatprep.subr.mxu1 %v2550_v48  ;;  %v2585_v46 = vld [vmem:[#allocation25 + $0x340] sm:$0xff]  ;;  %v2520_v47 = vld [vmem:[#allocation25 + $0x138] sm:$0xff] }
 0x5af   : > { %2935 = vmatpush1.msra.mxu0 %v2485_v49  ;;  %3006 = vmatpush1.msra.mxu1 %v2549_v50  ;;  %v2584_v48 = vld [vmem:[#allocation25 + $0x338] sm:$0xff]  ;;  %v2519_v50 = vld [vmem:[#allocation25 + $0x130] sm:$0xff] }
 0x5b0   : > { %2936 = vmatprep.subr.mxu0 %v2484_v51  ;;  %3007 = vmatprep.subr.mxu1 %v2548_v52  ;;  %v2473_v49 = vld [vmem:[#allocation5] sm:$0x80]  ;;  %v2583_v51 = vld [vmem:[#allocation25 + $0x330] sm:$0xff]  ;;  %v2475_v52 = vld [vmem:[#allocation5 + $0x10] sm:$0x80] }
 0x5b1   : > { %2937 = vmatpush1.msra.mxu0 %v2483_v53  ;;  %3008 = vmatpush1.msra.mxu1 %v2547_v54  ;;  %v2518_v53 = vld [vmem:[#allocation25 + $0x128] sm:$0xff] }
 0x5b2   : > { %2938 = vmatprep.subr.mxu0 %v2482_v55  ;;  %3009 = vmatprep.subr.mxu1 %v2546_v56  ;;  %v2582_v54 = vld [vmem:[#allocation25 + $0x328] sm:$0xff]  ;;  %v2517_v55 = vld [vmem:[#allocation25 + $0x120] sm:$0xff] }
 0x5b3   : > { %2939 = vmatpush1.msra.mxu0 %v2481_v57  ;;  %3010 = vmatpush1.msra.mxu1 %v2545_v58  ;;  %v2581_v56 = vld [vmem:[#allocation25 + $0x320] sm:$0xff]  ;;  %v2477_v57 = vld [vmem:[#allocation5 + $0x20] sm:$0x7f] }
 0x5b4   : > { %2940 = vmatprep.subr.mxu0 %v2544_v59  ;;  %3011 = vmatprep.subr.mxu1 %v2608_v60  ;;  %v2479_v58 = vld [vmem:[#allocation5 + $0x30] sm:$0x7f]  ;;  %v3055_v59 = vld [vmem:[#allocation5 + $0x48] sm:$0x1] }
 0x5b5   : > { %2941 = vmatpush2.msra.mxu0 %v2543_v61  ;;  %3012 = vmatpush2.msra.mxu1 %v2607_v62  ;;  %v2516_v60 = vld [vmem:[#allocation25 + $0x118] sm:$0xff]  ;;  %v3057_v62 = vld [vmem:[#allocation5 + $0x58] sm:$0x1] }
 0x5b6   : > { %2942 = vmatprep.subr.mxu0 %v2542_v63  ;;  %3013 = vmatprep.subr.mxu1 %v2606_v1  ;;  %v2580_v61 = vld [vmem:[#allocation25 + $0x318] sm:$0xff]  ;;  %v2515_v63 = vld [vmem:[#allocation25 + $0x110] sm:$0xff] }
 0x5b7   : > { %2943 = vmatpush2.msra.mxu0 %v2541_v2  ;;  %3014 = vmatpush2.msra.mxu1 %v2605_v3  ;;  %v2579_v1 = vld [vmem:[#allocation25 + $0x310] sm:$0xff]  ;;  %v2892_v2 = vrot.slane %v2473_v49, 7  ;;  %v2898_v3 = vrot.slane %v2475_v52, 7  ;;  %v3139_v52 = vld [vmem:[#allocation28 + $0x288] sm:$0xff] }
 0x5b8   : > { %2944 = vmatprep.subr.mxu0 %v2540_v4  ;;  %3015 = vmatprep.subr.mxu1 %v2604_v5  ;;  %v3051_v4 = vld [vmem:[#allocation5 + $0x28] sm:$0xfe]  ;;  %v2514_v5 = vld [vmem:[#allocation25 + $0x108] sm:$0xff]  ;;  %v3076_v49 = vld [vmem:[#allocation28 + $0x90] sm:$0xff] }
 0x5b9   : > { %2945 = vmatpush2.msra.mxu0 %v2539_v6  ;;  %3016 = vmatpush2.msra.mxu1 %v2603_v7  ;;  %v2578_v6 = vld [vmem:[#allocation25 + $0x308] sm:$0xff]  ;;  %v2893_v7 = vrot.slane %v2477_v57, 7  ;;  %v3072_v57 = vld [vmem:[#allocation28 + $0x70] sm:$0xff] }
 0x5ba   : > { %2946 = vmatprep.subr.mxu0 %v2538_v8  ;;  %3017 = vmatprep.subr.mxu1 %v2602_v9  ;;  %v2899_v8 = vrot.slane %v2479_v58, 7  ;;  %v3053_v9 = vld [vmem:[#allocation5 + $0x38] sm:$0xfe] }
 0x5bb   : > { %2947 = vmatpush2.msra.mxu0 %v2537_v10  ;;  %3018 = vmatpush2.msra.mxu1 %v2601_v12  ;;  %v2513_v10 = vld [vmem:[#allocation25 + $0x100] sm:$0xff]  ;;  %v3136_v58 = vld [vmem:[#allocation28 + $0x270] sm:$0xff] }
 0x5bc   : > { %2948 = vmatprep.subr.mxu0 %v2536_v13  ;;  %3019 = vmatprep.subr.mxu1 %v2600_v14  ;;  %v2577_v12 = vld [vmem:[#allocation25 + $0x300] sm:$0xff]  ;;  %v3198_v13 = vrot.slane %v3051_v4, 1  ;;  %v3199_v14 = vrot.slane %v3055_v59, 1  ;;  %v3071_v59 = vld [vmem:[#allocation28 + $0x68] sm:$0xff] }
 0x5bd   : > { %2949 = vmatpush2.msra.mxu0 %v2535_v15  ;;  %3020 = vmatpush2.msra.mxu1 %v2599_v17  ;;  %v3089_v15 = vld [vmem:[#allocation28 + $0xf8] sm:$0xff]  ;;  %v3067_v4 = vld [vmem:[#allocation28 + $0x48] sm:$0xff] }
 0x5be   : > { %2950 = vmatprep.subr.mxu0 %v2534_v18  ;;  %3021 = vmatprep.subr.mxu1 %v2598_v20  ;;  %v3153_v17 = vld [vmem:[#allocation28 + $0x2f8] sm:$0xff]  ;;  %v3204_v18 = vrot.slane %v3053_v9, 1  ;;  %v3205_v20 = vrot.slane %v3057_v62, 1  ;;  %v3134_v62 = vld [vmem:[#allocation28 + $0x260] sm:$0xff] }
 0x5bf   : > { %2951 = vmatpush2.msra.mxu0 %v2533_v21  ;;  %3022 = vmatpush2.msra.mxu1 %v2597_v22  ;;  %v2894_v21 = vsel %vm2891_vm7, %v2892_v2, %v2893_v7  ;;  %v2900_v22 = vsel %vm2891_vm7, %v2898_v3, %v2899_v8  ;;  %v3068_v2 = vld [vmem:[#allocation28 + $0x50] sm:$0xff]  ;;  %v3130_v7 = vld [vmem:[#allocation28 + $0x240] sm:$0xff]  ;;  %v3065_v8 = vld [vmem:[#allocation28 + $0x38] sm:$0xff] }
 0x5c0   : > { %2952 = vmatprep.subr.mxu0 %v2532_v23  ;;  %3023 = vmatprep.subr.mxu1 %v2596_v24  ;;  %v3088_v23 = vld [vmem:[#allocation28 + $0xf0] sm:$0xff]  ;;  %v3129_v9 = vld [vmem:[#allocation28 + $0x238] sm:$0xff] }
 0x5c1   : > { %2953 = vmatpush2.msra.mxu0 %v2531_v25  ;;  %3024 = vmatpush2.msra.mxu1 %v2595_v26  ;;  %v3152_v24 = vld [vmem:[#allocation28 + $0x2f0] sm:$0xff]  ;;  %v3200_v25 = vsel %vm3194_vm8, %v3198_v13, %v3199_v14  ;;  %v3087_v26 = vld [vmem:[#allocation28 + $0xe8] sm:$0xff] }
 0x5c2   : > { %2954 = vmatprep.subr.mxu0 %v2530_v27  ;;  %3025 = vmatprep.subr.mxu1 %v2594_v28  ;;  %v3151_v27 = vld [vmem:[#allocation28 + $0x2e8] sm:$0xff]  ;;  %v3206_v28 = vsel %vm3194_vm8, %v3204_v18, %v3205_v20  ;;  %v3132_v3 = vld [vmem:[#allocation28 + $0x250] sm:$0xff]  ;;  %v3061_v18 = vld [vmem:[#allocation28 + $0x18] sm:$0xff] }
 0x5c3   : > { %2955 = vmatpush2.msra.mxu0 %v2529_v29  ;;  %3026 = vmatpush2.msra.mxu1 %v2593_v30  ;;  %v3086_v29 = vld [vmem:[#allocation28 + $0xe0] sm:$0xff]  ;;  %v3063_v13 = vld [vmem:[#allocation28 + $0x28] sm:$0xff]  ;;  %v3125_v20 = vld [vmem:[#allocation28 + $0x218] sm:$0xff] }
 0x5c4   : > { %2956 = vmatprep.subr.mxu0 %v2528_v31  ;;  %3027 = vmatprep.subr.mxu1 %v2592_v32  ;;  %v3150_v30 = vld [vmem:[#allocation28 + $0x2e0] sm:$0xff]  ;;  %v3085_v31 = vld [vmem:[#allocation28 + $0xd8] sm:$0xff]  ;;  %v3127_v14 = vld [vmem:[#allocation28 + $0x228] sm:$0xff] }
 0x5c5   : > { %2957 = vmatpush2.msra.mxu0 %v2527_v33  ;;  %3028 = vmatpush2.msra.mxu1 %v2591_v34  ;;  %v3149_v32 = vld [vmem:[#allocation28 + $0x2d8] sm:$0xff]  ;;  %v3084_v33 = vld [vmem:[#allocation28 + $0xd0] sm:$0xff] }
 0x5c6   : > { %2958 = vmatprep.subr.mxu0 %v2526_v35  ;;  %3029 = vmatprep.subr.mxu1 %v2590_v36  ;;  %v3148_v34 = vld [vmem:[#allocation28 + $0x2d0] sm:$0xff]  ;;  %v3083_v35 = vld [vmem:[#allocation28 + $0xc8] sm:$0xff] }
 0x5c7   : > { %2959 = vmatpush2.msra.mxu0 %v2525_v37  ;;  %3030 = vmatpush2.msra.mxu1 %v2589_v38  ;;  %v3147_v36 = vld [vmem:[#allocation28 + $0x2c8] sm:$0xff]  ;;  %v3082_v37 = vld [vmem:[#allocation28 + $0xc0] sm:$0xff] }
 0x5c8   : > { %2960 = vmatprep.subr.mxu0 %v2524_v39  ;;  %3031 = vmatprep.subr.mxu1 %v2588_v40  ;;  %v3146_v38 = vld [vmem:[#allocation28 + $0x2c0] sm:$0xff]  ;;  %v3081_v39 = vld [vmem:[#allocation28 + $0xb8] sm:$0xff] }
 0x5c9   : > { %2961 = vmatpush2.msra.mxu0 %v2523_v41  ;;  %3032 = vmatpush2.msra.mxu1 %v2587_v42  ;;  %v3145_v40 = vld [vmem:[#allocation28 + $0x2b8] sm:$0xff]  ;;  %v3080_v41 = vld [vmem:[#allocation28 + $0xb0] sm:$0xff] }
 0x5ca   : > { %2962 = vmatprep.subr.mxu0 %v2522_v43  ;;  %3033 = vmatprep.subr.mxu1 %v2586_v44  ;;  %v3144_v42 = vld [vmem:[#allocation28 + $0x2b0] sm:$0xff]  ;;  %v3079_v43 = vld [vmem:[#allocation28 + $0xa8] sm:$0xff] }
 0x5cb   : > { %2963 = vmatpush2.msra.mxu0 %v2521_v45  ;;  %3034 = vmatpush2.msra.mxu1 %v2585_v46  ;;  %v3143_v44 = vld [vmem:[#allocation28 + $0x2a8] sm:$0xff]  ;;  %v3078_v45 = vld [vmem:[#allocation28 + $0xa0] sm:$0xff] }
 0x5cc   : > { %2964 = vmatprep.subr.mxu0 %v2520_v47  ;;  %3035 = vmatprep.subr.mxu1 %v2584_v48  ;;  %v3142_v46 = vld [vmem:[#allocation28 + $0x2a0] sm:$0xff]  ;;  %v3077_v47 = vld [vmem:[#allocation28 + $0x98] sm:$0xff] }
 0x5cd   : > { %2965 = vmatpush2.msra.mxu0 %v2519_v50  ;;  %3036 = vmatpush2.msra.mxu1 %v2583_v51  ;;  %v3141_v48 = vld [vmem:[#allocation28 + $0x298] sm:$0xff]  ;;  %v3140_v50 = vld [vmem:[#allocation28 + $0x290] sm:$0xff]  ;;  %v3075_v51 = vld [vmem:[#allocation28 + $0x88] sm:$0xff] }
 0x5ce   : > { %2966 = vmatprep.subr.mxu0 %v2518_v53  ;;  %3037 = vmatprep.subr.mxu1 %v2582_v54  ;;  %v3074_v53 = vld [vmem:[#allocation28 + $0x80] sm:$0xff] }
 0x5cf   : > { %2967 = vmatpush2.msra.mxu0 %v2517_v55  ;;  %3038 = vmatpush2.msra.mxu1 %v2581_v56  ;;  %v3138_v54 = vld [vmem:[#allocation28 + $0x280] sm:$0xff]  ;;  %v3073_v55 = vld [vmem:[#allocation28 + $0x78] sm:$0xff] }
 0x5d0   : > { %2968 = vmatprep.subr.mxu0 %v2516_v60  ;;  %3039 = vmatprep.subr.mxu1 %v2580_v61  ;;  %v3137_v56 = vld [vmem:[#allocation28 + $0x278] sm:$0xff]  ;;  %v3135_v60 = vld [vmem:[#allocation28 + $0x268] sm:$0xff]  ;;  %v3070_v61 = vld [vmem:[#allocation28 + $0x60] sm:$0xff] }
 0x5d1   : > { %2969 = vmatpush2.msra.mxu0 %v2515_v63  ;;  %3040 = vmatpush2.msra.mxu1 %v2579_v1  ;;  %v3069_v63 = vld [vmem:[#allocation28 + $0x58] sm:$0xff] }
 0x5d2   : > { %2970 = vmatprep.subr.mxu0 %v2514_v5  ;;  %3041 = vmatprep.subr.mxu1 %v2578_v6  ;;  %v3133_v1 = vld [vmem:[#allocation28 + $0x258] sm:$0xff]  ;;  %v3131_v5 = vld [vmem:[#allocation28 + $0x248] sm:$0xff]  ;;  %v3066_v6 = vld [vmem:[#allocation28 + $0x40] sm:$0xff] }
 0x5d3   : > { %2971 = vmatpush2.msra.mxu0 %v2513_v10  ;;  %3042 = vmatpush2.msra.mxu1 %v2577_v12  ;;  %v3064_v10 = vld [vmem:[#allocation28 + $0x30] sm:$0xff] }
 0x5d4   : > { %2973 = vmatmul.mubr.f32.vlgmr.msra.gmra.mxu0 %v2894_v21  ;;  %3044 = vmatmul.mubr.f32.vlgmr.msra.gmra.mxu1 %v2900_v22  ;;  %v3128_v12 = vld [vmem:[#allocation28 + $0x230] sm:$0xff] }
 0x5d5   : > { %3211 = vmatprep.subr.mxu0 %v3089_v15  ;;  %3282 = vmatprep.subr.mxu1 %v3153_v17  ;;  %v3062_v15 = vld [vmem:[#allocation28 + $0x20] sm:$0xff]  ;;  %v3060_v21 = vld [vmem:[#allocation28 + $0x10] sm:$0xff] }
 0x5d6   : > { %3212 = vmatpush1.msra.mxu0 %v3088_v23  ;;  %3275 = vmatprep.mubr.f32.mxu0 %v3200_v25  ;;  %v3126_v17 = vld [vmem:[#allocation28 + $0x220] sm:$0xff]  ;;  %v3124_v22 = vld [vmem:[#allocation28 + $0x210] sm:$0xff]  ;;  %v3059_v23 = vld [vmem:[#allocation28 + $0x8] sm:$0xff] }
 0x5d7   : > { %3283 = vmatpush1.msra.mxu1 %v3152_v24  ;;  %3346 = vmatprep.mubr.f32.mxu1 %v3206_v28  ;;  %v3123_v24 = vld [vmem:[#allocation28 + $0x208] sm:$0xff]  ;;  %v3058_v25 = vld [vmem:[#allocation28] sm:$0xff]  ;;  %v3185_v28 = vld [vmem:[#allocation28 + $0x3f8] sm:$0xff] }
 0x5d8   : > { %3213 = vmatprep.subr.mxu0 %v3087_v26  ;;  %3284 = vmatprep.subr.mxu1 %v3151_v27  ;;  %v3122_v26 = vld [vmem:[#allocation28 + $0x200] sm:$0xff]  ;;  %v3121_v27 = vld [vmem:[#allocation28 + $0x1f8] sm:$0xff] }
 0x5d9   : > { %3214 = vmatpush1.msra.mxu0 %v3086_v29  ;;  %3285 = vmatpush1.msra.mxu1 %v3150_v30  ;;  %v3120_v29 = vld [vmem:[#allocation28 + $0x1f0] sm:$0xff] }
 0x5da   : > { %3215 = vmatprep.subr.mxu0 %v3085_v31  ;;  %3286 = vmatprep.subr.mxu1 %v3149_v32  ;;  %v3184_v30 = vld [vmem:[#allocation28 + $0x3f0] sm:$0xff]  ;;  %v3119_v31 = vld [vmem:[#allocation28 + $0x1e8] sm:$0xff] }
 0x5db   : > { %3216 = vmatpush1.msra.mxu0 %v3084_v33  ;;  %3287 = vmatpush1.msra.mxu1 %v3148_v34  ;;  %v3183_v32 = vld [vmem:[#allocation28 + $0x3e8] sm:$0xff]  ;;  %v3118_v33 = vld [vmem:[#allocation28 + $0x1e0] sm:$0xff] }
 0x5dc   : > { %3217 = vmatprep.subr.mxu0 %v3083_v35  ;;  %3288 = vmatprep.subr.mxu1 %v3147_v36  ;;  %v3182_v34 = vld [vmem:[#allocation28 + $0x3e0] sm:$0xff]  ;;  %v3117_v35 = vld [vmem:[#allocation28 + $0x1d8] sm:$0xff] }
 0x5dd   : > { %3218 = vmatpush1.msra.mxu0 %v3082_v37  ;;  %3289 = vmatpush1.msra.mxu1 %v3146_v38  ;;  %v3181_v36 = vld [vmem:[#allocation28 + $0x3d8] sm:$0xff]  ;;  %v3116_v37 = vld [vmem:[#allocation28 + $0x1d0] sm:$0xff] }
 0x5de   : > { %3219 = vmatprep.subr.mxu0 %v3081_v39  ;;  %3290 = vmatprep.subr.mxu1 %v3145_v40  ;;  %v3180_v38 = vld [vmem:[#allocation28 + $0x3d0] sm:$0xff]  ;;  %v3115_v39 = vld [vmem:[#allocation28 + $0x1c8] sm:$0xff] }
 0x5df   : > { %3220 = vmatpush1.msra.mxu0 %v3080_v41  ;;  %3291 = vmatpush1.msra.mxu1 %v3144_v42  ;;  %v3179_v40 = vld [vmem:[#allocation28 + $0x3c8] sm:$0xff]  ;;  %v3114_v41 = vld [vmem:[#allocation28 + $0x1c0] sm:$0xff] }
 0x5e0   : > { %3221 = vmatprep.subr.mxu0 %v3079_v43  ;;  %3292 = vmatprep.subr.mxu1 %v3143_v44  ;;  %v3178_v42 = vld [vmem:[#allocation28 + $0x3c0] sm:$0xff]  ;;  %v3113_v43 = vld [vmem:[#allocation28 + $0x1b8] sm:$0xff] }
 0x5e1   : > { %3222 = vmatpush1.msra.mxu0 %v3078_v45  ;;  %3293 = vmatpush1.msra.mxu1 %v3142_v46  ;;  %v3177_v44 = vld [vmem:[#allocation28 + $0x3b8] sm:$0xff]  ;;  %v3112_v45 = vld [vmem:[#allocation28 + $0x1b0] sm:$0xff] }
 0x5e2   : > { %3223 = vmatprep.subr.mxu0 %v3077_v47  ;;  %3294 = vmatprep.subr.mxu1 %v3141_v48  ;;  %v3176_v46 = vld [vmem:[#allocation28 + $0x3b0] sm:$0xff]  ;;  %v3111_v47 = vld [vmem:[#allocation28 + $0x1a8] sm:$0xff] }
 0x5e3   : > { %3224 = vmatpush1.msra.mxu0 %v3076_v49  ;;  %3295 = vmatpush1.msra.mxu1 %v3140_v50  ;;  %v3175_v48 = vld [vmem:[#allocation28 + $0x3a8] sm:$0xff]  ;;  %v3110_v49 = vld [vmem:[#allocation28 + $0x1a0] sm:$0xff] }
 0x5e4   : > { %3225 = vmatprep.subr.mxu0 %v3075_v51  ;;  %3296 = vmatprep.subr.mxu1 %v3139_v52  ;;  %v3174_v50 = vld [vmem:[#allocation28 + $0x3a0] sm:$0xff]  ;;  %v3109_v51 = vld [vmem:[#allocation28 + $0x198] sm:$0xff] }
 0x5e5   : > { %3226 = vmatpush1.msra.mxu0 %v3074_v53  ;;  %3297 = vmatpush1.msra.mxu1 %v3138_v54  ;;  %v3173_v52 = vld [vmem:[#allocation28 + $0x398] sm:$0xff]  ;;  %v3108_v53 = vld [vmem:[#allocation28 + $0x190] sm:$0xff] }
 0x5e6   : > { %3227 = vmatprep.subr.mxu0 %v3073_v55  ;;  %3298 = vmatprep.subr.mxu1 %v3137_v56  ;;  %v3172_v54 = vld [vmem:[#allocation28 + $0x390] sm:$0xff]  ;;  %v3107_v55 = vld [vmem:[#allocation28 + $0x188] sm:$0xff] }
 0x5e7   : > { %3228 = vmatpush1.msra.mxu0 %v3072_v57  ;;  %3299 = vmatpush1.msra.mxu1 %v3136_v58  ;;  %v3171_v56 = vld [vmem:[#allocation28 + $0x388] sm:$0xff]  ;;  %v3106_v57 = vld [vmem:[#allocation28 + $0x180] sm:$0xff] }
 0x5e8   : > { %3229 = vmatprep.subr.mxu0 %v3071_v59  ;;  %3300 = vmatprep.subr.mxu1 %v3135_v60  ;;  %v3170_v58 = vld [vmem:[#allocation28 + $0x380] sm:$0xff]  ;;  %v3105_v59 = vld [vmem:[#allocation28 + $0x178] sm:$0xff] }
 0x5e9   : > { %3230 = vmatpush1.msra.mxu0 %v3070_v61  ;;  %3301 = vmatpush1.msra.mxu1 %v3134_v62  ;;  %v3169_v60 = vld [vmem:[#allocation28 + $0x378] sm:$0xff]  ;;  %v3104_v61 = vld [vmem:[#allocation28 + $0x170] sm:$0xff] }
 0x5ea   : > { %3231 = vmatprep.subr.mxu0 %v3069_v63  ;;  %3302 = vmatprep.subr.mxu1 %v3133_v1  ;;  %v3168_v62 = vld [vmem:[#allocation28 + $0x370] sm:$0xff]  ;;  %v3103_v63 = vld [vmem:[#allocation28 + $0x168] sm:$0xff] }
 0x5eb   : > { %3232 = vmatpush1.msra.mxu0 %v3068_v2  ;;  %3303 = vmatpush1.msra.mxu1 %v3132_v3  ;;  %v3167_v1 = vld [vmem:[#allocation28 + $0x368] sm:$0xff]  ;;  %v3102_v2 = vld [vmem:[#allocation28 + $0x160] sm:$0xff] }
 0x5ec   : > { %3233 = vmatprep.subr.mxu0 %v3067_v4  ;;  %3304 = vmatprep.subr.mxu1 %v3131_v5  ;;  %v3166_v3 = vld [vmem:[#allocation28 + $0x360] sm:$0xff]  ;;  %v3101_v4 = vld [vmem:[#allocation28 + $0x158] sm:$0xff] }
 0x5ed   : > { %3234 = vmatpush1.msra.mxu0 %v3066_v6  ;;  %3305 = vmatpush1.msra.mxu1 %v3130_v7  ;;  %v3165_v5 = vld [vmem:[#allocation28 + $0x358] sm:$0xff]  ;;  %v3100_v6 = vld [vmem:[#allocation28 + $0x150] sm:$0xff] }
 0x5ee   : > { %3235 = vmatprep.subr.mxu0 %v3065_v8  ;;  %3306 = vmatprep.subr.mxu1 %v3129_v9  ;;  %v3164_v7 = vld [vmem:[#allocation28 + $0x350] sm:$0xff]  ;;  %v3099_v8 = vld [vmem:[#allocation28 + $0x148] sm:$0xff] }
 0x5ef   : > { %3236 = vmatpush1.msra.mxu0 %v3064_v10  ;;  %3307 = vmatpush1.msra.mxu1 %v3128_v12  ;;  %v3163_v9 = vld [vmem:[#allocation28 + $0x348] sm:$0xff]  ;;  %v3098_v10 = vld [vmem:[#allocation28 + $0x140] sm:$0xff] }
 0x5f0   : > { %3237 = vmatprep.subr.mxu0 %v3063_v13  ;;  %3308 = vmatprep.subr.mxu1 %v3127_v14  ;;  %v3162_v12 = vld [vmem:[#allocation28 + $0x340] sm:$0xff]  ;;  %v3097_v13 = vld [vmem:[#allocation28 + $0x138] sm:$0xff] }
 0x5f1   : > { %3238 = vmatpush1.msra.mxu0 %v3062_v15  ;;  %3309 = vmatpush1.msra.mxu1 %v3126_v17  ;;  %v3161_v14 = vld [vmem:[#allocation28 + $0x338] sm:$0xff]  ;;  %v3096_v15 = vld [vmem:[#allocation28 + $0x130] sm:$0xff] }
 0x5f2   : > { %3239 = vmatprep.subr.mxu0 %v3061_v18  ;;  %3310 = vmatprep.subr.mxu1 %v3125_v20  ;;  %v3160_v17 = vld [vmem:[#allocation28 + $0x330] sm:$0xff]  ;;  %v3056_v20 = vld [vmem:[#allocation5 + $0x50] sm:$0x1] }
 0x5f3   : > { %3240 = vmatpush1.msra.mxu0 %v3060_v21  ;;  %3311 = vmatpush1.msra.mxu1 %v3124_v22  ;;  %v3054_v18 = vld [vmem:[#allocation5 + $0x40] sm:$0x1]  ;;  %v3095_v21 = vld [vmem:[#allocation28 + $0x128] sm:$0xff] }
 0x5f4   : > { %3241 = vmatprep.subr.mxu0 %v3059_v23  ;;  %3312 = vmatprep.subr.mxu1 %v3123_v24  ;;  %v3159_v22 = vld [vmem:[#allocation28 + $0x328] sm:$0xff]  ;;  %v3094_v23 = vld [vmem:[#allocation28 + $0x120] sm:$0xff] }
 0x5f5   : > { %3242 = vmatpush1.msra.mxu0 %v3058_v25  ;;  %3313 = vmatpush1.msra.mxu1 %v3122_v26  ;;  %v3158_v24 = vld [vmem:[#allocation28 + $0x320] sm:$0xff]  ;;  %v3050_v25 = vld [vmem:[#allocation5 + $0x20] sm:$0xfe] }
 0x5f6   : > { %3243 = vmatprep.subr.mxu0 %v3121_v27  ;;  %3314 = vmatprep.subr.mxu1 %v3185_v28  ;;  %v3052_v26 = vld [vmem:[#allocation5 + $0x30] sm:$0xfe]  ;;  %v3093_v27 = vld [vmem:[#allocation28 + $0x118] sm:$0xff] }
 0x5f7   : > { %3244 = vmatpush2.msra.mxu0 %v3120_v29  ;;  %3315 = vmatpush2.msra.mxu1 %v3184_v30  ;;  %v3157_v28 = vld [vmem:[#allocation28 + $0x318] sm:$0xff]  ;;  %v3092_v29 = vld [vmem:[#allocation28 + $0x110] sm:$0xff] }
 0x5f8   : > { %3245 = vmatprep.subr.mxu0 %v3119_v31  ;;  %3316 = vmatprep.subr.mxu1 %v3183_v32  ;;  %v3156_v30 = vld [vmem:[#allocation28 + $0x310] sm:$0xff]  ;;  %v3091_v31 = vld [vmem:[#allocation28 + $0x108] sm:$0xff] }
 0x5f9   : > { %3246 = vmatpush2.msra.mxu0 %v3118_v33  ;;  %3317 = vmatpush2.msra.mxu1 %v3182_v34  ;;  %v3155_v32 = vld [vmem:[#allocation28 + $0x308] sm:$0xff]  ;;  %v3195_v33 = vrot.slane %v3050_v25, 1  ;;  %v3196_v34 = vrot.slane %v3054_v18, 1  ;;  %v3400_v25 = vld [vmem:[#allocation30 + $0xb8] sm:$0xff] }
 0x5fa   : > { %3247 = vmatprep.subr.mxu0 %v3117_v35  ;;  %3318 = vmatprep.subr.mxu1 %v3181_v36  ;;  %v3201_v35 = vrot.slane %v3052_v26, 1  ;;  %v3202_v36 = vrot.slane %v3056_v20, 1  ;;  %v3386_v18 = vld [vmem:[#allocation30 + $0x48] sm:$0xff]  ;;  %v3414_v20 = vld [vmem:[#allocation31 + $0x18] sm:$0xff] }
 0x5fb   : > { %3248 = vmatpush2.msra.mxu0 %v3116_v37  ;;  %3319 = vmatpush2.msra.mxu1 %v3180_v38  ;;  %v3090_v37 = vld [vmem:[#allocation28 + $0x100] sm:$0xff]  ;;  %v3428_v26 = vld [vmem:[#allocation31 + $0x88] sm:$0xff] }
 0x5fc   : > { %3249 = vmatprep.subr.mxu0 %v3115_v39  ;;  %3320 = vmatprep.subr.mxu1 %v3179_v40  ;;  %v3154_v38 = vld [vmem:[#allocation28 + $0x300] sm:$0xff]  ;;  %v3197_v39 = vsel %vm3194_vm8, %v3195_v33, %v3196_v34  ;;  %v3203_v40 = vsel %vm3194_vm8, %v3201_v35, %v3202_v36  ;;  %v3398_v33 = vld [vmem:[#allocation30 + $0xa8] sm:$0xff]  ;;  %v3630_v34 = vld [vmem:[#allocation33 + $0xf8] sm:$0xff] }
 0x5fd   : > { %3250 = vmatpush2.msra.mxu0 %v3114_v41  ;;  %3321 = vmatpush2.msra.mxu1 %v3178_v42  ;;  %v3442_v41 = vld [vmem:[#allocation31 + $0xf8] sm:$0xff]  ;;  %v3382_v35 = vld [vmem:[#allocation30 + $0x28] sm:$0xff]  ;;  %v3397_v36 = vld [vmem:[#allocation30 + $0xa0] sm:$0xff] }
 0x5fe   : > { %3251 = vmatprep.subr.mxu0 %v3113_v43  ;;  %3322 = vmatprep.subr.mxu1 %v3177_v44  ;;  %v3426_v42 = vld [vmem:[#allocation31 + $0x78] sm:$0xff]  ;;  %v3441_v43 = vld [vmem:[#allocation31 + $0xf0] sm:$0xff] }
 0x5ff   : > { %3252 = vmatpush2.msra.mxu0 %v3112_v45  ;;  %3323 = vmatpush2.msra.mxu1 %v3176_v46  ;;  %v3425_v44 = vld [vmem:[#allocation31 + $0x70] sm:$0xff]  ;;  %v3408_v45 = vld [vmem:[#allocation30 + $0xf8] sm:$0xff]  ;;  %v3440_v46 = vld [vmem:[#allocation31 + $0xe8] sm:$0xff] }
 0x600   : > { %3253 = vmatprep.subr.mxu0 %v3111_v47  ;;  %3324 = vmatprep.subr.mxu1 %v3175_v48  ;;  %v3392_v47 = vld [vmem:[#allocation30 + $0x78] sm:$0xff]  ;;  %v3424_v48 = vld [vmem:[#allocation31 + $0x68] sm:$0xff] }
 0x601   : > { %3254 = vmatpush2.msra.mxu0 %v3110_v49  ;;  %3325 = vmatpush2.msra.mxu1 %v3174_v50  ;;  %v3407_v49 = vld [vmem:[#allocation30 + $0xf0] sm:$0xff] }
 0x602   : > { %3255 = vmatprep.subr.mxu0 %v3109_v51  ;;  %3326 = vmatprep.subr.mxu1 %v3173_v52  ;;  %v3391_v50 = vld [vmem:[#allocation30 + $0x70] sm:$0xff]  ;;  %v3439_v51 = vld [vmem:[#allocation31 + $0xe0] sm:$0xff]  ;;  %v3406_v52 = vld [vmem:[#allocation30 + $0xe8] sm:$0xff] }
 0x603   : > { %3256 = vmatpush2.msra.mxu0 %v3108_v53  ;;  %3327 = vmatpush2.msra.mxu1 %v3172_v54  ;;  %v3423_v53 = vld [vmem:[#allocation31 + $0x60] sm:$0xff]  ;;  %v3390_v54 = vld [vmem:[#allocation30 + $0x68] sm:$0xff] }
 0x604   : > { %3257 = vmatprep.subr.mxu0 %v3107_v55  ;;  %3328 = vmatprep.subr.mxu1 %v3171_v56  ;;  %v3405_v55 = vld [vmem:[#allocation30 + $0xe0] sm:$0xff]  ;;  %v3438_v56 = vld [vmem:[#allocation31 + $0xd8] sm:$0xff] }
 0x605   : > { %3258 = vmatpush2.msra.mxu0 %v3106_v57  ;;  %3329 = vmatpush2.msra.mxu1 %v3170_v58  ;;  %v3389_v57 = vld [vmem:[#allocation30 + $0x60] sm:$0xff]  ;;  %v3422_v58 = vld [vmem:[#allocation31 + $0x58] sm:$0xff] }
 0x606   : > { %3259 = vmatprep.subr.mxu0 %v3105_v59  ;;  %3330 = vmatprep.subr.mxu1 %v3169_v60  ;;  %v3404_v59 = vld [vmem:[#allocation30 + $0xd8] sm:$0xff]  ;;  %v3437_v60 = vld [vmem:[#allocation31 + $0xd0] sm:$0xff] }
 0x607   : > { %3260 = vmatpush2.msra.mxu0 %v3104_v61  ;;  %3331 = vmatpush2.msra.mxu1 %v3168_v62  ;;  %v3421_v61 = vld [vmem:[#allocation31 + $0x50] sm:$0xff]  ;;  %v3436_v62 = vld [vmem:[#allocation31 + $0xc8] sm:$0xff] }
 0x608   : > { %3261 = vmatprep.subr.mxu0 %v3103_v63  ;;  %3332 = vmatprep.subr.mxu1 %v3167_v1  ;;  %v3420_v63 = vld [vmem:[#allocation31 + $0x48] sm:$0xff]  ;;  %v3435_v1 = vld [vmem:[#allocation31 + $0xc0] sm:$0xff] }
 0x609   : > { %3262 = vmatpush2.msra.mxu0 %v3102_v2  ;;  %3333 = vmatpush2.msra.mxu1 %v3166_v3  ;;  %v3419_v2 = vld [vmem:[#allocation31 + $0x40] sm:$0xff]  ;;  %v3434_v3 = vld [vmem:[#allocation31 + $0xb8] sm:$0xff] }
 0x60a   : > { %3263 = vmatprep.subr.mxu0 %v3101_v4  ;;  %3334 = vmatprep.subr.mxu1 %v3165_v5  ;;  %v3418_v4 = vld [vmem:[#allocation31 + $0x38] sm:$0xff]  ;;  %v3433_v5 = vld [vmem:[#allocation31 + $0xb0] sm:$0xff] }
 0x60b   : > { %3264 = vmatpush2.msra.mxu0 %v3100_v6  ;;  %3335 = vmatpush2.msra.mxu1 %v3164_v7  ;;  %v3417_v6 = vld [vmem:[#allocation31 + $0x30] sm:$0xff]  ;;  %v3432_v7 = vld [vmem:[#allocation31 + $0xa8] sm:$0xff] }
 0x60c   : > { %3265 = vmatprep.subr.mxu0 %v3099_v8  ;;  %3336 = vmatprep.subr.mxu1 %v3163_v9  ;;  %v3388_v8 = vld [vmem:[#allocation30 + $0x58] sm:$0xff]  ;;  %v3416_v9 = vld [vmem:[#allocation31 + $0x28] sm:$0xff] }
 0x60d   : > { %3266 = vmatpush2.msra.mxu0 %v3098_v10  ;;  %3337 = vmatpush2.msra.mxu1 %v3162_v12  ;;  %v3403_v10 = vld [vmem:[#allocation30 + $0xd0] sm:$0xff]  ;;  %v3431_v12 = vld [vmem:[#allocation31 + $0xa0] sm:$0xff] }
 0x60e   : > { %3267 = vmatprep.subr.mxu0 %v3097_v13  ;;  %3338 = vmatprep.subr.mxu1 %v3161_v14  ;;  %v3387_v13 = vld [vmem:[#allocation30 + $0x50] sm:$0xff]  ;;  %v3415_v14 = vld [vmem:[#allocation31 + $0x20] sm:$0xff] }
 0x60f   : > { %3268 = vmatpush2.msra.mxu0 %v3096_v15  ;;  %3339 = vmatpush2.msra.mxu1 %v3160_v17  ;;  %v3402_v15 = vld [vmem:[#allocation30 + $0xc8] sm:$0xff]  ;;  %v3430_v17 = vld [vmem:[#allocation31 + $0x98] sm:$0xff] }
 0x610   : > { %3269 = vmatprep.subr.mxu0 %v3095_v21  ;;  %3340 = vmatprep.subr.mxu1 %v3159_v22  ;;  %v3401_v21 = vld [vmem:[#allocation30 + $0xc0] sm:$0xff]  ;;  %v3429_v22 = vld [vmem:[#allocation31 + $0x90] sm:$0xff] }
 0x611   : > { %3270 = vmatpush2.msra.mxu0 %v3094_v23  ;;  %3341 = vmatpush2.msra.mxu1 %v3158_v24  ;;  %v3385_v23 = vld [vmem:[#allocation30 + $0x40] sm:$0xff]  ;;  %v3413_v24 = vld [vmem:[#allocation31 + $0x10] sm:$0xff] }
 0x612   : > { %3271 = vmatprep.subr.mxu0 %v3093_v27  ;;  %3342 = vmatprep.subr.mxu1 %v3157_v28  ;;  %v3384_v27 = vld [vmem:[#allocation30 + $0x38] sm:$0xff]  ;;  %v3412_v28 = vld [vmem:[#allocation31 + $0x8] sm:$0xff] }
 0x613   : > { %3272 = vmatpush2.msra.mxu0 %v3092_v29  ;;  %3343 = vmatpush2.msra.mxu1 %v3156_v30  ;;  %v3399_v29 = vld [vmem:[#allocation30 + $0xb0] sm:$0xff]  ;;  %v3427_v30 = vld [vmem:[#allocation31 + $0x80] sm:$0xff] }
 0x614   : > { %3273 = vmatprep.subr.mxu0 %v3091_v31  ;;  %3344 = vmatprep.subr.mxu1 %v3155_v32  ;;  %v3383_v31 = vld [vmem:[#allocation30 + $0x30] sm:$0xff]  ;;  %v3411_v32 = vld [vmem:[#allocation31] sm:$0xff] }
 0x615   : > { %3274 = vmatpush2.msra.mxu0 %v3090_v37  ;;  %3345 = vmatpush2.msra.mxu1 %v3154_v38  ;;  %v3381_v37 = vld [vmem:[#allocation30 + $0x20] sm:$0xff]  ;;  %v3396_v38 = vld [vmem:[#allocation30 + $0x98] sm:$0xff] }
 0x616   : > { %3276 = vmatmul.mubr.f32.vlgmr.msra.gmra.mxu0 %v3197_v39  ;;  %3347 = vmatmul.mubr.f32.vlgmr.msra.gmra.mxu1 %v3203_v40  ;;  %v3380_v39 = vld [vmem:[#allocation30 + $0x18] sm:$0xff]  ;;  %v3395_v40 = vld [vmem:[#allocation30 + $0x90] sm:$0xff] }
 0x617   : > { %4400 = vmatprep.subr.mxu0 %v3442_v41  ;;  %4435 = vmatprep.subr.mxu1 %v3408_v45  ;;  %v3379_v41 = vld [vmem:[#allocation30 + $0x10] sm:$0xff]  ;;  %v3377_v45 = vld [vmem:[#allocation30] sm:$0xff] }
 0x618   : > { %4401 = vmatpush3.msra.mxu0 %v3426_v42  ;;  %4436 = vmatpush3.msra.mxu1 %v3392_v47  ;;  %v3394_v42 = vld [vmem:[#allocation30 + $0x88] sm:$0xff] }
 0x619   : > { %4402 = vmatprep.subr.mxu0 %v3441_v43  ;;  %4437 = vmatprep.subr.mxu1 %v3407_v49  ;;  %v3378_v43 = vld [vmem:[#allocation30 + $0x8] sm:$0xff] }
 0x61a   : > { %4403 = vmatpush3.msra.mxu0 %v3425_v44  ;;  %4438 = vmatpush3.msra.mxu1 %v3391_v50  ;;  %v3393_v44 = vld [vmem:[#allocation30 + $0x80] sm:$0xff] }
 0x61b   : > { %4404 = vmatprep.subr.mxu0 %v3440_v46  ;;  %4439 = vmatprep.subr.mxu1 %v3406_v52 }
 0x61c   : > { %4405 = vmatpush3.msra.mxu0 %v3424_v48  ;;  %4440 = vmatpush3.msra.mxu1 %v3390_v54 }
 0x61d   : > { %4406 = vmatprep.subr.mxu0 %v3439_v51  ;;  %4441 = vmatprep.subr.mxu1 %v3405_v55 }
 0x61e   : > { %4407 = vmatpush3.msra.mxu0 %v3423_v53  ;;  %4442 = vmatpush3.msra.mxu1 %v3389_v57  ;;  %v3355_v57 = vld [vmem:[%s6352_s6] sm:$0x3] }
 0x61f   : > { %4408 = vmatprep.subr.mxu0 %v3438_v56  ;;  %4443 = vmatprep.subr.mxu1 %v3404_v59 }
 0x620   : > { %4409 = vmatpush3.msra.mxu0 %v3422_v58  ;;  %4444 = vmatpush3.msra.mxu1 %v3388_v8 }
 0x621   : > { %4410 = vmatprep.subr.mxu0 %v3437_v60  ;;  %4445 = vmatprep.subr.mxu1 %v3403_v10 }
 0x622   : > { %4411 = vmatpush3.msra.mxu0 %v3421_v61  ;;  %4446 = vmatpush3.msra.mxu1 %v3387_v13  ;;  %v3614_v13 = vld [vmem:[#allocation33 + $0x78] sm:$0xff] }
 0x623   : > { %4412 = vmatprep.subr.mxu0 %v3436_v62  ;;  %4447 = vmatprep.subr.mxu1 %v3402_v15  ;;  %v3374_v15 = vld [vmem:[#allocation6 + $0x8] sm:$0x80] }
 0x624   : > { %4413 = vmatpush3.msra.mxu0 %v3420_v63  ;;  %4448 = vmatpush3.msra.mxu1 %v3386_v18  ;;  %v3360_v63 = vrot.slane %v3355_v57, %v2443_v16  ;;  %v3613_v16 = vld [vmem:[#allocation33 + $0x70] sm:$0xff]  ;;  %v3598_v18 = vld [vmem:[#allocation6 + $0x28] sm:$0x1] }
 0x625   : > { %4414 = vmatprep.subr.mxu0 %v3435_v1  ;;  %4449 = vmatprep.subr.mxu1 %v3401_v21 }
 0x626   : > { %4415 = vmatpush3.msra.mxu0 %v3419_v2  ;;  %4450 = vmatpush3.msra.mxu1 %v3385_v23  ;;  %v3520_v23 = vrot.slane %v3374_v15, 7  ;;  %v3748_v15 = vld [vmem:[#allocation36 + $0x30] sm:$0xff] }
 0x627   : > { %4416 = vmatprep.subr.mxu0 %v3434_v3  ;;  %4451 = vmatprep.subr.mxu1 %v3400_v25 }
 0x628   : > { %4417 = vmatpush3.msra.mxu0 %v3418_v4  ;;  %4452 = vmatpush3.msra.mxu1 %v3384_v27 }
 0x629   : > { %4418 = vmatprep.subr.mxu0 %v3433_v5  ;;  %4453 = vmatprep.subr.mxu1 %v3399_v29 }
 0x62a   : > { %4419 = vmatpush3.msra.mxu0 %v3417_v6  ;;  %4454 = vmatpush3.msra.mxu1 %v3383_v31  ;;  %v3364_v6 = vrot.slane %v3355_v57, %v2447_v19  ;;  %v3627_v19 = vld [vmem:[#allocation33 + $0xe0] sm:$0xff]  ;;  %v3600_v57 = vld [vmem:[#allocation33 + $0x8] sm:$0xff] }
 0x62b   : > { %4420 = vmatprep.subr.mxu0 %v3432_v7  ;;  %4455 = vmatprep.subr.mxu1 %v3398_v33  ;;  %v3625_v33 = vld [vmem:[#allocation33 + $0xd0] sm:$0xff] }
 0x62c   : > { %4421 = vmatpush3.msra.mxu0 %v3416_v9  ;;  %4456 = vmatpush3.msra.mxu1 %v3382_v35 }
 0x62d   : > { %4422 = vmatprep.subr.mxu0 %v3431_v12  ;;  %4457 = vmatprep.subr.mxu1 %v3397_v36  ;;  %v3609_v36 = vld [vmem:[#allocation33 + $0x50] sm:$0xff] }
 0x62e   : > { %4423 = vmatpush3.msra.mxu0 %v3415_v14  ;;  %4458 = vmatpush3.msra.mxu1 %v3381_v37  ;;  %v3629_v14 = vld [vmem:[#allocation33 + $0xf0] sm:$0xff] }
 0x62f   : > { %4424 = vmatprep.subr.mxu0 %v3430_v17  ;;  %4459 = vmatprep.subr.mxu1 %v3396_v38  ;;  %v3628_v17 = vld [vmem:[#allocation33 + $0xe8] sm:$0xff] }
 0x630   : > { %4425 = vmatpush3.msra.mxu0 %v3414_v20  ;;  %4460 = vmatpush3.msra.mxu1 %v3380_v39  ;;  %v3373_v20 = vld [vmem:[#allocation6] sm:$0x80]  ;;  %v3624_v38 = vld [vmem:[#allocation33 + $0xc8] sm:$0xff] }
 0x631   : > { %4426 = vmatprep.subr.mxu0 %v3429_v22  ;;  %4461 = vmatprep.subr.mxu1 %v3395_v40  ;;  %v3611_v22 = vld [vmem:[#allocation33 + $0x60] sm:$0xff]  ;;  %v3517_v25 = vrot.slane %v3373_v20, 7  ;;  %v3608_v39 = vld [vmem:[#allocation33 + $0x48] sm:$0xff] }
 0x632   : > { %4427 = vmatpush3.msra.mxu0 %v3413_v24  ;;  %4462 = vmatpush3.msra.mxu1 %v3379_v41  ;;  %v3639_v24 = vrot.slane %v3598_v18, 1  ;;  %v3623_v40 = vld [vmem:[#allocation33 + $0xc0] sm:$0xff]  ;;  %v3734_v18 = vld [vmem:[#allocation34 + $0x48] sm:$0xff] }
 0x633   : > { %4428 = vmatprep.subr.mxu0 %v3428_v26  ;;  %4463 = vmatprep.subr.mxu1 %v3394_v42  ;;  %v3626_v26 = vld [vmem:[#allocation33 + $0xd8] sm:$0xff]  ;;  %v3607_v41 = vld [vmem:[#allocation33 + $0x40] sm:$0xff] }
 0x634   : > { %4429 = vmatpush3.msra.mxu0 %v3412_v28  ;;  %4464 = vmatpush3.msra.mxu1 %v3378_v43  ;;  %v3622_v42 = vld [vmem:[#allocation33 + $0xb8] sm:$0xff]  ;;  %v3746_v20 = vld [vmem:[#allocation36 + $0x20] sm:$0xff] }
 0x635   : > { %4430 = vmatprep.subr.mxu0 %v3427_v30  ;;  %4465 = vmatprep.subr.mxu1 %v3393_v44  ;;  %v3610_v30 = vld [vmem:[#allocation33 + $0x58] sm:$0xff]  ;;  %v3621_v44 = vld [vmem:[#allocation33 + $0xb0] sm:$0xff] }
 0x636   : > { %4431 = vmatpush3.msra.mxu0 %v3411_v32  ;;  %4466 = vmatpush3.msra.mxu1 %v3377_v45  ;;  %v3606_v43 = vld [vmem:[#allocation33 + $0x38] sm:$0xff]  ;;  %v3605_v45 = vld [vmem:[#allocation33 + $0x30] sm:$0xff] }
 0x637   : > { %4470 = vmatprep.subr.mxu0 %v3630_v34  ;;  %4684 = vmatprep.subr.mxu1 %v5662_v0 }
 0x653   : > { %v2807_v46 = vpop.f32.mrf.mxu0  ;;  %v2878_v47 = vpop.f32.mrf.mxu1 }
 0x654   : > { %v2879_v52 = vadd.f32 %v2878_v47, %v2807_v46  ;;  %v3620_v46 = vld [vmem:[#allocation33 + $0xa8] sm:$0xff] }
 0x655   : > { %v2809_v48 = vpop.f32.mrf.mxu0  ;;  %v2880_v49 = vpop.f32.mrf.mxu1  ;;  %v3604_v47 = vld [vmem:[#allocation33 + $0x28] sm:$0xff] }
 0x656   : > { %v2881_v54 = vadd.f32 %v2880_v49, %v2809_v48  ;;  %v3619_v48 = vld [vmem:[#allocation33 + $0xa0] sm:$0xff] }
 0x657   : > { %v3603_v49 = vld [vmem:[#allocation33 + $0x20] sm:$0xff] }
 0x694   : > { %v2974_v50 = vpop.f32.mrf.mxu0  ;;  %v3045_v51 = vpop.f32.mrf.mxu1 }
 0x695   : > { %v2975_v55 = vadd.f32 %v2974_v50, %v2879_v52  ;;  %v3618_v50 = vld [vmem:[#allocation33 + $0x98] sm:$0xff]  ;;  %v3617_v52 = vld [vmem:[#allocation33 + $0x90] sm:$0xff] }
 0x696   : > { %v2976_v53 = vpop.f32.mrf.mxu0  ;;  %v3047_v56 = vpop.f32.mrf.mxu1 }
 0x697   : > { %v2977_v58 = vadd.f32 %v2976_v53, %v2881_v54  ;;  %v3046_v61 = vadd.f32 %v3045_v51, %v2975_v55  ;;  %v3602_v51 = vld [vmem:[#allocation33 + $0x18] sm:$0xff]  ;;  %v3601_v53 = vld [vmem:[#allocation33 + $0x10] sm:$0xff] }
 0x698   : > { %v3597_v55 = vld [vmem:[#allocation6 + $0x20] sm:$0x1] }
 0x699   : > { %v3048_v3 = vadd.f32 %v3047_v56, %v2977_v58  ;;  %v3616_v56 = vld [vmem:[#allocation33 + $0x88] sm:$0xff]  ;;  %v3615_v58 = vld [vmem:[#allocation33 + $0x80] sm:$0xff] }
 0x6d6   : > { %v3277_v59 = vpop.f32.mrf.mxu0  ;;  %v3348_v60 = vpop.f32.mrf.mxu1 }
 0x6d7   : > { %v3349_v62 = vadd.f32 %v3348_v60, %v3277_v59  ;;  %v3636_v60 = vrot.slane %v3597_v55, 1  ;;  %v3906_v55 = vld [vmem:[#allocation37 + $0x38] sm:$0xff] }
 0x6d8   : > { %v3279_v1 = vpop.f32.mrf.mxu0  ;;  %v3350_v2 = vpop.f32.mrf.mxu1 }
 0x6d9   : > { %v3353_v4 = vadd.f32 %v3349_v62, %v3046_v61  ;;  %v3351_v5 = vadd.f32 %v3350_v2, %v3279_v1  ;;  %v3599_v61 = vld [vmem:[#allocation33] sm:$0xff]  ;;  %v3756_v1 = vld [vmem:[#allocation36 + $0x70] sm:$0xff]  ;;  %v3755_v2 = vld [vmem:[#allocation36 + $0x68] sm:$0xff] }
 0x6db   : > { %v3367_v7 = vadd.f32 %v3360_v63, %v3353_v4  ;;  %v3354_v8 = vadd.f32 %v3351_v5, %v3048_v3  ;;  %v3757_v63 = vld [vmem:[#allocation36 + $0x78] sm:$0xff]  ;;  %v3739_v4 = vld [vmem:[#allocation34 + $0x70] sm:$0xff]  ;;  %v3754_v5 = vld [vmem:[#allocation36 + $0x60] sm:$0xff] }
 0x6dc   : > { %v3740_v3 = vld [vmem:[#allocation34 + $0x78] sm:$0xff] }
 0x6dd   : > { %v3369_v9 = vmax.f32 %v3367_v7, 0.0  ;;  %v3368_v10 = vadd.f32 %v3364_v6, %v3354_v8  ;;  %v3753_v6 = vld [vmem:[#allocation36 + $0x58] sm:$0xff]  ;;  %v3738_v7 = vld [vmem:[#allocation34 + $0x68] sm:$0xff]  ;;  %v3752_v8 = vld [vmem:[#allocation36 + $0x50] sm:$0xff] }
 0x6df   : > { %3371 = vst [vmem:[#allocation6 + $0x10] sm:$0xff] %v3369_v9  ;;  %v3370_v12 = vmax.f32 %v3368_v10, 0.0  ;;  %v3751_v10 = vld [vmem:[#allocation36 + $0x48] sm:$0xff] }
 0x6e1   : > { %3372 = vst [vmem:[#allocation6 + $0x18] sm:$0xff] %v3370_v12  ;;  %3507 = vmatprep.mubr.f32.mxu0 %v3370_v12  ;;  %v3736_v12 = vld [vmem:[#allocation34 + $0x58] sm:$0xff] }
 0x6e2   : > { %3508 = vmatmul.mubr.f32.vlgmr.msra.gmra.mxu0 %v3369_v9  ;;  %v3737_v9 = vld [vmem:[#allocation34 + $0x60] sm:$0xff] }
 0x6e3   : > { %4471 = vmatpush3.msra.mxu0 %v3614_v13  ;;  %v3735_v13 = vld [vmem:[#allocation34 + $0x50] sm:$0xff] }
 0x6e4   : > { %4472 = vmatprep.subr.mxu0 %v3629_v14  ;;  %v3750_v14 = vld [vmem:[#allocation36 + $0x40] sm:$0xff] }
 0x6e5   : > { %4473 = vmatpush3.msra.mxu0 %v3613_v16  ;;  %v3749_v16 = vld [vmem:[#allocation36 + $0x38] sm:$0xff] }
 0x6e6   : > { %v3375_v21 = vld [vmem:[#allocation6 + $0x10] sm:$0x7f]  ;;  %4474 = vmatprep.subr.mxu0 %v3628_v17 }
 0x6e7   : > { %4475 = vmatpush3.msra.mxu0 %v3612_v11  ;;  %v3518_v29 = vrot.slane %v3375_v21, 7  ;;  %v3595_v54 = vld [vmem:[#allocation6 + $0x10] sm:$0xfe]  ;;  %v3732_v21 = vld [vmem:[#allocation34 + $0x38] sm:$0xff] }
 0x6e8   : > { %v3376_v27 = vld [vmem:[#allocation6 + $0x18] sm:$0x7f]  ;;  %4476 = vmatprep.subr.mxu0 %v3627_v19  ;;  %v3635_v59 = vrot.slane %v3595_v54, 1  ;;  %v3733_v11 = vld [vmem:[#allocation34 + $0x40] sm:$0xff]  ;;  %v3745_v19 = vld [vmem:[#allocation36 + $0x18] sm:$0xff] }
 0x6e9   : > { %v3596_v28 = vld [vmem:[#allocation6 + $0x18] sm:$0xfe]  ;;  %v3521_v31 = vrot.slane %v3376_v27, 7  ;;  %4477 = vmatpush3.msra.mxu0 %v3611_v22  ;;  %v3519_v37 = vsel %vm2891_vm7, %v3517_v25, %v3518_v29  ;;  %v3729_v27 = vld [vmem:[#allocation34 + $0x20] sm:$0xff] }
 0x6ea   : > { %v3638_v32 = vrot.slane %v3596_v28, 1  ;;  %4478 = vmatprep.subr.mxu0 %v3626_v26  ;;  %v3637_v62 = vsel %vm3194_vm8, %v3635_v59, %v3636_v60  ;;  %v3747_v17 = vld [vmem:[#allocation36 + $0x28] sm:$0xff]  ;;  %v3744_v22 = vld [vmem:[#allocation36 + $0x10] sm:$0xff]  ;;  %v3742_v26 = vld [vmem:[#allocation36] sm:$0xff] }
 0x6eb   : > { %v3522_v34 = vsel %vm2891_vm7, %v3520_v23, %v3521_v31  ;;  %4479 = vmatpush3.msra.mxu0 %v3610_v30  ;;  %v3731_v23 = vld [vmem:[#allocation34 + $0x30] sm:$0xff]  ;;  %v3730_v25 = vld [vmem:[#allocation34 + $0x28] sm:$0xff]  ;;  %v3728_v28 = vld [vmem:[#allocation34 + $0x18] sm:$0xff] }
 0x6ec   : > { %v3640_v35 = vsel %vm3194_vm8, %v3638_v32, %v3639_v24  ;;  %3589 = vmatprep.mubr.f32.mxu1 %v3522_v34  ;;  %4480 = vmatprep.subr.mxu0 %v3625_v33  ;;  %v3743_v24 = vld [vmem:[#allocation36 + $0x8] sm:$0xff]  ;;  %v3727_v29 = vld [vmem:[#allocation34 + $0x10] sm:$0xff]  ;;  %v3725_v31 = vld [vmem:[#allocation34] sm:$0xff] }
 0x6ed   : > { %3707 = vmatprep.mubr.f32.mxu0 %v3640_v35  ;;  %3590 = vmatmul.mubr.f32.vlgmr.msra.gmra.mxu1 %v3519_v37  ;;  %v3726_v30 = vld [vmem:[#allocation34 + $0x8] sm:$0xff]  ;;  %v3907_v54 = vld [vmem:[#allocation37 + $0x40] sm:$0xff]  ;;  %v3902_v59 = vld [vmem:[#allocation37 + $0x18] sm:$0xff] }
 0x6ee   : > { %4481 = vmatpush3.msra.mxu0 %v3609_v36  ;;  %4716 = vmatprep.mubr.msk.f32.mxu1 %vm5663_vm1, %v5662_v0  ;;  %v3901_v60 = vld [vmem:[#allocation37 + $0x10] sm:$0xff] }
 0x6ef   : > { %4482 = vmatprep.subr.mxu0 %v3624_v38  ;;  %4685 = vmatpush3.msra.mxu1 %v3757_v63 }
 0x6f0   : > { %4483 = vmatpush3.msra.mxu0 %v3608_v39  ;;  %4686 = vmatprep.subr.mxu1 %v5662_v0 }
 0x6f1   : > { %4484 = vmatprep.subr.mxu0 %v3623_v40  ;;  %4687 = vmatpush3.msra.mxu1 %v3756_v1 }
 0x6f2   : > { %4485 = vmatpush3.msra.mxu0 %v3607_v41  ;;  %4688 = vmatprep.subr.mxu1 %v5662_v0 }
 0x6f3   : > { %4486 = vmatprep.subr.mxu0 %v3622_v42  ;;  %4689 = vmatpush3.msra.mxu1 %v3755_v2  ;;  %v4336_v42 = vld [vmem:[%s6353_s3] ss:$0 sm:$0xff] }
 0x6f4   : > { %4487 = vmatpush3.msra.mxu0 %v3606_v43  ;;  %4690 = vmatprep.subr.mxu1 %v5662_v0 }
 0x6f5   : > { %4488 = vmatprep.subr.mxu0 %v3621_v44  ;;  %4691 = vmatpush3.msra.mxu1 %v3754_v5 }
 0x6f6   : > { %4489 = vmatpush3.msra.mxu0 %v3605_v45  ;;  %4692 = vmatprep.subr.mxu1 %v5662_v0 }
 0x6f7   : > { %4490 = vmatprep.subr.mxu0 %v3620_v46  ;;  %4693 = vmatpush3.msra.mxu1 %v3753_v6  ;;  %v3914_v46 = vld [vmem:[#allocation37 + $0x78] sm:$0xff] }
 0x6f8   : > { %4491 = vmatpush3.msra.mxu0 %v3604_v47  ;;  %4694 = vmatprep.subr.mxu1 %v5662_v0  ;;  %v3913_v47 = vld [vmem:[#allocation37 + $0x70] sm:$0xff] }
 0x6f9   : > { %4492 = vmatprep.subr.mxu0 %v3619_v48  ;;  %4695 = vmatpush3.msra.mxu1 %v3752_v8  ;;  %v3912_v48 = vld [vmem:[#allocation37 + $0x68] sm:$0xff] }
 0x6fa   : > { %4493 = vmatpush3.msra.mxu0 %v3603_v49  ;;  %4696 = vmatprep.subr.mxu1 %v5662_v0  ;;  %v3911_v49 = vld [vmem:[#allocation37 + $0x60] sm:$0xff] }
 0x6fb   : > { %4494 = vmatprep.subr.mxu0 %v3618_v50  ;;  %4697 = vmatpush3.msra.mxu1 %v3751_v10  ;;  %v3910_v50 = vld [vmem:[#allocation37 + $0x58] sm:$0xff] }
 0x6fc   : > { %4495 = vmatpush3.msra.mxu0 %v3602_v51  ;;  %4698 = vmatprep.subr.mxu1 %v5662_v0 }
 0x6fd   : > { %4496 = vmatprep.subr.mxu0 %v3617_v52  ;;  %4699 = vmatpush3.msra.mxu1 %v3750_v14  ;;  %v3909_v52 = vld [vmem:[#allocation37 + $0x50] sm:$0xff] }
 0x6fe   : > { %4497 = vmatpush3.msra.mxu0 %v3601_v53  ;;  %4700 = vmatprep.subr.mxu1 %v5662_v0  ;;  %v3908_v53 = vld [vmem:[#allocation37 + $0x48] sm:$0xff] }
 0x6ff   : > { %4498 = vmatprep.subr.mxu0 %v3616_v56  ;;  %4701 = vmatpush3.msra.mxu1 %v3749_v16  ;;  %v3905_v56 = vld [vmem:[#allocation37 + $0x30] sm:$0xff] }
 0x700   : > { %4499 = vmatpush3.msra.mxu0 %v3600_v57  ;;  %4702 = vmatprep.subr.mxu1 %v5662_v0  ;;  %v3904_v57 = vld [vmem:[#allocation37 + $0x28] sm:$0xff] }
 0x701   : > { %4500 = vmatprep.subr.mxu0 %v3615_v58  ;;  %4703 = vmatpush3.msra.mxu1 %v3748_v15  ;;  %v3903_v58 = vld [vmem:[#allocation37 + $0x20] sm:$0xff] }
 0x702   : > { %4501 = vmatpush3.msra.mxu0 %v3599_v61  ;;  %4704 = vmatprep.subr.mxu1 %v5662_v0  ;;  %v3900_v61 = vld [vmem:[#allocation37 + $0x8] sm:$0xff] }
 0x703   : > { %3708 = vmatmul.mubr.f32.vlgmr.msra.gmra.mxu0 %v3637_v62  ;;  %4719 = vmatprep.subr.mxu0 %v5662_v0  ;;  %v3899_v62 = vld [vmem:[#allocation37] sm:$0xff] }
 0x704   : > { %4751 = vmatprep.mubr.msk.f32.mxu0 %vm5663_vm1, %v5662_v0  ;;  %4720 = vmatpush3.msra.mxu0 %v3740_v3 }
 0x705   : > { %4721 = vmatprep.subr.mxu0 %v5662_v0  ;;  %4705 = vmatpush3.msra.mxu1 %v3747_v17 }
 0x706   : > { %4722 = vmatpush3.msra.mxu0 %v3739_v4  ;;  %4706 = vmatprep.subr.mxu1 %v5662_v0 }
 0x707   : > { %4723 = vmatprep.subr.mxu0 %v5662_v0  ;;  %4707 = vmatpush3.msra.mxu1 %v3746_v20 }
 0x708   : > { %4724 = vmatpush3.msra.mxu0 %v3738_v7  ;;  %4708 = vmatprep.subr.mxu1 %v5662_v0  ;;  %v4337_v7 = vld [vmem:[%s5812_s27] ss:$0 sm:$0xff] }
 0x709   : > { %4725 = vmatprep.subr.mxu0 %v5662_v0  ;;  %4709 = vmatpush3.msra.mxu1 %v3745_v19 }
 0x70a   : > { %4726 = vmatpush3.msra.mxu0 %v3737_v9  ;;  %4710 = vmatprep.subr.mxu1 %v5662_v0 }
 0x70b   : > { %4727 = vmatprep.subr.mxu0 %v5662_v0  ;;  %4711 = vmatpush3.msra.mxu1 %v3744_v22 }
 0x70c   : > { %4728 = vmatpush3.msra.mxu0 %v3736_v12  ;;  %4712 = vmatprep.subr.mxu1 %v5662_v0 }
 0x70d   : > { %4729 = vmatprep.subr.mxu0 %v5662_v0  ;;  %4713 = vmatpush3.msra.mxu1 %v3743_v24 }
 0x70e   : > { %4730 = vmatpush3.msra.mxu0 %v3735_v13  ;;  %4714 = vmatprep.subr.mxu1 %v5662_v0 }
 0x70f   : > { %4731 = vmatprep.subr.mxu0 %v5662_v0  ;;  %4715 = vmatpush3.msra.mxu1 %v3742_v26 }
 0x710   : > { %4732 = vmatpush3.msra.mxu0 %v3734_v18  ;;  %4754 = vmatprep.subr.mxu1 %v5662_v0 }
 0x711   : > { %4733 = vmatprep.subr.mxu0 %v5662_v0 }
 0x712   : > { %4734 = vmatpush3.msra.mxu0 %v3733_v11 }
 0x713   : > { %4735 = vmatprep.subr.mxu0 %v5662_v0 }
 0x714   : > { %4736 = vmatpush3.msra.mxu0 %v3732_v21 }
 0x715   : > { %4737 = vmatprep.subr.mxu0 %v5662_v0 }
 0x716   : > { %4738 = vmatpush3.msra.mxu0 %v3731_v23 }
 0x717   : > { %4739 = vmatprep.subr.mxu0 %v5662_v0 }
 0x718   : > { %4740 = vmatpush3.msra.mxu0 %v3730_v25 }
 0x719   : > { %4741 = vmatprep.subr.mxu0 %v5662_v0 }
 0x71a   : > { %4742 = vmatpush3.msra.mxu0 %v3729_v27 }
 0x71b   : > { %4743 = vmatprep.subr.mxu0 %v5662_v0 }
 0x71c   : > { %4744 = vmatpush3.msra.mxu0 %v3728_v28 }
 0x71d   : > { %4745 = vmatprep.subr.mxu0 %v5662_v0 }
 0x71e   : > { %4746 = vmatpush3.msra.mxu0 %v3727_v29 }
 0x71f   : > { %4747 = vmatprep.subr.mxu0 %v5662_v0 }
 0x720   : > { %4748 = vmatpush3.msra.mxu0 %v3726_v30 }
 0x721   : > { %4749 = vmatprep.subr.mxu0 %v5662_v0 }
 0x722   : > { %4750 = vmatpush3.msra.mxu0 %v3725_v31 }
 0x7a2   : > { %v4432_v33 = vpop.f32.mrf.mxu0 }
 0x7a4   : > { %v4433_v35 = vpop.f32.mrf.mxu0 }
 0x7a5   : > { %v4434_v38 = vadd.f32 %v4433_v35, %v4432_v33 }
 0x7ad   : > { %v4467_v32 = vpop.f32.mrf.mxu1 }
 0x7af   : > { %v4468_v34 = vpop.f32.mrf.mxu1 }
 0x7b0   : > { %v4469_v36 = vadd.f32 %v4468_v34, %v4467_v32 }
 0x7b2   : > { %v3592_v40 = vadd.f32 %v4469_v36, %v4434_v38 }
 0x7c3   : > { %v4502_v37 = vpop.f32.mrf.mxu0 }
 0x7c5   : > { %v4503_v39 = vpop.f32.mrf.mxu0 }
 0x7c6   : > { %v4504_v41 = vadd.f32 %v4503_v39, %v4502_v37 }
 0x7c8   : > { %v3713_v43 = vadd.f32 %v4504_v41, %v3592_v40 }
 0x7ca   : > { %v3721_v44 = vadd.f32 %v4336_v42, %v3713_v43 }
 0x7cc   : > { %v3722_v45 = vmax.f32 %v3721_v44, 0.0 }
 0x7ce   : > { %3723 = vst [vmem:[#allocation7 + $0x8] sm:$0xff] %v3722_v45  ;;  %4717 = vmatmul.mubr.f32.vlgmr.msra.gmra.mxu1 %v3722_v45 }
 0x7cf   : > { %4755 = vmatpush3.msra.mxu1 %v3914_v46  ;;  %4786 = vmatprep.mubr.msk.f32.mxu1 %vm5663_vm1, %v5662_v0 }
 0x7d0   : > { %4756 = vmatprep.subr.mxu1 %v5662_v0 }
 0x7d1   : > { %4757 = vmatpush3.msra.mxu1 %v3913_v47 }
 0x7d2   : > { %4758 = vmatprep.subr.mxu1 %v5662_v0 }
 0x7d3   : > { %4759 = vmatpush3.msra.mxu1 %v3912_v48 }
 0x7d4   : > { %4760 = vmatprep.subr.mxu1 %v5662_v0 }
 0x7d5   : > { %v3724_v51 = vld [vmem:[#allocation7 + $0x7] sm:$0xff]  ;;  %4761 = vmatpush3.msra.mxu1 %v3911_v49 }
 0x7d6   : > { %4752 = vmatmul.mubr.f32.vlgmr.msra.gmra.mxu0 %v3724_v51  ;;  %4762 = vmatprep.subr.mxu1 %v5662_v0  ;;  %v3898_v63 = vld [vmem:[#allocation7 + $0x9] sm:$0xff] }
 0x7d7   : > { %4763 = vmatpush3.msra.mxu1 %v3910_v50 }
 0x7d8   : > { %4764 = vmatprep.subr.mxu1 %v5662_v0 }
 0x7d9   : > { %4765 = vmatpush3.msra.mxu1 %v3909_v52 }
 0x7da   : > { %4766 = vmatprep.subr.mxu1 %v5662_v0 }
 0x7db   : > { %4767 = vmatpush3.msra.mxu1 %v3908_v53 }
 0x7dc   : > { %4768 = vmatprep.subr.mxu1 %v5662_v0 }
 0x7dd   : > { %4769 = vmatpush3.msra.mxu1 %v3907_v54 }
 0x7de   : > { %4770 = vmatprep.subr.mxu1 %v5662_v0 }
 0x7df   : > { %4771 = vmatpush3.msra.mxu1 %v3906_v55 }
 0x7e0   : > { %4772 = vmatprep.subr.mxu1 %v5662_v0 }
 0x7e1   : > { %4773 = vmatpush3.msra.mxu1 %v3905_v56 }
 0x7e2   : > { %4774 = vmatprep.subr.mxu1 %v5662_v0 }
 0x7e3   : > { %4775 = vmatpush3.msra.mxu1 %v3904_v57 }
 0x7e4   : > { %4776 = vmatprep.subr.mxu1 %v5662_v0 }
 0x7e5   : > { %4777 = vmatpush3.msra.mxu1 %v3903_v58 }
 0x7e6   : > { %4778 = vmatprep.subr.mxu1 %v5662_v0 }
 0x7e7   : > { %4779 = vmatpush3.msra.mxu1 %v3902_v59 }
 0x7e8   : > { %4780 = vmatprep.subr.mxu1 %v5662_v0 }
 0x7e9   : > { %4781 = vmatpush3.msra.mxu1 %v3901_v60 }
 0x7ea   : > { %4782 = vmatprep.subr.mxu1 %v5662_v0 }
 0x7eb   : > { %4783 = vmatpush3.msra.mxu1 %v3900_v61 }
 0x7ec   : > { %4784 = vmatprep.subr.mxu1 %v5662_v0 }
 0x7ed   : > { %4785 = vmatpush3.msra.mxu1 %v3899_v62 }
 0x7ee   : > { %4787 = vmatmul.mubr.f32.vlgmr.msra.gmra.mxu1 %v3898_v63 }
 0x88e   : > { %v3824_v1 = vpop.f32.mrf.mxu1 }
 0x890   : > { %v4718_v2 = vpop.f32.mrf.mxu1 }
 0x896   : > { %v3894_v3 = vpop.f32.mrf.mxu0 }
 0x897   : > { %v3895_v5 = vadd.f32 %v3894_v3, %v3824_v1 }
 0x898   : > { %v4753_v4 = vpop.f32.mrf.mxu0 }
 0x8ae   : > { %v3981_v6 = vpop.f32.mrf.mxu1 }
 0x8af   : > { %v3985_v8 = vadd.f32 %v3981_v6, %v3895_v5 }
 0x8b0   : > { %v4788_v9 = vpop.f32.mrf.mxu1 }
 0x8b1   : > { %v3993_v10 = vadd.f32 %v4337_v7, %v3985_v8 }
 0x8b3   : > { %v3994_v12 = vmax.f32 %v3993_v10, 0.0 }
 0x8b5   : > { %3995 = vst.msk [vmem:[%s1184_s4] sm:$0xff] %vm1214_vm2, %v3994_v12 }
 0x8b6 PF: > { %s80_s7 = sadd.s32 1, %s5605_s7  }
 0x8b7   : > { %p77_p0 = scmp.ge.s32.totalorder %s80_s7, 4  }
 0x8b9   :  { %79 = sbr.rel (!%p77_p0) target bundleno = 58 (0x3a), region = 280 }
 0x8be   :  { %4015 = vsyncpa [#allocation9], 1 }
 0x8bf   :  { %4017 = vsyncpa [#allocation9 + $0x1], 1 }
 0x8c0   :  { %4018 = vsyncpa [#allocation11], 1 }
 0x8c1   :  { %4019 = vsyncpa [#allocation14], 1 }
 0x8c2   :  { %4020 = vsyncpa [#allocation17], 1 }
 0x8c3   :  { %4021 = vsyncpa [#allocation20], 1 }
 0x8c4   :  { %4022 = vsyncpa [#allocation23], 1 }
 0x8c5   :  { %4023 = vsyncpa [#allocation26], 1 }
 0x8c6   :  { %4024 = vsyncpa [#allocation29], 1 }
 0x8c7   :  { %4025 = vsyncpa [#allocation32], 1 }
 0x8c8   :  { %4026 = vsyncpa [#allocation35], 1 }
 0x8c9   :  { %4027 = vsyncpa [#allocation38], 1 }

</bundles_post_ra>
